<compile_context>
chip_gen: v7x
topology: tpu7x:2x2x1
jax: 0.10.0
libtpu: 0.0.40
codegen_flags: <defaults>
</compile_context>

<pallas_src>
import functools
import math

import jax
import jax.numpy as jnp
import numpy as np
from jax import lax
from jax.experimental import pallas as pl
from jax.experimental.pallas import tpu as pltpu


# ---------------------------------------------------------------------------
# Tiled GEMM kernel (used for the two conv-as-GEMM stages)
# ---------------------------------------------------------------------------
def _linear_kernel(x_ref, w_ref, b_ref, o_ref, *, relu):
    x = x_ref[...].astype(jnp.bfloat16)
    w = w_ref[...].astype(jnp.bfloat16)
    y = jnp.dot(x, w, preferred_element_type=jnp.float32) + b_ref[...]
    if relu:
        y = jnp.maximum(y, 0.0)
    o_ref[...] = y


def pallas_linear(x, w, b, relu=False):
    """y = x @ w + b over an (M-tile, N-tile) grid; K kept whole per tile.

    # TODO(synk): add a K-tiled accumulator (grid 3rd axis + VMEM scratch)
    # before scaling M/K/N beyond what fits one VMEM block per tile.
    """
    M, K = x.shape
    N = w.shape[1]
    tm = 128 if M % 128 == 0 else M
    tn = 128 if N % 128 == 0 else N
    grid = (M // tm, N // tn)
    return pl.pallas_call(
        functools.partial(_linear_kernel, relu=relu),
        out_shape=jax.ShapeDtypeStruct((M, N), jnp.float32),
        grid=grid,
        in_specs=[
            pl.BlockSpec((tm, K), lambda i, j: (i, 0)),
            pl.BlockSpec((K, tn), lambda i, j: (0, j)),
            pl.BlockSpec((1, tn), lambda i, j: (0, j)),
        ],
        out_specs=pl.BlockSpec((tm, tn), lambda i, j: (i, j)),
        compiler_params=pltpu.CompilerParams(
            dimension_semantics=("parallel", "parallel")),
    )(x, w, b.reshape(1, N))


# ---------------------------------------------------------------------------
# Fused transformer-encoder stack (all layers in one pallas_call)
# ---------------------------------------------------------------------------
def _layernorm(x, w, b, eps=1e-5):
    mu = jnp.mean(x, axis=-1, keepdims=True)
    var = jnp.mean((x - mu) ** 2, axis=-1, keepdims=True)
    return (x - mu) * lax.rsqrt(var + eps) * w + b


def _encoder_stack_kernel(x_ref, wqkv_ref, bqkv_ref, wo_ref, bo_ref,
                          ln1w_ref, ln1b_ref, w1_ref, b1_ref,
                          w2_ref, b2_ref, ln2w_ref, ln2b_ref,
                          o_ref, attn_sc, *, nhead, s_real):
    """Grid step = (batch b, layer l).  Post-norm TransformerEncoderLayer,
    eval mode (dropout = identity).  The activation lives in o_ref, whose
    block index is constant across l, so the whole stack stays in VMEM."""
    l = pl.program_id(1)

    @pl.when(l == 0)
    def _():
        o_ref[...] = x_ref[...]           # load the (pos-encoded) tokens once

    x = o_ref[0]                          # [S, D] float32
    S, D = x.shape
    hd = D // nhead
    scale = 1.0 / math.sqrt(hd)

    # ---------------- self-attention (bf16 MXU, f32 accumulate) ------------
    xb = x.astype(jnp.bfloat16)
    qkv = jnp.dot(xb, wqkv_ref[0], preferred_element_type=jnp.float32) + bqkv_ref[0]
    q, k, v = qkv[:, :D], qkv[:, D:2 * D], qkv[:, 2 * D:]

    # mask padded key positions (sequence padded from s_real up to S)
    key_mask = lax.broadcasted_iota(jnp.int32, (1, S), 1) < s_real

    for h in range(nhead):                # static unroll, static lane slices
        sl = slice(h * hd, (h + 1) * hd)
        qh = q[:, sl].astype(jnp.bfloat16)
        kh = k[:, sl].astype(jnp.bfloat16)
        vh = v[:, sl].astype(jnp.bfloat16)
        # contraction expressed directly: no materialized kh.T
        scores = lax.dot_general(qh, kh, (((1,), (1,)), ((), ())),
                                 preferred_element_type=jnp.float32) * scale
        scores = jnp.where(key_mask, scores, -1e30)
        scores = scores - jnp.max(scores, axis=-1, keepdims=True)
        p = jnp.exp(scores)
        p = p * pl.reciprocal(jnp.sum(p, axis=-1, keepdims=True), approx=True)
        ctx = jnp.dot(p.astype(jnp.bfloat16), vh,
                      preferred_element_type=jnp.float32)
        attn_sc[:, sl] = ctx              # write heads at static lane offsets

    attn = jnp.dot(attn_sc[...].astype(jnp.bfloat16), wo_ref[0],
                   preferred_element_type=jnp.float32) + bo_ref[0]
    x = _layernorm(x + attn, ln1w_ref[0], ln1b_ref[0])

    # ---------------- feed-forward ------------------------------------------
    # TODO(synk): tile w1/w2 over K/N inside this kernel before scaling D/dff
    # to production sizes (whole-weight residency would exceed v7x VMEM).
    ff = jnp.dot(x.astype(jnp.bfloat16), w1_ref[0],
                 preferred_element_type=jnp.float32) + b1_ref[0]
    ff = jnp.maximum(ff, 0.0)
    ff = jnp.dot(ff.astype(jnp.bfloat16), w2_ref[0],
                 preferred_element_type=jnp.float32) + b2_ref[0]
    x = _layernorm(x + ff, ln2w_ref[0], ln2b_ref[0])

    o_ref[0] = x


_STACK_NAMES = ['wqkv', 'bqkv', 'wo', 'bo', 'ln1w', 'ln1b',
                'w1', 'b1', 'w2', 'b2', 'ln2w', 'ln2b']


def pallas_encoder_stack(x, stack, nhead, s_real):
    B, S, D = x.shape
    L = stack['wqkv'].shape[0]
    weights = [stack[n] for n in _STACK_NAMES]

    in_specs = [pl.BlockSpec((1, S, D), lambda b, l: (b, 0, 0))]
    for w in weights:
        in_specs.append(pl.BlockSpec((1,) + w.shape[1:],
                                     lambda b, l: (l, 0, 0)))

    return pl.pallas_call(
        functools.partial(_encoder_stack_kernel, nhead=nhead, s_real=s_real),
        out_shape=jax.ShapeDtypeStruct((B, S, D), jnp.float32),
        grid=(B, L),
        in_specs=in_specs,
        out_specs=pl.BlockSpec((1, S, D), lambda b, l: (b, 0, 0)),
        scratch_shapes=[pltpu.VMEM((S, D), jnp.float32)],
        compiler_params=pltpu.CompilerParams(
            dimension_semantics=("parallel", "arbitrary")),
    )(x, *weights)


# ---------------------------------------------------------------------------
# Fused classification head: CLS extraction + fc1 + ReLU + fc2
# ---------------------------------------------------------------------------
def _head_kernel(x_ref, w1_ref, b1_ref, w2_ref, b2_ref, o_ref):
    cls = x_ref[:, 0, :].astype(jnp.bfloat16)                   # [B, D]
    h = jnp.dot(cls, w1_ref[...], preferred_element_type=jnp.float32) + b1_ref[...]
    h = jnp.maximum(h, 0.0)
    y = jnp.dot(h.astype(jnp.bfloat16), w2_ref[...],
                preferred_element_type=jnp.float32) + b2_ref[...]
    o_ref[...] = y


def pallas_head(seq, w1, b1, w2, b2):
    B = seq.shape[0]
    n1, n2 = w1.shape[1], w2.shape[1]
    return pl.pallas_call(
        _head_kernel,
        out_shape=jax.ShapeDtypeStruct((B, n2), jnp.float32),
    )(seq, w1, b1.reshape(1, n1), w2, b2.reshape(1, n2))


# ---------------------------------------------------------------------------
# Plain-JAX glue: padding, im2col, positional encoding, parameter setup
# ---------------------------------------------------------------------------
def pad_to_multiple_of_4(x):
    B, C, H, W = x.shape
    tH = math.ceil(H / 4) * 4
    tW = math.ceil(W / 4) * 4
    return jnp.pad(x, ((0, 0), (0, 0), (0, tH - H), (0, tW - W)))


def im2col(x_nchw, kh=3, kw=3, stride=2, pad=1, k_pad=None):
    """[B,C,H,W] -> [B*Ho*Wo, C*kh*kw] (channel-major, matching torch weight
    layout), optionally zero-padded along K to an MXU-friendly width."""
    B, C, H, W = x_nchw.shape
    xp = jnp.pad(x_nchw, ((0, 0), (0, 0), (pad, pad), (pad, pad)))
    Ho = (H + 2 * pad - kh) // stride + 1
    Wo = (W + 2 * pad - kw) // stride + 1
    cols = []
    for i in range(kh):
        for j in range(kw):
            cols.append(xp[:, :, i:i + stride * Ho:stride, j:j + stride * Wo:stride])
    col = jnp.stack(cols, axis=0).reshape(kh, kw, B, C, Ho, Wo)
    col = col.transpose(2, 4, 5, 3, 0, 1).reshape(B * Ho * Wo, C * kh * kw)
    if k_pad is not None and k_pad > C * kh * kw:
        col = jnp.pad(col, ((0, 0), (0, k_pad - C * kh * kw)))
    return col, Ho, Wo


def get_sinusoid_encoding(n_position, d_hid):
    def angle_vec(pos):
        return [pos / np.power(10000, 2 * (j // 2) / d_hid) for j in range(d_hid)]
    table = np.array([angle_vec(p) for p in range(n_position)])
    table[:, 0::2] = np.sin(table[:, 0::2])
    table[:, 1::2] = np.cos(table[:, 1::2])
    return jnp.asarray(table[None], dtype=jnp.float32)          # (1, n_pos, d)


def init_params(key, C_in, D, nhead, dff, num_layers, patch_num):
    s = 0.02
    keys = jax.random.split(key, 8 + num_layers)
    p = {}

    # conv1 (C_in -> 64) lowered to a GEMM padded to K=128 / Cout=128.
    conv1_w = jax.random.normal(keys[0], (64, C_in, 3, 3), jnp.float32) * s
    K1 = C_in * 9
    w2d = jnp.pad(conv1_w.reshape(64, K1).T, ((0, 128 - K1), (0, 128 - 64)))
    p['conv1_w2d'] = w2d.astype(jnp.bfloat16)                   # [128, 128]
    p['conv1_b'] = jnp.zeros((128,), jnp.float32)               # padded bias

    # conv2 (64 -> D); input channels zero-padded to 128 to match conv1's
    # padded (all-zero extra channels) output -> numerically identical.
    conv2_w = jax.random.normal(keys[1], (D, 64, 3, 3), jnp.float32) * s
    conv2_w = jnp.pad(conv2_w, ((0, 0), (0, 128 - 64), (0, 0), (0, 0)))
    p['conv2_w2d'] = conv2_w.reshape(D, 128 * 9).T.astype(jnp.bfloat16)  # [1152, D]
    p['conv2_b'] = jnp.zeros((D,), jnp.float32)

    p['cls_token'] = jax.random.normal(keys[2], (1, 1, D), jnp.float32)
    p['pos_embedding'] = get_sinusoid_encoding(patch_num + 1, D)

    def layer(k):
        k = jax.random.split(k, 4)
        return {
            'wqkv': (jax.random.normal(k[0], (D, 3 * D), jnp.float32) * s).astype(jnp.bfloat16),
            'bqkv': jnp.zeros((1, 3 * D), jnp.float32),
            'wo':   (jax.random.normal(k[1], (D, D), jnp.float32) * s).astype(jnp.bfloat16),
            'bo':   jnp.zeros((1, D), jnp.float32),
            'ln1w': jnp.ones((1, D), jnp.float32),
            'ln1b': jnp.zeros((1, D), jnp.float32),
            'w1':   (jax.random.normal(k[2], (D, dff), jnp.float32) * s).astype(jnp.bfloat16),
            'b1':   jnp.zeros((1, dff), jnp.float32),
            'w2':   (jax.random.normal(k[3], (dff, D), jnp.float32) * s).astype(jnp.bfloat16),
            'b2':   jnp.zeros((1, D), jnp.float32),
            'ln2w': jnp.ones((1, D), jnp.float32),
            'ln2b': jnp.zeros((1, D), jnp.float32),
        }

    layers = [layer(keys[3 + l]) for l in range(num_layers)]
    # Stack per-layer weights along a leading L axis for the fused kernel.
    p['stack'] = {name: jnp.stack([lp[name] for lp in layers], axis=0)
                  for name in _STACK_NAMES}

    p['fc1_w'] = (jax.random.normal(keys[3 + num_layers], (D, 128), jnp.float32) * s).astype(jnp.bfloat16)
    p['fc1_b'] = jnp.zeros((128,), jnp.float32)
    p['fc2_w'] = (jax.random.normal(keys[4 + num_layers], (128, 2), jnp.float32) * s).astype(jnp.bfloat16)
    p['fc2_b'] = jnp.zeros((2,), jnp.float32)
    return p


# ---------------------------------------------------------------------------
# Full forward pass
# ---------------------------------------------------------------------------
def transformer_model_forward(params, x, nhead, s_pad):
    B = x.shape[0]
    x = pad_to_multiple_of_4(x)                                  # [B, C, M', N']

    # CNN: conv(C->64, s2) + ReLU, conv(64->D, s2) as padded im2col GEMMs.
    col1, Ho1, Wo1 = im2col(x, k_pad=128)
    y1 = pallas_linear(col1, params['conv1_w2d'], params['conv1_b'], relu=True)
    h = y1.reshape(B, Ho1, Wo1, 128).transpose(0, 3, 1, 2)       # NCHW, ch 64.. == 0
    col2, Ho2, Wo2 = im2col(h)                                   # K = 128*9 = 1152
    y2 = pallas_linear(col2, params['conv2_w2d'], params['conv2_b'], relu=False)
    D = y2.shape[-1]
    tok = y2.reshape(B, Ho2 * Wo2, D)                            # == flatten(2).T

    # CLS token + sinusoidal positional encoding (plain-JAX glue), then pad
    # the sequence to a sublane-aligned length for the encoder kernel.
    cls = jnp.broadcast_to(params['cls_token'], (B, 1, D))
    seq = jnp.concatenate([cls, tok], axis=1)                    # [B, s_real, D]
    s_real = seq.shape[1]
    seq = seq + params['pos_embedding'][:, :s_real, :]
    seq = jnp.pad(seq, ((0, 0), (0, s_pad - s_real), (0, 0)))    # [B, s_pad, D]

    # Fused transformer encoder stack (single pallas_call, grid=(B, L)).
    seq = pallas_encoder_stack(seq, params['stack'], nhead=nhead, s_real=s_real)

    # Fused head: CLS extraction + fc1 + ReLU + fc2.
    return pallas_head(seq, params['fc1_w'], params['fc1_b'],
                       params['fc2_w'], params['fc2_b'])         # [B, 2]


# ---------------------------------------------------------------------------
if __name__ == "__main__":
    # Small configuration consistent with the module's forward pass.
    B, C, M, N = 2, 2, 16, 16
    D, nhead, dff, num_layers = 128, 4, 256, 2
    M_p, N_p = math.ceil(M / 4), math.ceil(N / 4)
    patch_num = M_p * N_p                                        # 16
    s_real = patch_num + 1                                       # 17
    s_pad = ((s_real + 7) // 8) * 8                              # 24

    key = jax.random.PRNGKey(0)
    pkey, xkey = jax.random.split(key)
    params = init_params(pkey, C_in=C, D=D, nhead=nhead, dff=dff,
                         num_layers=num_layers, patch_num=patch_num)
    x = jax.random.normal(xkey, (B, C, M, N), jnp.float32)

    fwd = jax.jit(functools.partial(transformer_model_forward,
                                    nhead=nhead, s_pad=s_pad))
    out = jax.block_until_ready(fwd(params, x))
    assert out.shape == (B, 2)
    assert bool(jnp.all(jnp.isfinite(out)))
    print("KERNEL_OK")
</pallas_src>

<mosaic_0001>
module attributes {stable_mosaic.version = 11 : i64} {
  func.func @_linear_kernel(%arg0: i32, %arg1: i32, %arg2: memref<128x128xf32, #tpu.memory_space<vmem>>, %arg3: memref<128x128xbf16, #tpu.memory_space<vmem>>, %arg4: memref<1x128xf32, #tpu.memory_space<vmem>>, %arg5: memref<128x128xf32, #tpu.memory_space<vmem>>) attributes {dimension_semantics = [#tpu.dimension_semantics<parallel>, #tpu.dimension_semantics<parallel>], iteration_bounds = array<i64: 1, 1>, scalar_prefetch = 0 : i64, scratch_operands = 0 : i64, tpu.core_type = #tpu.core_type<tc>, window_params = [{transform_indices = @transform_0, window_bounds = array<i64: 128, 128>}, {transform_indices = @transform_1, window_bounds = array<i64: 128, 128>}, {transform_indices = @transform_2, window_bounds = array<i64: 1, 128>}, {transform_indices = @transform_3, window_bounds = array<i64: 128, 128>}]} {
    %c0 = arith.constant 0 : index
    %c0_0 = arith.constant 0 : index
    %0 = vector.load %arg2[%c0, %c0_0] : memref<128x128xf32, #tpu.memory_space<vmem>>, vector<128x128xf32>
    %1 = arith.truncf %0 : vector<128x128xf32> to vector<128x128xbf16>
    %c0_1 = arith.constant 0 : index
    %c0_2 = arith.constant 0 : index
    %2 = vector.load %arg3[%c0_1, %c0_2] : memref<128x128xbf16, #tpu.memory_space<vmem>>, vector<128x128xbf16>
    %cst = arith.constant dense<0.000000e+00> : vector<128x128xf32>
    %3 = tpu.matmul %1, %2, %cst {dimension_numbers = #tpu.dot_dimension_numbers<[1], [0], [0], [1], [0, 0, 1, 1], [], []>} : vector<128x128xbf16>, vector<128x128xbf16>, vector<128x128xf32> -> vector<128x128xf32>
    %c0_3 = arith.constant 0 : index
    %c0_4 = arith.constant 0 : index
    %4 = vector.load %arg4[%c0_3, %c0_4] : memref<1x128xf32, #tpu.memory_space<vmem>>, vector<1x128xf32>
    %5 = vector.broadcast %4 : vector<1x128xf32> to vector<128x128xf32>
    %6 = arith.addf %3, %5 : vector<128x128xf32>
    %cst_5 = arith.constant 0.000000e+00 : f32
    %7 = vector.broadcast %cst_5 : f32 to vector<128x128xf32>
    %8 = arith.maximumf %6, %7 : vector<128x128xf32>
    %c0_6 = arith.constant 0 : index
    %c0_7 = arith.constant 0 : index
    %9 = vector.load %arg5[%c0_6, %c0_7] : memref<128x128xf32, #tpu.memory_space<vmem>>, vector<128x128xf32>
    tpu.vector_store %arg5[%c0_6, %c0_7], %8 {strides = array<i32>} : memref<128x128xf32, #tpu.memory_space<vmem>>, vector<128x128xf32>,
    return
  }
  func.func @transform_0(%arg0: i32, %arg1: i32) -> (i32, i32) {
    %c0_i32 = arith.constant 0 : i32
    %c0_i32_0 = arith.constant 0 : i32
    return %arg0, %c0_i32 : i32, i32
  }
  func.func @transform_1(%arg0: i32, %arg1: i32) -> (i32, i32) {
    %c0_i32 = arith.constant 0 : i32
    %c0_i32_0 = arith.constant 0 : i32
    return %c0_i32, %arg1 : i32, i32
  }
  func.func @transform_2(%arg0: i32, %arg1: i32) -> (i32, i32) {
    %c0_i32 = arith.constant 0 : i32
    %c0_i32_0 = arith.constant 0 : i32
    return %c0_i32, %arg1 : i32, i32
  }
  func.func @transform_3(%arg0: i32, %arg1: i32) -> (i32, i32) {
    %c0_i32 = arith.constant 0 : i32
    return %arg0, %arg1 : i32, i32
  }
}

module attributes {stable_mosaic.version = 11 : i64} {
  func.func @_linear_kernel(%arg0: i32, %arg1: i32, %arg2: memref<32x1152xf32, #tpu.memory_space<vmem>>, %arg3: memref<1152x128xbf16, #tpu.memory_space<vmem>>, %arg4: memref<1x128xf32, #tpu.memory_space<vmem>>, %arg5: memref<32x128xf32, #tpu.memory_space<vmem>>) attributes {dimension_semantics = [#tpu.dimension_semantics<parallel>, #tpu.dimension_semantics<parallel>], iteration_bounds = array<i64: 1, 1>, scalar_prefetch = 0 : i64, scratch_operands = 0 : i64, tpu.core_type = #tpu.core_type<tc>, window_params = [{transform_indices = @transform_0, window_bounds = array<i64: 32, 1152>}, {transform_indices = @transform_1, window_bounds = array<i64: 1152, 128>}, {transform_indices = @transform_2, window_bounds = array<i64: 1, 128>}, {transform_indices = @transform_3, window_bounds = array<i64: 32, 128>}]} {
    %c0 = arith.constant 0 : index
    %c0_0 = arith.constant 0 : index
    %0 = vector.load %arg2[%c0, %c0_0] : memref<32x1152xf32, #tpu.memory_space<vmem>>, vector<32x1152xf32>
    %1 = arith.truncf %0 : vector<32x1152xf32> to vector<32x1152xbf16>
    %c0_1 = arith.constant 0 : index
    %c0_2 = arith.constant 0 : index
    %2 = vector.load %arg3[%c0_1, %c0_2] : memref<1152x128xbf16, #tpu.memory_space<vmem>>, vector<1152x128xbf16>
    %cst = arith.constant dense<0.000000e+00> : vector<32x128xf32>
    %3 = tpu.matmul %1, %2, %cst {dimension_numbers = #tpu.dot_dimension_numbers<[1], [0], [0], [1], [0, 0, 1, 1], [], []>} : vector<32x1152xbf16>, vector<1152x128xbf16>, vector<32x128xf32> -> vector<32x128xf32>
    %c0_3 = arith.constant 0 : index
    %c0_4 = arith.constant 0 : index
    %4 = vector.load %arg4[%c0_3, %c0_4] : memref<1x128xf32, #tpu.memory_space<vmem>>, vector<1x128xf32>
    %5 = vector.broadcast %4 : vector<1x128xf32> to vector<32x128xf32>
    %6 = arith.addf %3, %5 : vector<32x128xf32>
    %c0_5 = arith.constant 0 : index
    %c0_6 = arith.constant 0 : index
    %7 = vector.load %arg5[%c0_5, %c0_6] : memref<32x128xf32, #tpu.memory_space<vmem>>, vector<32x128xf32>
    tpu.vector_store %arg5[%c0_5, %c0_6], %6 {strides = array<i32>} : memref<32x128xf32, #tpu.memory_space<vmem>>, vector<32x128xf32>,
    return
  }
  func.func @transform_0(%arg0: i32, %arg1: i32) -> (i32, i32) {
    %c0_i32 = arith.constant 0 : i32
    %c0_i32_0 = arith.constant 0 : i32
    return %arg0, %c0_i32 : i32, i32
  }
  func.func @transform_1(%arg0: i32, %arg1: i32) -> (i32, i32) {
    %c0_i32 = arith.constant 0 : i32
    %c0_i32_0 = arith.constant 0 : i32
    return %c0_i32, %arg1 : i32, i32
  }
  func.func @transform_2(%arg0: i32, %arg1: i32) -> (i32, i32) {
    %c0_i32 = arith.constant 0 : i32
    %c0_i32_0 = arith.constant 0 : i32
    return %c0_i32, %arg1 : i32, i32
  }
  func.func @transform_3(%arg0: i32, %arg1: i32) -> (i32, i32) {
    %c0_i32 = arith.constant 0 : i32
    return %arg0, %arg1 : i32, i32
  }
}

module attributes {stable_mosaic.version = 11 : i64} {
  func.func @_encoder_stack_kernel(%arg0: i32, %arg1: i32, %arg2: memref<1x24x128xf32, #tpu.memory_space<vmem>>, %arg3: memref<1x128x384xbf16, #tpu.memory_space<vmem>>, %arg4: memref<1x1x384xf32, #tpu.memory_space<vmem>>, %arg5: memref<1x128x128xbf16, #tpu.memory_space<vmem>>, %arg6: memref<1x1x128xf32, #tpu.memory_space<vmem>>, %arg7: memref<1x1x128xf32, #tpu.memory_space<vmem>>, %arg8: memref<1x1x128xf32, #tpu.memory_space<vmem>>, %arg9: memref<1x128x256xbf16, #tpu.memory_space<vmem>>, %arg10: memref<1x1x256xf32, #tpu.memory_space<vmem>>, %arg11: memref<1x256x128xbf16, #tpu.memory_space<vmem>>, %arg12: memref<1x1x128xf32, #tpu.memory_space<vmem>>, %arg13: memref<1x1x128xf32, #tpu.memory_space<vmem>>, %arg14: memref<1x1x128xf32, #tpu.memory_space<vmem>>, %arg15: memref<1x24x128xf32, #tpu.memory_space<vmem>>, %arg16: memref<24x128xf32, #tpu.memory_space<vmem>>) attributes {dimension_semantics = [#tpu.dimension_semantics<parallel>, #tpu.dimension_semantics<arbitrary>], iteration_bounds = array<i64: 2, 2>, scalar_prefetch = 0 : i64, scratch_operands = 1 : i64, tpu.core_type = #tpu.core_type<tc>, window_params = [{transform_indices = @transform_0, window_bounds = array<i64: 1, 24, 128>}, {transform_indices = @transform_1, window_bounds = array<i64: 1, 128, 384>}, {transform_indices = @transform_2, window_bounds = array<i64: 1, 1, 384>}, {transform_indices = @transform_3, window_bounds = array<i64: 1, 128, 128>}, {transform_indices = @transform_4, window_bounds = array<i64: 1, 1, 128>}, {transform_indices = @transform_5, window_bounds = array<i64: 1, 1, 128>}, {transform_indices = @transform_6, window_bounds = array<i64: 1, 1, 128>}, {transform_indices = @transform_7, window_bounds = array<i64: 1, 128, 256>}, {transform_indices = @transform_8, window_bounds = array<i64: 1, 1, 256>}, {transform_indices = @transform_9, window_bounds = array<i64: 1, 256, 128>}, {transform_indices = @transform_10, window_bounds = array<i64: 1, 1, 128>}, {transform_indices = @transform_11, window_bounds = array<i64: 1, 1, 128>}, {transform_indices = @transform_12, window_bounds = array<i64: 1, 1, 128>}, {transform_indices = @transform_13, window_bounds = array<i64: 1, 24, 128>}]} {
    %c0_i32 = arith.constant 0 : i32
    %0 = arith.cmpi eq, %arg1, %c0_i32 : i32
    %1 = arith.extui %0 : i1 to i32
    %c0_i32_0 = arith.constant 0 : i32
    %2 = arith.cmpi ne, %1, %c0_i32_0 : i32
    scf.if %2 {
      %c0_87 = arith.constant 0 : index
      %c0_88 = arith.constant 0 : index
      %c0_89 = arith.constant 0 : index
      %207 = vector.load %arg2[%c0_87, %c0_88, %c0_89] : memref<1x24x128xf32, #tpu.memory_space<vmem>>, vector<1x24x128xf32>
      %c0_90 = arith.constant 0 : index
      %c0_91 = arith.constant 0 : index
      %c0_92 = arith.constant 0 : index
      %208 = vector.load %arg15[%c0_90, %c0_91, %c0_92] : memref<1x24x128xf32, #tpu.memory_space<vmem>>, vector<1x24x128xf32>
      tpu.vector_store %arg15[%c0_90, %c0_91, %c0_92], %207 {strides = array<i32>} : memref<1x24x128xf32, #tpu.memory_space<vmem>>, vector<1x24x128xf32>,
    } else {
    }
    %c0 = arith.constant 0 : index
    %c0_1 = arith.constant 0 : index
    %c0_2 = arith.constant 0 : index
    %3 = vector.load %arg15[%c0, %c0_1, %c0_2] : memref<1x24x128xf32, #tpu.memory_space<vmem>>, vector<1x24x128xf32>
    %4 = vector.shape_cast %3 : vector<1x24x128xf32> to vector<24x128xf32>
    %5 = arith.truncf %4 : vector<24x128xf32> to vector<24x128xbf16>
    %c0_3 = arith.constant 0 : index
    %c0_4 = arith.constant 0 : index
    %c0_5 = arith.constant 0 : index
    %6 = vector.load %arg3[%c0_3, %c0_4, %c0_5] : memref<1x128x384xbf16, #tpu.memory_space<vmem>>, vector<1x128x384xbf16>
    %7 = vector.shape_cast %6 : vector<1x128x384xbf16> to vector<128x384xbf16>
    %cst = arith.constant dense<0.000000e+00> : vector<24x384xf32>
    %8 = tpu.matmul %5, %7, %cst {dimension_numbers = #tpu.dot_dimension_numbers<[1], [0], [0], [1], [0, 0, 1, 1], [], []>} : vector<24x128xbf16>, vector<128x384xbf16>, vector<24x384xf32> -> vector<24x384xf32>
    %c0_6 = arith.constant 0 : index
    %c0_7 = arith.constant 0 : index
    %c0_8 = arith.constant 0 : index
    %9 = vector.load %arg4[%c0_6, %c0_7, %c0_8] : memref<1x1x384xf32, #tpu.memory_space<vmem>>, vector<1x1x384xf32>
    %10 = vector.shape_cast %9 : vector<1x1x384xf32> to vector<1x384xf32>
    %11 = vector.broadcast %10 : vector<1x384xf32> to vector<24x384xf32>
    %12 = arith.addf %8, %11 : vector<24x384xf32>
    %13 = vector.extract_strided_slice %12 {offsets = [0, 0], sizes = [24, 128], strides = [1, 1]} : vector<24x384xf32> to vector<24x128xf32>
    %14 = vector.extract_strided_slice %12 {offsets = [0, 128], sizes = [24, 128], strides = [1, 1]} : vector<24x384xf32> to vector<24x128xf32>
    %15 = vector.extract_strided_slice %12 {offsets = [0, 256], sizes = [24, 128], strides = [1, 1]} : vector<24x384xf32> to vector<24x128xf32>
    %16 = tpu.iota {dimensions = array<i32: 1>} : vector<1x24xi32>
    %c17_i32 = arith.constant 17 : i32
    %17 = vector.broadcast %c17_i32 : i32 to vector<1x24xi32>
    %18 = arith.cmpi slt, %16, %17 : vector<1x24xi32>
    %19 = vector.extract_strided_slice %13 {offsets = [0, 0], sizes = [24, 32], strides = [1, 1]} : vector<24x128xf32> to vector<24x32xf32>
    %20 = arith.truncf %19 : vector<24x32xf32> to vector<24x32xbf16>
    %21 = vector.extract_strided_slice %14 {offsets = [0, 0], sizes = [24, 32], strides = [1, 1]} : vector<24x128xf32> to vector<24x32xf32>
    %22 = arith.truncf %21 : vector<24x32xf32> to vector<24x32xbf16>
    %23 = vector.extract_strided_slice %15 {offsets = [0, 0], sizes = [24, 32], strides = [1, 1]} : vector<24x128xf32> to vector<24x32xf32>
    %24 = arith.truncf %23 : vector<24x32xf32> to vector<24x32xbf16>
    %cst_9 = arith.constant dense<0.000000e+00> : vector<24x24xf32>
    %25 = tpu.matmul %20, %22, %cst_9 {dimension_numbers = #tpu.dot_dimension_numbers<[1], [1], [0], [0], [0, 0, 1, 0], [], []>} : vector<24x32xbf16>, vector<24x32xbf16>, vector<24x24xf32> -> vector<24x24xf32>
    %cst_10 = arith.constant 0.176776692 : f32
    %26 = vector.broadcast %cst_10 : f32 to vector<24x24xf32>
    %27 = arith.mulf %25, %26 : vector<24x24xf32>
    %cst_11 = arith.constant -1.000000e+30 : f32
    %28 = vector.shape_cast %18 : vector<1x24xi1> to vector<1x24xi1>
    %29 = vector.broadcast %28 : vector<1x24xi1> to vector<24x24xi1>
    %30 = vector.broadcast %cst_11 : f32 to vector<24x24xf32>
    %31 = arith.select %29, %27, %30 : vector<24x24xi1>, vector<24x24xf32>
    %cst_12 = arith.constant dense<0xFF800000> : vector<24xf32>
    %32 = vector.multi_reduction <maximumf>, %31, %cst_12 [1] : vector<24x24xf32> to vector<24xf32>
    %33 = vector.shape_cast %32 : vector<24xf32> to vector<24x1xf32>
    %34 = vector.broadcast %33 : vector<24x1xf32> to vector<24x24xf32>
    %35 = arith.subf %31, %34 : vector<24x24xf32>
    %36 = math.exp %35 : vector<24x24xf32>
    %cst_13 = arith.constant dense<0.000000e+00> : vector<24xf32>
    %37 = vector.multi_reduction <add>, %36, %cst_13 [1] : vector<24x24xf32> to vector<24xf32>
    %38 = vector.shape_cast %37 : vector<24xf32> to vector<24x1xf32>
    %39 = tpu.reciprocal %38 {approx = true} : vector<24x1xf32> -> vector<24x1xf32>
    %40 = vector.broadcast %39 : vector<24x1xf32> to vector<24x24xf32>
    %41 = arith.mulf %36, %40 : vector<24x24xf32>
    %42 = arith.truncf %41 : vector<24x24xf32> to vector<24x24xbf16>
    %cst_14 = arith.constant dense<0.000000e+00> : vector<24x32xf32>
    %43 = tpu.matmul %42, %24, %cst_14 {dimension_numbers = #tpu.dot_dimension_numbers<[1], [0], [0], [1], [0, 0, 1, 1], [], []>} : vector<24x24xbf16>, vector<24x32xbf16>, vector<24x32xf32> -> vector<24x32xf32>
    %c0_15 = arith.constant 0 : index
    %c0_16 = arith.constant 0 : index
    %44 = vector.load %arg16[%c0_15, %c0_16] : memref<24x128xf32, #tpu.memory_space<vmem>>, vector<24x32xf32>
    tpu.vector_store %arg16[%c0_15, %c0_16], %43 {strides = array<i32>} : memref<24x128xf32, #tpu.memory_space<vmem>>, vector<24x32xf32>,
    %45 = vector.extract_strided_slice %13 {offsets = [0, 32], sizes = [24, 32], strides = [1, 1]} : vector<24x128xf32> to vector<24x32xf32>
    %46 = arith.truncf %45 : vector<24x32xf32> to vector<24x32xbf16>
    %47 = vector.extract_strided_slice %14 {offsets = [0, 32], sizes = [24, 32], strides = [1, 1]} : vector<24x128xf32> to vector<24x32xf32>
    %48 = arith.truncf %47 : vector<24x32xf32> to vector<24x32xbf16>
    %49 = vector.extract_strided_slice %15 {offsets = [0, 32], sizes = [24, 32], strides = [1, 1]} : vector<24x128xf32> to vector<24x32xf32>
    %50 = arith.truncf %49 : vector<24x32xf32> to vector<24x32xbf16>
    %cst_17 = arith.constant dense<0.000000e+00> : vector<24x24xf32>
    %51 = tpu.matmul %46, %48, %cst_17 {dimension_numbers = #tpu.dot_dimension_numbers<[1], [1], [0], [0], [0, 0, 1, 0], [], []>} : vector<24x32xbf16>, vector<24x32xbf16>, vector<24x24xf32> -> vector<24x24xf32>
    %cst_18 = arith.constant 0.176776692 : f32
    %52 = vector.broadcast %cst_18 : f32 to vector<24x24xf32>
    %53 = arith.mulf %51, %52 : vector<24x24xf32>
    %cst_19 = arith.constant -1.000000e+30 : f32
    %54 = vector.shape_cast %18 : vector<1x24xi1> to vector<1x24xi1>
    %55 = vector.broadcast %54 : vector<1x24xi1> to vector<24x24xi1>
    %56 = vector.broadcast %cst_19 : f32 to vector<24x24xf32>
    %57 = arith.select %55, %53, %56 : vector<24x24xi1>, vector<24x24xf32>
    %cst_20 = arith.constant dense<0xFF800000> : vector<24xf32>
    %58 = vector.multi_reduction <maximumf>, %57, %cst_20 [1] : vector<24x24xf32> to vector<24xf32>
    %59 = vector.shape_cast %58 : vector<24xf32> to vector<24x1xf32>
    %60 = vector.broadcast %59 : vector<24x1xf32> to vector<24x24xf32>
    %61 = arith.subf %57, %60 : vector<24x24xf32>
    %62 = math.exp %61 : vector<24x24xf32>
    %cst_21 = arith.constant dense<0.000000e+00> : vector<24xf32>
    %63 = vector.multi_reduction <add>, %62, %cst_21 [1] : vector<24x24xf32> to vector<24xf32>
    %64 = vector.shape_cast %63 : vector<24xf32> to vector<24x1xf32>
    %65 = tpu.reciprocal %64 {approx = true} : vector<24x1xf32> -> vector<24x1xf32>
    %66 = vector.broadcast %65 : vector<24x1xf32> to vector<24x24xf32>
    %67 = arith.mulf %62, %66 : vector<24x24xf32>
    %68 = arith.truncf %67 : vector<24x24xf32> to vector<24x24xbf16>
    %cst_22 = arith.constant dense<0.000000e+00> : vector<24x32xf32>
    %69 = tpu.matmul %68, %50, %cst_22 {dimension_numbers = #tpu.dot_dimension_numbers<[1], [0], [0], [1], [0, 0, 1, 1], [], []>} : vector<24x24xbf16>, vector<24x32xbf16>, vector<24x32xf32> -> vector<24x32xf32>
    %c0_23 = arith.constant 0 : index
    %c32 = arith.constant 32 : index
    %70 = vector.load %arg16[%c0_23, %c32] : memref<24x128xf32, #tpu.memory_space<vmem>>, vector<24x32xf32>
    tpu.vector_store %arg16[%c0_23, %c32], %69 {strides = array<i32>} : memref<24x128xf32, #tpu.memory_space<vmem>>, vector<24x32xf32>,
    %71 = vector.extract_strided_slice %13 {offsets = [0, 64], sizes = [24, 32], strides = [1, 1]} : vector<24x128xf32> to vector<24x32xf32>
    %72 = arith.truncf %71 : vector<24x32xf32> to vector<24x32xbf16>
    %73 = vector.extract_strided_slice %14 {offsets = [0, 64], sizes = [24, 32], strides = [1, 1]} : vector<24x128xf32> to vector<24x32xf32>
    %74 = arith.truncf %73 : vector<24x32xf32> to vector<24x32xbf16>
    %75 = vector.extract_strided_slice %15 {offsets = [0, 64], sizes = [24, 32], strides = [1, 1]} : vector<24x128xf32> to vector<24x32xf32>
    %76 = arith.truncf %75 : vector<24x32xf32> to vector<24x32xbf16>
    %cst_24 = arith.constant dense<0.000000e+00> : vector<24x24xf32>
    %77 = tpu.matmul %72, %74, %cst_24 {dimension_numbers = #tpu.dot_dimension_numbers<[1], [1], [0], [0], [0, 0, 1, 0], [], []>} : vector<24x32xbf16>, vector<24x32xbf16>, vector<24x24xf32> -> vector<24x24xf32>
    %cst_25 = arith.constant 0.176776692 : f32
    %78 = vector.broadcast %cst_25 : f32 to vector<24x24xf32>
    %79 = arith.mulf %77, %78 : vector<24x24xf32>
    %cst_26 = arith.constant -1.000000e+30 : f32
    %80 = vector.shape_cast %18 : vector<1x24xi1> to vector<1x24xi1>
    %81 = vector.broadcast %80 : vector<1x24xi1> to vector<24x24xi1>
    %82 = vector.broadcast %cst_26 : f32 to vector<24x24xf32>
    %83 = arith.select %81, %79, %82 : vector<24x24xi1>, vector<24x24xf32>
    %cst_27 = arith.constant dense<0xFF800000> : vector<24xf32>
    %84 = vector.multi_reduction <maximumf>, %83, %cst_27 [1] : vector<24x24xf32> to vector<24xf32>
    %85 = vector.shape_cast %84 : vector<24xf32> to vector<24x1xf32>
    %86 = vector.broadcast %85 : vector<24x1xf32> to vector<24x24xf32>
    %87 = arith.subf %83, %86 : vector<24x24xf32>
    %88 = math.exp %87 : vector<24x24xf32>
    %cst_28 = arith.constant dense<0.000000e+00> : vector<24xf32>
    %89 = vector.multi_reduction <add>, %88, %cst_28 [1] : vector<24x24xf32> to vector<24xf32>
    %90 = vector.shape_cast %89 : vector<24xf32> to vector<24x1xf32>
    %91 = tpu.reciprocal %90 {approx = true} : vector<24x1xf32> -> vector<24x1xf32>
    %92 = vector.broadcast %91 : vector<24x1xf32> to vector<24x24xf32>
    %93 = arith.mulf %88, %92 : vector<24x24xf32>
    %94 = arith.truncf %93 : vector<24x24xf32> to vector<24x24xbf16>
    %cst_29 = arith.constant dense<0.000000e+00> : vector<24x32xf32>
    %95 = tpu.matmul %94, %76, %cst_29 {dimension_numbers = #tpu.dot_dimension_numbers<[1], [0], [0], [1], [0, 0, 1, 1], [], []>} : vector<24x24xbf16>, vector<24x32xbf16>, vector<24x32xf32> -> vector<24x32xf32>
    %c0_30 = arith.constant 0 : index
    %c64 = arith.constant 64 : index
    %96 = vector.load %arg16[%c0_30, %c64] : memref<24x128xf32, #tpu.memory_space<vmem>>, vector<24x32xf32>
    tpu.vector_store %arg16[%c0_30, %c64], %95 {strides = array<i32>} : memref<24x128xf32, #tpu.memory_space<vmem>>, vector<24x32xf32>,
    %97 = vector.extract_strided_slice %13 {offsets = [0, 96], sizes = [24, 32], strides = [1, 1]} : vector<24x128xf32> to vector<24x32xf32>
    %98 = arith.truncf %97 : vector<24x32xf32> to vector<24x32xbf16>
    %99 = vector.extract_strided_slice %14 {offsets = [0, 96], sizes = [24, 32], strides = [1, 1]} : vector<24x128xf32> to vector<24x32xf32>
    %100 = arith.truncf %99 : vector<24x32xf32> to vector<24x32xbf16>
    %101 = vector.extract_strided_slice %15 {offsets = [0, 96], sizes = [24, 32], strides = [1, 1]} : vector<24x128xf32> to vector<24x32xf32>
    %102 = arith.truncf %101 : vector<24x32xf32> to vector<24x32xbf16>
    %cst_31 = arith.constant dense<0.000000e+00> : vector<24x24xf32>
    %103 = tpu.matmul %98, %100, %cst_31 {dimension_numbers = #tpu.dot_dimension_numbers<[1], [1], [0], [0], [0, 0, 1, 0], [], []>} : vector<24x32xbf16>, vector<24x32xbf16>, vector<24x24xf32> -> vector<24x24xf32>
    %cst_32 = arith.constant 0.176776692 : f32
    %104 = vector.broadcast %cst_32 : f32 to vector<24x24xf32>
    %105 = arith.mulf %103, %104 : vector<24x24xf32>
    %cst_33 = arith.constant -1.000000e+30 : f32
    %106 = vector.shape_cast %18 : vector<1x24xi1> to vector<1x24xi1>
    %107 = vector.broadcast %106 : vector<1x24xi1> to vector<24x24xi1>
    %108 = vector.broadcast %cst_33 : f32 to vector<24x24xf32>
    %109 = arith.select %107, %105, %108 : vector<24x24xi1>, vector<24x24xf32>
    %cst_34 = arith.constant dense<0xFF800000> : vector<24xf32>
    %110 = vector.multi_reduction <maximumf>, %109, %cst_34 [1] : vector<24x24xf32> to vector<24xf32>
    %111 = vector.shape_cast %110 : vector<24xf32> to vector<24x1xf32>
    %112 = vector.broadcast %111 : vector<24x1xf32> to vector<24x24xf32>
    %113 = arith.subf %109, %112 : vector<24x24xf32>
    %114 = math.exp %113 : vector<24x24xf32>
    %cst_35 = arith.constant dense<0.000000e+00> : vector<24xf32>
    %115 = vector.multi_reduction <add>, %114, %cst_35 [1] : vector<24x24xf32> to vector<24xf32>
    %116 = vector.shape_cast %115 : vector<24xf32> to vector<24x1xf32>
    %117 = tpu.reciprocal %116 {approx = true} : vector<24x1xf32> -> vector<24x1xf32>
    %118 = vector.broadcast %117 : vector<24x1xf32> to vector<24x24xf32>
    %119 = arith.mulf %114, %118 : vector<24x24xf32>
    %120 = arith.truncf %119 : vector<24x24xf32> to vector<24x24xbf16>
    %cst_36 = arith.constant dense<0.000000e+00> : vector<24x32xf32>
    %121 = tpu.matmul %120, %102, %cst_36 {dimension_numbers = #tpu.dot_dimension_numbers<[1], [0], [0], [1], [0, 0, 1, 1], [], []>} : vector<24x24xbf16>, vector<24x32xbf16>, vector<24x32xf32> -> vector<24x32xf32>
    %c0_37 = arith.constant 0 : index
    %c96 = arith.constant 96 : index
    %122 = vector.load %arg16[%c0_37, %c96] : memref<24x128xf32, #tpu.memory_space<vmem>>, vector<24x32xf32>
    tpu.vector_store %arg16[%c0_37, %c96], %121 {strides = array<i32>} : memref<24x128xf32, #tpu.memory_space<vmem>>, vector<24x32xf32>,
    %c0_38 = arith.constant 0 : index
    %c0_39 = arith.constant 0 : index
    %123 = vector.load %arg16[%c0_38, %c0_39] : memref<24x128xf32, #tpu.memory_space<vmem>>, vector<24x128xf32>
    %124 = arith.truncf %123 : vector<24x128xf32> to vector<24x128xbf16>
    %c0_40 = arith.constant 0 : index
    %c0_41 = arith.constant 0 : index
    %c0_42 = arith.constant 0 : index
    %125 = vector.load %arg5[%c0_40, %c0_41, %c0_42] : memref<1x128x128xbf16, #tpu.memory_space<vmem>>, vector<1x128x128xbf16>
    %126 = vector.shape_cast %125 : vector<1x128x128xbf16> to vector<128x128xbf16>
    %cst_43 = arith.constant dense<0.000000e+00> : vector<24x128xf32>
    %127 = tpu.matmul %124, %126, %cst_43 {dimension_numbers = #tpu.dot_dimension_numbers<[1], [0], [0], [1], [0, 0, 1, 1], [], []>} : vector<24x128xbf16>, vector<128x128xbf16>, vector<24x128xf32> -> vector<24x128xf32>
    %c0_44 = arith.constant 0 : index
    %c0_45 = arith.constant 0 : index
    %c0_46 = arith.constant 0 : index
    %128 = vector.load %arg6[%c0_44, %c0_45, %c0_46] : memref<1x1x128xf32, #tpu.memory_space<vmem>>, vector<1x1x128xf32>
    %129 = vector.shape_cast %128 : vector<1x1x128xf32> to vector<1x128xf32>
    %130 = vector.broadcast %129 : vector<1x128xf32> to vector<24x128xf32>
    %131 = arith.addf %127, %130 : vector<24x128xf32>
    %132 = arith.addf %4, %131 : vector<24x128xf32>
    %c0_47 = arith.constant 0 : index
    %c0_48 = arith.constant 0 : index
    %c0_49 = arith.constant 0 : index
    %133 = vector.load %arg7[%c0_47, %c0_48, %c0_49] : memref<1x1x128xf32, #tpu.memory_space<vmem>>, vector<1x1x128xf32>
    %134 = vector.shape_cast %133 : vector<1x1x128xf32> to vector<1x128xf32>
    %c0_50 = arith.constant 0 : index
    %c0_51 = arith.constant 0 : index
    %c0_52 = arith.constant 0 : index
    %135 = vector.load %arg8[%c0_50, %c0_51, %c0_52] : memref<1x1x128xf32, #tpu.memory_space<vmem>>, vector<1x1x128xf32>
    %136 = vector.shape_cast %135 : vector<1x1x128xf32> to vector<1x128xf32>
    %cst_53 = arith.constant dense<0.000000e+00> : vector<24xf32>
    %137 = vector.multi_reduction <add>, %132, %cst_53 [1] : vector<24x128xf32> to vector<24xf32>
    %138 = vector.shape_cast %137 : vector<24xf32> to vector<24x1xf32>
    %cst_54 = arith.constant 1.280000e+02 : f32
    %139 = vector.broadcast %cst_54 : f32 to vector<24x1xf32>
    %140 = arith.divf %138, %139 : vector<24x1xf32>
    %141 = vector.broadcast %140 : vector<24x1xf32> to vector<24x128xf32>
    %142 = arith.subf %132, %141 : vector<24x128xf32>
    %143 = arith.mulf %142, %142 : vector<24x128xf32>
    %cst_55 = arith.constant dense<0.000000e+00> : vector<24xf32>
    %144 = vector.multi_reduction <add>, %143, %cst_55 [1] : vector<24x128xf32> to vector<24xf32>
    %145 = vector.shape_cast %144 : vector<24xf32> to vector<24x1xf32>
    %cst_56 = arith.constant 1.280000e+02 : f32
    %146 = vector.broadcast %cst_56 : f32 to vector<24x1xf32>
    %147 = arith.divf %145, %146 : vector<24x1xf32>
    %148 = vector.broadcast %140 : vector<24x1xf32> to vector<24x128xf32>
    %149 = arith.subf %132, %148 : vector<24x128xf32>
    %cst_57 = arith.constant 9.99999974E-6 : f32
    %150 = vector.broadcast %cst_57 : f32 to vector<24x1xf32>
    %151 = arith.addf %147, %150 : vector<24x1xf32>
    %152 = math.rsqrt %151 : vector<24x1xf32>
    %153 = vector.broadcast %152 : vector<24x1xf32> to vector<24x128xf32>
    %154 = arith.mulf %149, %153 : vector<24x128xf32>
    %155 = vector.broadcast %134 : vector<1x128xf32> to vector<24x128xf32>
    %156 = arith.mulf %154, %155 : vector<24x128xf32>
    %157 = vector.broadcast %136 : vector<1x128xf32> to vector<24x128xf32>
    %158 = arith.addf %156, %157 : vector<24x128xf32>
    %159 = arith.truncf %158 : vector<24x128xf32> to vector<24x128xbf16>
    %c0_58 = arith.constant 0 : index
    %c0_59 = arith.constant 0 : index
    %c0_60 = arith.constant 0 : index
    %160 = vector.load %arg9[%c0_58, %c0_59, %c0_60] : memref<1x128x256xbf16, #tpu.memory_space<vmem>>, vector<1x128x256xbf16>
    %161 = vector.shape_cast %160 : vector<1x128x256xbf16> to vector<128x256xbf16>
    %cst_61 = arith.constant dense<0.000000e+00> : vector<24x256xf32>
    %162 = tpu.matmul %159, %161, %cst_61 {dimension_numbers = #tpu.dot_dimension_numbers<[1], [0], [0], [1], [0, 0, 1, 1], [], []>} : vector<24x128xbf16>, vector<128x256xbf16>, vector<24x256xf32> -> vector<24x256xf32>
    %c0_62 = arith.constant 0 : index
    %c0_63 = arith.constant 0 : index
    %c0_64 = arith.constant 0 : index
    %163 = vector.load %arg10[%c0_62, %c0_63, %c0_64] : memref<1x1x256xf32, #tpu.memory_space<vmem>>, vector<1x1x256xf32>
    %164 = vector.shape_cast %163 : vector<1x1x256xf32> to vector<1x256xf32>
    %165 = vector.broadcast %164 : vector<1x256xf32> to vector<24x256xf32>
    %166 = arith.addf %162, %165 : vector<24x256xf32>
    %cst_65 = arith.constant 0.000000e+00 : f32
    %167 = vector.broadcast %cst_65 : f32 to vector<24x256xf32>
    %168 = arith.maximumf %166, %167 : vector<24x256xf32>
    %169 = arith.truncf %168 : vector<24x256xf32> to vector<24x256xbf16>
    %c0_66 = arith.constant 0 : index
    %c0_67 = arith.constant 0 : index
    %c0_68 = arith.constant 0 : index
    %170 = vector.load %arg11[%c0_66, %c0_67, %c0_68] : memref<1x256x128xbf16, #tpu.memory_space<vmem>>, vector<1x256x128xbf16>
    %171 = vector.shape_cast %170 : vector<1x256x128xbf16> to vector<256x128xbf16>
    %cst_69 = arith.constant dense<0.000000e+00> : vector<24x128xf32>
    %172 = tpu.matmul %169, %171, %cst_69 {dimension_numbers = #tpu.dot_dimension_numbers<[1], [0], [0], [1], [0, 0, 1, 1], [], []>} : vector<24x256xbf16>, vector<256x128xbf16>, vector<24x128xf32> -> vector<24x128xf32>
    %c0_70 = arith.constant 0 : index
    %c0_71 = arith.constant 0 : index
    %c0_72 = arith.constant 0 : index
    %173 = vector.load %arg12[%c0_70, %c0_71, %c0_72] : memref<1x1x128xf32, #tpu.memory_space<vmem>>, vector<1x1x128xf32>
    %174 = vector.shape_cast %173 : vector<1x1x128xf32> to vector<1x128xf32>
    %175 = vector.broadcast %174 : vector<1x128xf32> to vector<24x128xf32>
    %176 = arith.addf %172, %175 : vector<24x128xf32>
    %177 = arith.addf %158, %176 : vector<24x128xf32>
    %c0_73 = arith.constant 0 : index
    %c0_74 = arith.constant 0 : index
    %c0_75 = arith.constant 0 : index
    %178 = vector.load %arg13[%c0_73, %c0_74, %c0_75] : memref<1x1x128xf32, #tpu.memory_space<vmem>>, vector<1x1x128xf32>
    %179 = vector.shape_cast %178 : vector<1x1x128xf32> to vector<1x128xf32>
    %c0_76 = arith.constant 0 : index
    %c0_77 = arith.constant 0 : index
    %c0_78 = arith.constant 0 : index
    %180 = vector.load %arg14[%c0_76, %c0_77, %c0_78] : memref<1x1x128xf32, #tpu.memory_space<vmem>>, vector<1x1x128xf32>
    %181 = vector.shape_cast %180 : vector<1x1x128xf32> to vector<1x128xf32>
    %cst_79 = arith.constant dense<0.000000e+00> : vector<24xf32>
    %182 = vector.multi_reduction <add>, %177, %cst_79 [1] : vector<24x128xf32> to vector<24xf32>
    %183 = vector.shape_cast %182 : vector<24xf32> to vector<24x1xf32>
    %cst_80 = arith.constant 1.280000e+02 : f32
    %184 = vector.broadcast %cst_80 : f32 to vector<24x1xf32>
    %185 = arith.divf %183, %184 : vector<24x1xf32>
    %186 = vector.broadcast %185 : vector<24x1xf32> to vector<24x128xf32>
    %187 = arith.subf %177, %186 : vector<24x128xf32>
    %188 = arith.mulf %187, %187 : vector<24x128xf32>
    %cst_81 = arith.constant dense<0.000000e+00> : vector<24xf32>
    %189 = vector.multi_reduction <add>, %188, %cst_81 [1] : vector<24x128xf32> to vector<24xf32>
    %190 = vector.shape_cast %189 : vector<24xf32> to vector<24x1xf32>
    %cst_82 = arith.constant 1.280000e+02 : f32
    %191 = vector.broadcast %cst_82 : f32 to vector<24x1xf32>
    %192 = arith.divf %190, %191 : vector<24x1xf32>
    %193 = vector.broadcast %185 : vector<24x1xf32> to vector<24x128xf32>
    %194 = arith.subf %177, %193 : vector<24x128xf32>
    %cst_83 = arith.constant 9.99999974E-6 : f32
    %195 = vector.broadcast %cst_83 : f32 to vector<24x1xf32>
    %196 = arith.addf %192, %195 : vector<24x1xf32>
    %197 = math.rsqrt %196 : vector<24x1xf32>
    %198 = vector.broadcast %197 : vector<24x1xf32> to vector<24x128xf32>
    %199 = arith.mulf %194, %198 : vector<24x128xf32>
    %200 = vector.broadcast %179 : vector<1x128xf32> to vector<24x128xf32>
    %201 = arith.mulf %199, %200 : vector<24x128xf32>
    %202 = vector.broadcast %181 : vector<1x128xf32> to vector<24x128xf32>
    %203 = arith.addf %201, %202 : vector<24x128xf32>
    %c0_84 = arith.constant 0 : index
    %c0_85 = arith.constant 0 : index
    %c0_86 = arith.constant 0 : index
    %204 = vector.load %arg15[%c0_84, %c0_85, %c0_86] : memref<1x24x128xf32, #tpu.memory_space<vmem>>, vector<1x24x128xf32>
    %205 = vector.shape_cast %204 : vector<1x24x128xf32> to vector<24x128xf32>
    %206 = vector.shape_cast %203 : vector<24x128xf32> to vector<1x24x128xf32>
    tpu.vector_store %arg15[%c0_84, %c0_85, %c0_86], %206 {strides = array<i32>} : memref<1x24x128xf32, #tpu.memory_space<vmem>>, vector<1x24x128xf32>,
    return
  }
  func.func @transform_0(%arg0: i32, %arg1: i32) -> (i32, i32, i32) {
    %c0_i32 = arith.constant 0 : i32
    %c0_i32_0 = arith.constant 0 : i32
    %c0_i32_1 = arith.constant 0 : i32
    return %arg0, %c0_i32, %c0_i32_0 : i32, i32, i32
  }
  func.func @transform_1(%arg0: i32, %arg1: i32) -> (i32, i32, i32) {
    %c0_i32 = arith.constant 0 : i32
    %c0_i32_0 = arith.constant 0 : i32
    %c0_i32_1 = arith.constant 0 : i32
    return %arg1, %c0_i32, %c0_i32_0 : i32, i32, i32
  }
  func.func @transform_2(%arg0: i32, %arg1: i32) -> (i32, i32, i32) {
    %c0_i32 = arith.constant 0 : i32
    %c0_i32_0 = arith.constant 0 : i32
    %c0_i32_1 = arith.constant 0 : i32
    return %arg1, %c0_i32, %c0_i32_0 : i32, i32, i32
  }
  func.func @transform_3(%arg0: i32, %arg1: i32) -> (i32, i32, i32) {
    %c0_i32 = arith.constant 0 : i32
    %c0_i32_0 = arith.constant 0 : i32
    %c0_i32_1 = arith.constant 0 : i32
    return %arg1, %c0_i32, %c0_i32_0 : i32, i32, i32
  }
  func.func @transform_4(%arg0: i32, %arg1: i32) -> (i32, i32, i32) {
    %c0_i32 = arith.constant 0 : i32
    %c0_i32_0 = arith.constant 0 : i32
    %c0_i32_1 = arith.constant 0 : i32
    return %arg1, %c0_i32, %c0_i32_0 : i32, i32, i32
  }
  func.func @transform_5(%arg0: i32, %arg1: i32) -> (i32, i32, i32) {
    %c0_i32 = arith.constant 0 : i32
    %c0_i32_0 = arith.constant 0 : i32
    %c0_i32_1 = arith.constant 0 : i32
    return %arg1, %c0_i32, %c0_i32_0 : i32, i32, i32
  }
  func.func @transform_6(%arg0: i32, %arg1: i32) -> (i32, i32, i32) {
    %c0_i32 = arith.constant 0 : i32
    %c0_i32_0 = arith.constant 0 : i32
    %c0_i32_1 = arith.constant 0 : i32
    return %arg1, %c0_i32, %c0_i32_0 : i32, i32, i32
  }
  func.func @transform_7(%arg0: i32, %arg1: i32) -> (i32, i32, i32) {
    %c0_i32 = arith.constant 0 : i32
    %c0_i32_0 = arith.constant 0 : i32
    %c0_i32_1 = arith.constant 0 : i32
    return %arg1, %c0_i32, %c0_i32_0 : i32, i32, i32
  }
  func.func @transform_8(%arg0: i32, %arg1: i32) -> (i32, i32, i32) {
    %c0_i32 = arith.constant 0 : i32
    %c0_i32_0 = arith.constant 0 : i32
    %c0_i32_1 = arith.constant 0 : i32
    return %arg1, %c0_i32, %c0_i32_0 : i32, i32, i32
  }
  func.func @transform_9(%arg0: i32, %arg1: i32) -> (i32, i32, i32) {
    %c0_i32 = arith.constant 0 : i32
    %c0_i32_0 = arith.constant 0 : i32
    %c0_i32_1 = arith.constant 0 : i32
    return %arg1, %c0_i32, %c0_i32_0 : i32, i32, i32
  }
  func.func @transform_10(%arg0: i32, %arg1: i32) -> (i32, i32, i32) {
    %c0_i32 = arith.constant 0 : i32
    %c0_i32_0 = arith.constant 0 : i32
    %c0_i32_1 = arith.constant 0 : i32
    return %arg1, %c0_i32, %c0_i32_0 : i32, i32, i32
  }
  func.func @transform_11(%arg0: i32, %arg1: i32) -> (i32, i32, i32) {
    %c0_i32 = arith.constant 0 : i32
    %c0_i32_0 = arith.constant 0 : i32
    %c0_i32_1 = arith.constant 0 : i32
    return %arg1, %c0_i32, %c0_i32_0 : i32, i32, i32
  }
  func.func @transform_12(%arg0: i32, %arg1: i32) -> (i32, i32, i32) {
    %c0_i32 = arith.constant 0 : i32
    %c0_i32_0 = arith.constant 0 : i32
    %c0_i32_1 = arith.constant 0 : i32
    return %arg1, %c0_i32, %c0_i32_0 : i32, i32, i32
  }
  func.func @transform_13(%arg0: i32, %arg1: i32) -> (i32, i32, i32) {
    %c0_i32 = arith.constant 0 : i32
    %c0_i32_0 = arith.constant 0 : i32
    %c0_i32_1 = arith.constant 0 : i32
    return %arg0, %c0_i32, %c0_i32_0 : i32, i32, i32
  }
}

module attributes {stable_mosaic.version = 11 : i64} {
  func.func @_head_kernel(%arg0: memref<2x24x128xf32, #tpu.memory_space<vmem>>, %arg1: memref<128x128xbf16, #tpu.memory_space<vmem>>, %arg2: memref<1x128xf32, #tpu.memory_space<vmem>>, %arg3: memref<128x2xbf16, #tpu.memory_space<vmem>>, %arg4: memref<1x2xf32, #tpu.memory_space<vmem>>, %arg5: memref<2x2xf32, #tpu.memory_space<vmem>>) attributes {dimension_semantics = [], scalar_prefetch = 0 : i64, scratch_operands = 0 : i64, tpu.core_type = #tpu.core_type<tc>} {
    %c0 = arith.constant 0 : index
    %c0_0 = arith.constant 0 : index
    %c0_1 = arith.constant 0 : index
    %0 = vector.load %arg0[%c0, %c0_0, %c0_1] : memref<2x24x128xf32, #tpu.memory_space<vmem>>, vector<2x1x128xf32>
    %1 = vector.shape_cast %0 : vector<2x1x128xf32> to vector<2x128xf32>
    %2 = arith.truncf %1 : vector<2x128xf32> to vector<2x128xbf16>
    %c0_2 = arith.constant 0 : index
    %c0_3 = arith.constant 0 : index
    %3 = vector.load %arg1[%c0_2, %c0_3] : memref<128x128xbf16, #tpu.memory_space<vmem>>, vector<128x128xbf16>
    %cst = arith.constant dense<0.000000e+00> : vector<2x128xf32>
    %4 = tpu.matmul %2, %3, %cst {dimension_numbers = #tpu.dot_dimension_numbers<[1], [0], [0], [1], [0, 0, 1, 1], [], []>} : vector<2x128xbf16>, vector<128x128xbf16>, vector<2x128xf32> -> vector<2x128xf32>
    %c0_4 = arith.constant 0 : index
    %c0_5 = arith.constant 0 : index
    %5 = vector.load %arg2[%c0_4, %c0_5] : memref<1x128xf32, #tpu.memory_space<vmem>>, vector<1x128xf32>
    %6 = vector.broadcast %5 : vector<1x128xf32> to vector<2x128xf32>
    %7 = arith.addf %4, %6 : vector<2x128xf32>
    %cst_6 = arith.constant 0.000000e+00 : f32
    %8 = vector.broadcast %cst_6 : f32 to vector<2x128xf32>
    %9 = arith.maximumf %7, %8 : vector<2x128xf32>
    %10 = arith.truncf %9 : vector<2x128xf32> to vector<2x128xbf16>
    %c0_7 = arith.constant 0 : index
    %c0_8 = arith.constant 0 : index
    %11 = vector.load %arg3[%c0_7, %c0_8] : memref<128x2xbf16, #tpu.memory_space<vmem>>, vector<128x2xbf16>
    %cst_9 = arith.constant dense<0.000000e+00> : vector<2x2xf32>
    %12 = tpu.matmul %10, %11, %cst_9 {dimension_numbers = #tpu.dot_dimension_numbers<[1], [0], [0], [1], [0, 0, 1, 1], [], []>} : vector<2x128xbf16>, vector<128x2xbf16>, vector<2x2xf32> -> vector<2x2xf32>
    %c0_10 = arith.constant 0 : index
    %c0_11 = arith.constant 0 : index
    %13 = vector.load %arg4[%c0_10, %c0_11] : memref<1x2xf32, #tpu.memory_space<vmem>>, vector<1x2xf32>
    %14 = vector.broadcast %13 : vector<1x2xf32> to vector<2x2xf32>
    %15 = arith.addf %12, %14 : vector<2x2xf32>
    %c0_12 = arith.constant 0 : index
    %c0_13 = arith.constant 0 : index
    %16 = vector.load %arg5[%c0_12, %c0_13] : memref<2x2xf32, #tpu.memory_space<vmem>>, vector<2x2xf32>
    tpu.vector_store %arg5[%c0_12, %c0_13], %15 {strides = array<i32>} : memref<2x2xf32, #tpu.memory_space<vmem>>, vector<2x2xf32>,
    return
  }
}

</mosaic_0001>

<bundles_post_ra>
// kernel: transformer_model_forward.4
= control target key start
LH: loop header
LB: loop body
LE: loop exit
PB: predicated region body
PF: predicated region fallthrough
CT: control target
= control target key end

     0   :  { %8 = vsyncpa [#allocation3], 0  ;;  %s548_s0 = inlined_call_operand.vmem [shape: f32[128,128], index: 0, kind: input, shape index: {}]   ;;  %s549_s1 = inlined_call_operand.hbm [shape: bf16[128,128], index: 1, kind: input, shape index: {}]   ;;  %s550_s2 = inlined_call_operand.hbm [shape: f32[1,128], index: 2, kind: input, shape index: {}]   ;;  %s551_s3 = inlined_call_operand.vmem [shape: f32[128,128], index: 3, kind: output, shape index: {}]  }
   0x1   :  { %9 = vsyncpa [#allocation5], 0  ;;  %s404_s12 = smov [#allocation2]   ;;  %s356_s16 = scalar_lea.hbm %s549_s1, 1024 }
   0x2   :  { %s17_s13 = sshll.u32 %s404_s12, 4  ;;  %p357_p0 = scmp.ne.s32.totalorder %s549_s1, %s356_s16  ;;  %s18_s13 = int_to_ptr.vmem [resolvable:$true] %s17_s13 }
   0x3   :  { %p360_p1 = scmp.lt.u32.totalorder %s356_s16, %s549_s1 }
   0x5   :  { %p362_p2 = pnand %p360_p1, %p357_p0 }
   0x7   :  { %365 = shalt.err (!%p362_p2)
}
   0x8   :  { %s366_s21 = scalar_lea.vmem %s18_s13, 1024  ;;  %p371_p4 = scmp.lt.s32.totalorder %s18_s13, %s18_s13 }
   0x9   :  { %p367_p3 = scmp.ne.s32.totalorder %s18_s13, %s366_s21  ;;  %p372_p5 = scmp.lt.s32.totalorder %s366_s21, %s366_s21 }
   0xb   :  { %p373_p6 = por %p372_p5, %p371_p4 }
   0xd   :  { %p374_p7 = pnand %p373_p6, %p367_p3 }
   0xf   :  { %377 = shalt.err (!%p374_p7)
}
  0x10   :  { %s405_s22 = smov 64   ;;  %s406_s23 = smov 4  }
  0x11   :  { %23 = dma.hbm_to_vmem [thread:$0]  %s549_s1, 1024, %s18_s13, [#allocation3], %s405_s22, %s405_s22, %s406_s23  }
  0x12   :  { %s407_s26 = smov [#allocation4]   ;;  %s378_s30 = scalar_lea.hbm %s550_s2, 16 }
  0x13   :  { %s30_s27 = sshll.u32 %s407_s26, 4  ;;  %p379_p8 = scmp.ne.s32.totalorder %s550_s2, %s378_s30  ;;  %s31_s27 = int_to_ptr.vmem [resolvable:$true] %s30_s27 }
  0x14   :  { %p382_p9 = scmp.lt.u32.totalorder %s378_s30, %s550_s2 }
  0x16   :  { %p384_p10 = pnand %p382_p9, %p379_p8 }
  0x18   :  { %387 = shalt.err (!%p384_p10)
}
  0x19   :  { %s388_s8 = scalar_lea.vmem %s31_s27, 16  ;;  %s392_s1 = scalar_lea.vmem %s31_s27, 32 }
  0x1a   :  { %p389_p11 = scmp.ne.s32.totalorder %s31_s27, %s388_s8  ;;  %p393_p12 = scmp.lt.s32.totalorder %s31_s27, %s31_s27 }
  0x1b   :  { %p394_p13 = scmp.lt.s32.totalorder %s392_s1, %s388_s8 }
  0x1d   :  { %p395_p0 = por %p394_p13, %p393_p12 }
  0x1f   :  { %p396_p1 = pnand %p395_p0, %p389_p11 }
  0x21   :  { %399 = shalt.err (!%p396_p1)
}
  0x22   :  { %33 = dma.hbm_to_vmem [thread:$0]  %s550_s2, 16, %s31_s27, [#allocation5]  }
  0x23   :  { %400 = dma.done.wait [#allocation3], 1024  }
  0x24   :  { %401 = vsyncadd [#allocation3], 4294966272 }
  0x25   :  { %402 = dma.done.wait [#allocation5], 16  }
  0x26   :  { %403 = vsyncadd [#allocation5], 4294967280  ;;  %v348_v0 = vld [vmem:[#allocation2] sm:$0xff]   ;;  %v349_v1 = vld [vmem:[#allocation2 + $0x8] sm:$0xff]  }
  0x27   :  { %296 = vmatprep.subr.bf16.mxu0 %v348_v0  ;;  %328 = vmatprep.subr.bf16.mxu1 %v348_v0  ;;  %v350_v2 = vld [vmem:[#allocation2 + $0x10] sm:$0xff]   ;;  %v351_v3 = vld [vmem:[#allocation2 + $0x18] sm:$0xff]   ;;  %v41_v4 = vld [vmem:[%s548_s0] sm:$0xff] }
  0x28   :  { %297 = vmatpush3.bf16.msra.mxu0 %v348_v0  ;;  %336 = vmatpush3.bf16.msra.mxu1 %v348_v0  ;;  %v42_v5 = vld [vmem:[%s548_s0 + $0x8] sm:$0xff]  ;;  %v49_v6 = vld [vmem:[%s548_s0 + $0x40] sm:$0xff]  ;;  %v354_v12 = vld [vmem:[#allocation2 + $0x30] sm:$0xff]  }
  0x29   :  { %298 = vmatprep.subr.bf16.mxu0 %v349_v1  ;;  %329 = vmatprep.subr.bf16.mxu1 %v349_v1  ;;  %v57_v7 = vpack.c.bf16 %v42_v5, %v41_v4  ;;  %v50_v8 = vld [vmem:[%s548_s0 + $0x48] sm:$0xff]  ;;  %v352_v10 = vld [vmem:[#allocation2 + $0x20] sm:$0xff]   ;;  %v355_v13 = vld [vmem:[#allocation2 + $0x38] sm:$0xff]  }
  0x2a   :  { %v61_v9 = vpack.c.bf16 %v50_v8, %v49_v6  ;;  %v353_v11 = vld [vmem:[#allocation2 + $0x28] sm:$0xff]   ;;  %v43_v14 = vld [vmem:[%s548_s0 + $0x10] sm:$0xff]  ;;  %v44_v15 = vld [vmem:[%s548_s0 + $0x18] sm:$0xff] }
  0x2b   :  { %312 = vmatprep.mubr.bf16.mxu0 %v57_v7  ;;  %v51_v16 = vld [vmem:[%s548_s0 + $0x50] sm:$0xff]  ;;  %v52_v17 = vld [vmem:[%s548_s0 + $0x58] sm:$0xff]  ;;  %v45_v18 = vld [vmem:[%s548_s0 + $0x20] sm:$0xff]  ;;  %v58_v22 = vpack.c.bf16 %v44_v15, %v43_v14 }
  0x2c   :  { %299 = vmatpush3.bf16.msra.mxu0 %v349_v1  ;;  %337 = vmatpush3.bf16.msra.mxu1 %v349_v1  ;;  %v46_v19 = vld [vmem:[%s548_s0 + $0x28] sm:$0xff]  ;;  %v53_v20 = vld [vmem:[%s548_s0 + $0x60] sm:$0xff]  ;;  %v62_v23 = vpack.c.bf16 %v52_v17, %v51_v16  ;;  %v47_v26 = vld [vmem:[%s548_s0 + $0x30] sm:$0xff] }
  0x2d   :  { %300 = vmatprep.subr.bf16.mxu0 %v350_v2  ;;  %330 = vmatprep.subr.bf16.mxu1 %v350_v2  ;;  %v54_v21 = vld [vmem:[%s548_s0 + $0x68] sm:$0xff]  ;;  %v59_v24 = vpack.c.bf16 %v46_v19, %v45_v18  ;;  %v48_v27 = vld [vmem:[%s548_s0 + $0x38] sm:$0xff]  ;;  %v55_v28 = vld [vmem:[%s548_s0 + $0x70] sm:$0xff] }
  0x2e   :  { %320 = vmatprep.mubr.bf16.mxu1 %v61_v9  ;;  %v63_v25 = vpack.c.bf16 %v54_v21, %v53_v20  ;;  %v56_v29 = vld [vmem:[%s548_s0 + $0x78] sm:$0xff]  ;;  %v60_v30 = vpack.c.bf16 %v48_v27, %v47_v26  ;;  %v271_v32 = vld [vmem:[#allocation4] ss:$0 sm:$0xff] }
  0x2f   :  { %v64_v31 = vpack.c.bf16 %v56_v29, %v55_v28 }
  0x30   :  { %301 = vmatpush3.bf16.msra.mxu0 %v350_v2  ;;  %338 = vmatpush3.bf16.msra.mxu1 %v350_v2 }
  0x31   :  { %302 = vmatprep.subr.bf16.mxu0 %v351_v3  ;;  %331 = vmatprep.subr.bf16.mxu1 %v351_v3 }
  0x34   :  { %303 = vmatpush3.bf16.msra.mxu0 %v351_v3  ;;  %339 = vmatpush3.bf16.msra.mxu1 %v351_v3 }
  0x35   :  { %304 = vmatprep.subr.bf16.mxu0 %v352_v10  ;;  %332 = vmatprep.subr.bf16.mxu1 %v352_v10 }
  0x38   :  { %305 = vmatpush3.bf16.msra.mxu0 %v352_v10  ;;  %340 = vmatpush3.bf16.msra.mxu1 %v352_v10 }
  0x39   :  { %306 = vmatprep.subr.bf16.mxu0 %v353_v11  ;;  %333 = vmatprep.subr.bf16.mxu1 %v353_v11 }
  0x3c   :  { %307 = vmatpush3.bf16.msra.mxu0 %v353_v11  ;;  %341 = vmatpush3.bf16.msra.mxu1 %v353_v11 }
  0x3d   :  { %308 = vmatprep.subr.bf16.mxu0 %v354_v12  ;;  %334 = vmatprep.subr.bf16.mxu1 %v354_v12 }
  0x40   :  { %309 = vmatpush3.bf16.msra.mxu0 %v354_v12  ;;  %342 = vmatpush3.bf16.msra.mxu1 %v354_v12 }
  0x41   :  { %310 = vmatprep.subr.bf16.mxu0 %v355_v13  ;;  %335 = vmatprep.subr.bf16.mxu1 %v355_v13 }
  0x44   :  { %311 = vmatpush3.bf16.msra.mxu0 %v355_v13  ;;  %343 = vmatpush3.bf16.msra.mxu1 %v355_v13 }
  0x47   :  { %313 = vmatmul.mubr.bf16.vlgmr.msra.gmra.mrb[0].mxu0 %v58_v22  ;;  %321 = vmatmul.mubr.bf16.vlgmr.msra.gmra.mrb[0].mxu1 %v62_v23 }
  0x48   :  { %316 = vmatprep.mubr.bf16.mxu0 %v59_v24  ;;  %324 = vmatprep.mubr.bf16.mxu1 %v63_v25 }
  0x4f   :  { %317 = vmatmul.mubr.bf16.gmra.mrb[4].mxu0 %v60_v30  ;;  %325 = vmatmul.mubr.bf16.gmra.mrb[4].mxu1 %v64_v31 }
 0x11a   :  { %v314_v33 = vpop.f32.mrb[0].mxu0  ;;  %v322_v34 = vpop.f32.mrb[0].mxu1 }
 0x11b   :  { %v179_v35 = vadd.f32 %v314_v33, %v271_v32  ;;  %v211_v36 = vadd.f32 %v322_v34, %v271_v32  ;;  %v170_v37 = vpop.f32.mrb[1].mxu0  ;;  %v202_v38 = vpop.f32.mrb[1].mxu1 }
 0x11c   :  { %v171_v39 = vadd.f32 %v271_v32, %v170_v37  ;;  %v203_v40 = vadd.f32 %v271_v32, %v202_v38  ;;  %v315_v41 = vpop.f32.mrb[2].mxu0  ;;  %v323_v42 = vpop.f32.mrb[2].mxu1 }
 0x11d   :  { %v235_v43 = vmax.f32 %v179_v35, 0.0  ;;  %v243_v44 = vmax.f32 %v211_v36, 0.0  ;;  %v182_v45 = vadd.f32 %v315_v41, %v271_v32  ;;  %v214_v46 = vadd.f32 %v323_v42, %v271_v32  ;;  %v173_v47 = vpop.f32.mrb[3].mxu0  ;;  %v205_v48 = vpop.f32.mrb[3].mxu1 }
 0x11e   :  { %v233_v49 = vmax.f32 %v171_v39, 0.0  ;;  %v241_v50 = vmax.f32 %v203_v40, 0.0  ;;  %v174_v51 = vadd.f32 %v271_v32, %v173_v47  ;;  %v206_v52 = vadd.f32 %v271_v32, %v205_v48 }
 0x11f   :  { %251 = vst [vmem:[%s551_s3 + $0x10] sm:$0xff] %v235_v43  ;;  %259 = vst [vmem:[%s551_s3 + $0x50] sm:$0xff] %v243_v44  ;;  %v236_v53 = vmax.f32 %v182_v45, 0.0  ;;  %v244_v54 = vmax.f32 %v214_v46, 0.0 }
 0x120   :  { %249 = vst [vmem:[%s551_s3] sm:$0xff] %v233_v49  ;;  %257 = vst [vmem:[%s551_s3 + $0x40] sm:$0xff] %v241_v50  ;;  %v234_v55 = vmax.f32 %v174_v51, 0.0  ;;  %v242_v56 = vmax.f32 %v206_v52, 0.0 }
 0x121   :  { %252 = vst [vmem:[%s551_s3 + $0x18] sm:$0xff] %v236_v53  ;;  %260 = vst [vmem:[%s551_s3 + $0x58] sm:$0xff] %v244_v54 }
 0x122   :  { %250 = vst [vmem:[%s551_s3 + $0x8] sm:$0xff] %v234_v55  ;;  %258 = vst [vmem:[%s551_s3 + $0x48] sm:$0xff] %v242_v56  ;;  %v318_v57 = vpop.f32.mrb[4].mxu0  ;;  %v326_v58 = vpop.f32.mrb[4].mxu1 }
 0x123   :  { %v195_v59 = vadd.f32 %v318_v57, %v271_v32  ;;  %v227_v60 = vadd.f32 %v326_v58, %v271_v32  ;;  %v186_v61 = vpop.f32.mrb[5].mxu0  ;;  %v218_v62 = vpop.f32.mrb[5].mxu1 }
 0x124   :  { %v187_v63 = vadd.f32 %v271_v32, %v186_v61  ;;  %v219_v0 = vadd.f32 %v271_v32, %v218_v62  ;;  %v319_v1 = vpop.f32.mrb[6].mxu0  ;;  %v327_v2 = vpop.f32.mrb[6].mxu1 }
 0x125   :  { %v239_v3 = vmax.f32 %v195_v59, 0.0  ;;  %v247_v4 = vmax.f32 %v227_v60, 0.0  ;;  %v198_v5 = vadd.f32 %v319_v1, %v271_v32  ;;  %v230_v6 = vadd.f32 %v327_v2, %v271_v32  ;;  %v189_v7 = vpop.f32.mrb[7].mxu0  ;;  %v221_v8 = vpop.f32.mrb[7].mxu1 }
 0x126   :  { %v237_v9 = vmax.f32 %v187_v63, 0.0  ;;  %v245_v10 = vmax.f32 %v219_v0, 0.0  ;;  %v190_v11 = vadd.f32 %v271_v32, %v189_v7  ;;  %v222_v12 = vadd.f32 %v271_v32, %v221_v8 }
 0x127   :  { %255 = vst [vmem:[%s551_s3 + $0x30] sm:$0xff] %v239_v3  ;;  %263 = vst [vmem:[%s551_s3 + $0x70] sm:$0xff] %v247_v4  ;;  %v240_v13 = vmax.f32 %v198_v5, 0.0  ;;  %v248_v14 = vmax.f32 %v230_v6, 0.0 }
 0x128   :  { %253 = vst [vmem:[%s551_s3 + $0x20] sm:$0xff] %v237_v9  ;;  %261 = vst [vmem:[%s551_s3 + $0x60] sm:$0xff] %v245_v10  ;;  %v238_v15 = vmax.f32 %v190_v11, 0.0  ;;  %v246_v16 = vmax.f32 %v222_v12, 0.0 }
 0x129   :  { %256 = vst [vmem:[%s551_s3 + $0x38] sm:$0xff] %v240_v13  ;;  %264 = vst [vmem:[%s551_s3 + $0x78] sm:$0xff] %v248_v14 }
 0x12a   :  { %254 = vst [vmem:[%s551_s3 + $0x28] sm:$0xff] %v238_v15  ;;  %262 = vst [vmem:[%s551_s3 + $0x68] sm:$0xff] %v246_v16 }
 0x12b   :  { %269 = vsyncpa [#allocation3], 1 }
 0x12c   :  { %270 = vsyncpa [#allocation5], 1 }

// kernel: transformer_model_forward.5
= control target key start
LH: loop header
LB: loop body
LE: loop exit
PB: predicated region body
PF: predicated region fallthrough
CT: control target
= control target key end

     0   :  { %s1551_s1 = inlined_call_operand.vmem [shape: bf16[1152,128], index: 1, kind: input, shape index: {}]   ;;  %s1552_s0 = inlined_call_operand.vmem [shape: f32[32,1152], index: 0, kind: input, shape index: {}]   ;;  %s1553_s2 = inlined_call_operand.vmem [shape: f32[1,128], index: 2, kind: input, shape index: {}]   ;;  %s1554_s3 = inlined_call_operand.vmem [shape: f32[32,128], index: 3, kind: output, shape index: {}]  }
   0x1   :  { %v1120_v0 = vld [vmem:[%s1551_s1 + $0x40] sm:$0xff]   ;;  %v1124_v4 = vld [vmem:[%s1551_s1 + $0x48] sm:$0xff]   ;;  %v1128_v8 = vld [vmem:[%s1551_s1 + $0x50] sm:$0xff]  }
   0x2   :  { %v1121_v1 = vld [vmem:[%s1551_s1] sm:$0xff]   ;;  %978 = vmatprep.subr.bf16.mxu0 %v1120_v0  ;;  %v1125_v5 = vld [vmem:[%s1551_s1 + $0x8] sm:$0xff]   ;;  %v1129_v9 = vld [vmem:[%s1551_s1 + $0x10] sm:$0xff]  }
   0x3   :  { %v1122_v2 = vld [vmem:[%s1551_s1 + $0xc0] sm:$0xff]   ;;  %979 = vmatpush3.bf16.msra.mxu0 %v1121_v1  ;;  %v1126_v6 = vld [vmem:[%s1551_s1 + $0xc8] sm:$0xff]   ;;  %v1130_v10 = vld [vmem:[%s1551_s1 + $0xd0] sm:$0xff]  }
   0x4   :  { %v1123_v3 = vld [vmem:[%s1551_s1 + $0x80] sm:$0xff]   ;;  %1006 = vmatprep.subr.bf16.mxu1 %v1122_v2  ;;  %980 = vmatprep.subr.bf16.mxu0 %v1124_v4  ;;  %v1127_v7 = vld [vmem:[%s1551_s1 + $0x88] sm:$0xff]   ;;  %v1131_v11 = vld [vmem:[%s1551_s1 + $0x90] sm:$0xff]  }
   0x5   :  { %1007 = vmatpush3.bf16.msra.mxu1 %v1123_v3  ;;  %v1132_v12 = vld [vmem:[%s1551_s1 + $0x58] sm:$0xff]   ;;  %v1136_v16 = vld [vmem:[%s1551_s1 + $0x60] sm:$0xff]   ;;  %v1140_v20 = vld [vmem:[%s1551_s1 + $0x68] sm:$0xff]  }
   0x6   :  { %1008 = vmatprep.subr.bf16.mxu1 %v1126_v6  ;;  %v1133_v13 = vld [vmem:[%s1551_s1 + $0x18] sm:$0xff]   ;;  %v1137_v17 = vld [vmem:[%s1551_s1 + $0x20] sm:$0xff]   ;;  %v1141_v21 = vld [vmem:[%s1551_s1 + $0x28] sm:$0xff]  }
   0x7   :  { %981 = vmatpush3.bf16.msra.mxu0 %v1125_v5  ;;  %v1134_v14 = vld [vmem:[%s1551_s1 + $0xd8] sm:$0xff]   ;;  %v1138_v18 = vld [vmem:[%s1551_s1 + $0xe0] sm:$0xff]   ;;  %v1142_v22 = vld [vmem:[%s1551_s1 + $0xe8] sm:$0xff]  }
   0x8   :  { %982 = vmatprep.subr.bf16.mxu0 %v1128_v8  ;;  %v1135_v15 = vld [vmem:[%s1551_s1 + $0x98] sm:$0xff]   ;;  %v1139_v19 = vld [vmem:[%s1551_s1 + $0xa0] sm:$0xff]   ;;  %v1143_v23 = vld [vmem:[%s1551_s1 + $0xa8] sm:$0xff]  }
   0x9   :  { %1009 = vmatpush3.bf16.msra.mxu1 %v1127_v7  ;;  %v1144_v24 = vld [vmem:[%s1551_s1 + $0x70] sm:$0xff]   ;;  %v1148_v28 = vld [vmem:[%s1551_s1 + $0x78] sm:$0xff]   ;;  %v16_v31 = vld [vmem:[%s1552_s0 + $0x8] sm:$0xff] }
   0xa   :  { %1010 = vmatprep.subr.bf16.mxu1 %v1130_v10  ;;  %v1145_v25 = vld [vmem:[%s1551_s1 + $0x30] sm:$0xff]   ;;  %v1149_v29 = vld [vmem:[%s1551_s1 + $0x38] sm:$0xff]   ;;  %v15_v35 = vld [vmem:[%s1552_s0] sm:$0xff] }
   0xb   :  { %983 = vmatpush3.bf16.msra.mxu0 %v1129_v9  ;;  %v1146_v26 = vld [vmem:[%s1551_s1 + $0xf0] sm:$0xff]   ;;  %v1150_v30 = vld [vmem:[%s1551_s1 + $0xf8] sm:$0xff]   ;;  %v24_v36 = vld [vmem:[%s1552_s0 + $0x48] sm:$0xff] }
   0xc   :  { %984 = vmatprep.subr.bf16.mxu0 %v1132_v12  ;;  %v1147_v27 = vld [vmem:[%s1551_s1 + $0xb0] sm:$0xff]   ;;  %v1151_v34 = vld [vmem:[%s1551_s1 + $0xb8] sm:$0xff]   ;;  %v51_v37 = vpack.c.bf16 %v24_v36, %v15_v35  ;;  %v1152_v38 = vld [vmem:[%s1551_s1 + $0x140] sm:$0xff]  }
   0xd   :  { %1011 = vmatpush3.bf16.msra.mxu1 %v1131_v11  ;;  %v25_v32 = vld [vmem:[%s1552_s0 + $0x50] sm:$0xff]  ;;  %v18_v39 = vld [vmem:[%s1552_s0 + $0x18] sm:$0xff]  ;;  %v27_v40 = vld [vmem:[%s1552_s0 + $0x60] sm:$0xff] }
   0xe   :  { %1012 = vmatprep.subr.bf16.mxu1 %v1134_v14  ;;  %v52_v33 = vpack.c.bf16 %v25_v32, %v16_v31  ;;  %v54_v41 = vpack.c.bf16 %v27_v40, %v18_v39  ;;  %v1153_v42 = vld [vmem:[%s1551_s1 + $0x100] sm:$0xff]   ;;  %v17_v43 = vld [vmem:[%s1552_s0 + $0x10] sm:$0xff]  ;;  %v26_v44 = vld [vmem:[%s1552_s0 + $0x58] sm:$0xff] }
   0xf   :  { %985 = vmatpush3.bf16.msra.mxu0 %v1133_v13  ;;  %v53_v45 = vpack.c.bf16 %v26_v44, %v17_v43  ;;  %v1154_v46 = vld [vmem:[%s1551_s1 + $0x1c0] sm:$0xff]   ;;  %v1156_v48 = vld [vmem:[%s1551_s1 + $0x148] sm:$0xff]   ;;  %v1160_v52 = vld [vmem:[%s1551_s1 + $0x150] sm:$0xff]  }
  0x10   :  { %986 = vmatprep.subr.bf16.mxu0 %v1136_v16  ;;  %684 = vmatprep.mubr.bf16.mxu0 %v52_v33  ;;  %v1155_v47 = vld [vmem:[%s1551_s1 + $0x180] sm:$0xff]   ;;  %v1157_v49 = vld [vmem:[%s1551_s1 + $0x108] sm:$0xff]   ;;  %v1161_v53 = vld [vmem:[%s1551_s1 + $0x110] sm:$0xff]  }
  0x11   :  { %1013 = vmatpush3.bf16.msra.mxu1 %v1135_v15  ;;  %733 = vmatprep.mubr.bf16.mxu1 %v54_v41  ;;  %v1158_v50 = vld [vmem:[%s1551_s1 + $0x1c8] sm:$0xff]   ;;  %v1162_v54 = vld [vmem:[%s1551_s1 + $0x1d0] sm:$0xff]   ;;  %v1164_v56 = vld [vmem:[%s1551_s1 + $0x158] sm:$0xff]  }
  0x12   :  { %1014 = vmatprep.subr.bf16.mxu1 %v1138_v18  ;;  %v1159_v51 = vld [vmem:[%s1551_s1 + $0x188] sm:$0xff]   ;;  %v1163_v55 = vld [vmem:[%s1551_s1 + $0x190] sm:$0xff]   ;;  %v1165_v57 = vld [vmem:[%s1551_s1 + $0x118] sm:$0xff]  }
  0x13   :  { %987 = vmatpush3.bf16.msra.mxu0 %v1137_v17  ;;  %v1166_v58 = vld [vmem:[%s1551_s1 + $0x1d8] sm:$0xff]   ;;  %v1168_v60 = vld [vmem:[%s1551_s1 + $0x160] sm:$0xff]   ;;  %v1172_v0 = vld [vmem:[%s1551_s1 + $0x168] sm:$0xff]  }
  0x14   :  { %988 = vmatprep.subr.bf16.mxu0 %v1140_v20  ;;  %v1167_v59 = vld [vmem:[%s1551_s1 + $0x198] sm:$0xff]   ;;  %v1169_v61 = vld [vmem:[%s1551_s1 + $0x120] sm:$0xff]   ;;  %v1173_v4 = vld [vmem:[%s1551_s1 + $0x128] sm:$0xff]  }
  0x15   :  { %1015 = vmatpush3.bf16.msra.mxu1 %v1139_v19  ;;  %v1170_v62 = vld [vmem:[%s1551_s1 + $0x1e0] sm:$0xff]   ;;  %v34_v1 = vld [vmem:[%s1552_s0 + $0x98] sm:$0xff]  ;;  %v33_v5 = vld [vmem:[%s1552_s0 + $0x90] sm:$0xff] }
  0x16   :  { %1016 = vmatprep.subr.bf16.mxu1 %v1142_v22  ;;  %v1171_v63 = vld [vmem:[%s1551_s1 + $0x1a0] sm:$0xff]   ;;  %v42_v6 = vld [vmem:[%s1552_s0 + $0xd8] sm:$0xff]  ;;  %v1174_v8 = vld [vmem:[%s1551_s1 + $0x1e8] sm:$0xff]  }
  0x17   :  { %989 = vmatpush3.bf16.msra.mxu0 %v1141_v21  ;;  %v43_v2 = vld [vmem:[%s1552_s0 + $0xe0] sm:$0xff]  ;;  %v60_v7 = vpack.c.bf16 %v42_v6, %v33_v5  ;;  %v36_v9 = vld [vmem:[%s1552_s0 + $0xa8] sm:$0xff]  ;;  %v45_v10 = vld [vmem:[%s1552_s0 + $0xf0] sm:$0xff] }
  0x18   :  { %990 = vmatprep.subr.bf16.mxu0 %v1144_v24  ;;  %v61_v3 = vpack.c.bf16 %v43_v2, %v34_v1  ;;  %v63_v11 = vpack.c.bf16 %v45_v10, %v36_v9  ;;  %v1175_v12 = vld [vmem:[%s1551_s1 + $0x1a8] sm:$0xff]   ;;  %v35_v13 = vld [vmem:[%s1552_s0 + $0xa0] sm:$0xff]  ;;  %v1176_v16 = vld [vmem:[%s1551_s1 + $0x170] sm:$0xff]  }
  0x19   :  { %1017 = vmatpush3.bf16.msra.mxu1 %v1143_v23  ;;  %v44_v14 = vld [vmem:[%s1552_s0 + $0xe8] sm:$0xff]  ;;  %v1177_v17 = vld [vmem:[%s1551_s1 + $0x130] sm:$0xff]   ;;  %v1180_v20 = vld [vmem:[%s1551_s1 + $0x178] sm:$0xff]  }
  0x1a   :  { %1018 = vmatprep.subr.bf16.mxu1 %v1146_v26  ;;  %v62_v15 = vpack.c.bf16 %v44_v14, %v35_v13  ;;  %v1178_v18 = vld [vmem:[%s1551_s1 + $0x1f0] sm:$0xff]   ;;  %v1181_v21 = vld [vmem:[%s1551_s1 + $0x138] sm:$0xff]   ;;  %v20_v23 = vld [vmem:[%s1552_s0 + $0x28] sm:$0xff] }
  0x1b   :  { %991 = vmatpush3.bf16.msra.mxu0 %v1145_v25  ;;  %v1179_v19 = vld [vmem:[%s1551_s1 + $0x1b0] sm:$0xff]   ;;  %v1182_v22 = vld [vmem:[%s1551_s1 + $0x1f8] sm:$0xff]   ;;  %v31_v32 = vld [vmem:[%s1552_s0 + $0x80] sm:$0xff] }
  0x1c   :  { %992 = vmatprep.subr.bf16.mxu0 %v1148_v28  ;;  %v29_v24 = vld [vmem:[%s1552_s0 + $0x70] sm:$0xff]  ;;  %v1183_v26 = vld [vmem:[%s1551_s1 + $0x1b8] sm:$0xff]   ;;  %v28_v28 = vld [vmem:[%s1552_s0 + $0x68] sm:$0xff] }
  0x1d   :  { %1019 = vmatpush3.bf16.msra.mxu1 %v1147_v27  ;;  %v56_v25 = vpack.c.bf16 %v29_v24, %v20_v23  ;;  %v19_v27 = vld [vmem:[%s1552_s0 + $0x20] sm:$0xff]  ;;  %v22_v31 = vld [vmem:[%s1552_s0 + $0x38] sm:$0xff]  ;;  %v21_v33 = vld [vmem:[%s1552_s0 + $0x30] sm:$0xff] }
  0x1e   :  { %1020 = vmatprep.subr.bf16.mxu1 %v1150_v30  ;;  %v1184_v30 = vld [vmem:[%s1551_s1 + $0x200] sm:$0xff]   ;;  %v58_v35 = vpack.c.bf16 %v31_v32, %v22_v31  ;;  %v37_v40 = vld [vmem:[%s1552_s0 + $0xb0] sm:$0xff]  ;;  %v40_v44 = vld [vmem:[%s1552_s0 + $0xc8] sm:$0xff] }
  0x1f   :  { %993 = vmatpush3.bf16.msra.mxu0 %v1149_v29  ;;  %v55_v29 = vpack.c.bf16 %v28_v28, %v19_v27  ;;  %v47_v39 = vld [vmem:[%s1552_s0 + $0x100] sm:$0xff]  ;;  %v1186_v43 = vld [vmem:[%s1551_s1 + $0x210] sm:$0xff]  }
  0x20   :  { %1034 = vmatprep.subr.bf16.mxu0 %v1152_v38  ;;  %v38_v38 = vld [vmem:[%s1552_s0 + $0xb8] sm:$0xff] }
  0x21   :  { %1021 = vmatpush3.bf16.msra.mxu1 %v1151_v34  ;;  %v30_v34 = vld [vmem:[%s1552_s0 + $0x78] sm:$0xff]  ;;  %v65_v41 = vpack.c.bf16 %v47_v39, %v38_v38 }
  0x22   :  { %685 = vmatmul.mubr.bf16.vlgmr.msra.gmra.mrb[0].mxu0 %v51_v37  ;;  %1062 = vmatprep.subr.bf16.mxu1 %v1154_v46  ;;  %v57_v36 = vpack.c.bf16 %v30_v34, %v21_v33  ;;  %v1185_v37 = vld [vmem:[%s1551_s1 + $0x208] sm:$0xff]  }
  0x23   :  { %1035 = vmatpush3.bf16.msra.mxu0 %v1153_v42  ;;  %692 = vmatprep.mubr.bf16.mxu0 %v61_v3  ;;  %v46_v42 = vld [vmem:[%s1552_s0 + $0xf8] sm:$0xff] }
  0x24   :  { %734 = vmatmul.mubr.bf16.vlgmr.msra.gmra.mrb[0].mxu1 %v53_v45  ;;  %1036 = vmatprep.subr.bf16.mxu0 %v1156_v48  ;;  %v49_v45 = vld [vmem:[%s1552_s0 + $0x110] sm:$0xff]  ;;  %v64_v46 = vpack.c.bf16 %v46_v42, %v37_v40  ;;  %v39_v48 = vld [vmem:[%s1552_s0 + $0xc0] sm:$0xff] }
  0x25   :  { %1063 = vmatpush3.bf16.msra.mxu1 %v1155_v47  ;;  %741 = vmatprep.mubr.bf16.mxu1 %v63_v11  ;;  %v67_v47 = vpack.c.bf16 %v49_v45, %v40_v44 }
  0x26   :  { %1064 = vmatprep.subr.bf16.mxu1 %v1158_v50  ;;  %v1187_v50 = vld [vmem:[%s1551_s1 + $0x218] sm:$0xff]  }
  0x27   :  { %1037 = vmatpush3.bf16.msra.mxu0 %v1157_v49  ;;  %v48_v49 = vld [vmem:[%s1552_s0 + $0x108] sm:$0xff] }
  0x28   :  { %1038 = vmatprep.subr.bf16.mxu0 %v1160_v52  ;;  %v23_v52 = vld [vmem:[%s1552_s0 + $0x40] sm:$0xff] }
  0x29   :  { %1065 = vmatpush3.bf16.msra.mxu1 %v1159_v51  ;;  %v66_v51 = vpack.c.bf16 %v48_v49, %v39_v48 }
  0x2a   :  { %1066 = vmatprep.subr.bf16.mxu1 %v1162_v54  ;;  %693 = vmatmul.mubr.bf16.gmra.mrb[4].mxu0 %v60_v7  ;;  %v32_v54 = vld [vmem:[%s1552_s0 + $0x88] sm:$0xff] }
  0x2b   :  { %1039 = vmatpush3.bf16.msra.mxu0 %v1161_v53  ;;  %782 = vmatprep.mubr.bf16.mxu0 %v56_v25  ;;  %v1188_v53 = vld [vmem:[%s1551_s1 + $0x220] sm:$0xff]  }
  0x2c   :  { %1040 = vmatprep.subr.bf16.mxu0 %v1164_v56  ;;  %742 = vmatmul.mubr.bf16.gmra.mrb[4].mxu1 %v62_v15  ;;  %v1189_v56 = vld [vmem:[%s1551_s1 + $0x228] sm:$0xff]  }
  0x2d   :  { %1067 = vmatpush3.bf16.msra.mxu1 %v1163_v55  ;;  %831 = vmatprep.mubr.bf16.mxu1 %v58_v35  ;;  %v59_v55 = vpack.c.bf16 %v32_v54, %v23_v52 }
  0x2e   :  { %1068 = vmatprep.subr.bf16.mxu1 %v1166_v58  ;;  %v1191_v58 = vld [vmem:[%s1551_s1 + $0x238] sm:$0xff]  }
  0x2f   :  { %1041 = vmatpush3.bf16.msra.mxu0 %v1165_v57  ;;  %v1190_v57 = vld [vmem:[%s1551_s1 + $0x230] sm:$0xff]  }
  0x30   :  { %1042 = vmatprep.subr.bf16.mxu0 %v1168_v60  ;;  %v50_v60 = vld [vmem:[%s1552_s0 + $0x118] sm:$0xff] }
  0x31   :  { %1069 = vmatpush3.bf16.msra.mxu1 %v1167_v59  ;;  %v41_v59 = vld [vmem:[%s1552_s0 + $0xd0] sm:$0xff] }
  0x32   :  { %1070 = vmatprep.subr.bf16.mxu1 %v1170_v62 }
  0x33   :  { %1043 = vmatpush3.bf16.msra.mxu0 %v1169_v61  ;;  %v68_v61 = vpack.c.bf16 %v50_v60, %v41_v59 }
  0x34   :  { %1044 = vmatprep.subr.bf16.mxu0 %v1172_v0 }
  0x35   :  { %1071 = vmatpush3.bf16.msra.mxu1 %v1171_v63  ;;  %v905_v63 = vld [vmem:[%s1553_s2] ss:$0 sm:$0xff] }
  0x36   :  { %1072 = vmatprep.subr.bf16.mxu1 %v1174_v8 }
  0x37   :  { %1045 = vmatpush3.bf16.msra.mxu0 %v1173_v4 }
  0x38   :  { %1046 = vmatprep.subr.bf16.mxu0 %v1176_v16 }
  0x39   :  { %1073 = vmatpush3.bf16.msra.mxu1 %v1175_v12 }
  0x3a   :  { %1074 = vmatprep.subr.bf16.mxu1 %v1178_v18 }
  0x3b   :  { %1047 = vmatpush3.bf16.msra.mxu0 %v1177_v17 }
  0x3c   :  { %1048 = vmatprep.subr.bf16.mxu0 %v1180_v20 }
  0x3d   :  { %1075 = vmatpush3.bf16.msra.mxu1 %v1179_v19 }
  0x3e   :  { %1076 = vmatprep.subr.bf16.mxu1 %v1182_v22 }
  0x3f   :  { %1049 = vmatpush3.bf16.msra.mxu0 %v1181_v21 }
  0x40   :  { %1100 = vmatprep.subr.bf16.mxu0 %v1184_v30 }
  0x41   :  { %1077 = vmatpush3.bf16.msra.mxu1 %v1183_v26 }
  0x42   :  { %783 = vmatmul.mubr.bf16.vlgmr.msra.gmra.mrb[8].mxu0 %v55_v29 }
  0x43   :  { %1101 = vmatpush3.bf16.msra.mxu0 %v1184_v30  ;;  %790 = vmatprep.mubr.bf16.mxu0 %v65_v41 }
  0x44   :  { %1102 = vmatprep.subr.bf16.mxu0 %v1185_v37  ;;  %832 = vmatmul.mubr.bf16.vlgmr.msra.gmra.mrb[8].mxu1 %v57_v36 }
  0x45   :  { %839 = vmatprep.mubr.bf16.mxu1 %v67_v47 }
  0x47   :  { %1103 = vmatpush3.bf16.msra.mxu0 %v1185_v37 }
  0x48   :  { %1104 = vmatprep.subr.bf16.mxu0 %v1186_v43 }
  0x4a   :  { %791 = vmatmul.mubr.bf16.gmra.mrb[12].mxu0 %v64_v46 }
  0x4b   :  { %1105 = vmatpush3.bf16.msra.mxu0 %v1186_v43  ;;  %1116 = vmatprep.mubr.bf16.mxu0 %v59_v55 }
  0x4c   :  { %1106 = vmatprep.subr.bf16.mxu0 %v1187_v50  ;;  %840 = vmatmul.mubr.bf16.gmra.mrb[12].mxu1 %v66_v51 }
  0x4f   :  { %1107 = vmatpush3.bf16.msra.mxu0 %v1187_v50 }
  0x50   :  { %1108 = vmatprep.subr.bf16.mxu0 %v1188_v53 }
  0x53   :  { %1109 = vmatpush3.bf16.msra.mxu0 %v1188_v53 }
  0x54   :  { %1110 = vmatprep.subr.bf16.mxu0 %v1189_v56 }
  0x57   :  { %1111 = vmatpush3.bf16.msra.mxu0 %v1189_v56 }
  0x58   :  { %1112 = vmatprep.subr.bf16.mxu0 %v1190_v57 }
  0x5b   :  { %1113 = vmatpush3.bf16.msra.mxu0 %v1190_v57 }
  0x5c   :  { %1114 = vmatprep.subr.bf16.mxu0 %v1191_v58 }
  0x5f   :  { %1115 = vmatpush3.bf16.msra.mxu0 %v1191_v58 }
  0x62   :  { %1117 = vmatmul.mubr.bf16.vlgmr.msra.gmra.mrb[16].mxu0 %v68_v61 }
  0xf5   :  { %v994_v62 = vpop.f32.mrb[0].mxu0 }
  0xf6   :  { %v995_v0 = vpop.f32.mrb[1].mxu0 }
  0xf7   :  { %v996_v1 = vadd.f32 %v995_v0, %v994_v62  ;;  %v997_v2 = vpop.f32.mrb[2].mxu0  ;;  %v1022_v3 = vpop.f32.mrb[0].mxu1 }
  0xf8   :  { %v998_v4 = vpop.f32.mrb[3].mxu0  ;;  %v1023_v7 = vpop.f32.mrb[1].mxu1 }
  0xf9   :  { %v687_v5 = vadd.f32 %v996_v1, %v905_v63  ;;  %v999_v6 = vadd.f32 %v998_v4, %v997_v2  ;;  %v1024_v8 = vadd.f32 %v1023_v7, %v1022_v3  ;;  %v1025_v9 = vpop.f32.mrb[2].mxu1 }
  0xfa   :  { %v1026_v11 = vpop.f32.mrb[3].mxu1 }
  0xfb   :  { %v690_v10 = vadd.f32 %v999_v6, %v905_v63  ;;  %v736_v12 = vadd.f32 %v1024_v8, %v687_v5  ;;  %v1027_v13 = vadd.f32 %v1026_v11, %v1025_v9 }
  0xfd   :  { %v739_v14 = vadd.f32 %v1027_v13, %v690_v10  ;;  %v1000_v15 = vpop.f32.mrb[4].mxu0 }
  0xfe   :  { %v1001_v16 = vpop.f32.mrb[5].mxu0 }
  0xff   :  { %v1002_v17 = vadd.f32 %v1001_v16, %v1000_v15  ;;  %v1003_v18 = vpop.f32.mrb[6].mxu0  ;;  %v1028_v21 = vpop.f32.mrb[4].mxu1 }
 0x100   :  { %v1004_v19 = vpop.f32.mrb[7].mxu0  ;;  %v1029_v23 = vpop.f32.mrb[5].mxu1 }
 0x101   :  { %v695_v20 = vadd.f32 %v1002_v17, %v905_v63  ;;  %v1005_v22 = vadd.f32 %v1004_v19, %v1003_v18  ;;  %v1030_v25 = vadd.f32 %v1029_v23, %v1028_v21  ;;  %v1031_v26 = vpop.f32.mrb[6].mxu1 }
 0x102   :  { %v1032_v27 = vpop.f32.mrb[7].mxu1 }
 0x103   :  { %v698_v24 = vadd.f32 %v1005_v22, %v905_v63  ;;  %v744_v28 = vadd.f32 %v1030_v25, %v695_v20  ;;  %v1033_v29 = vadd.f32 %v1032_v27, %v1031_v26 }
 0x105   :  { %v747_v30 = vadd.f32 %v1033_v29, %v698_v24 }
 0x115   :  { %v1050_v31 = vpop.f32.mrb[8].mxu0 }
 0x116   :  { %v1051_v32 = vpop.f32.mrb[9].mxu0 }
 0x117   :  { %v1052_v33 = vadd.f32 %v1051_v32, %v1050_v31  ;;  %v1053_v34 = vpop.f32.mrb[10].mxu0  ;;  %v1078_v35 = vpop.f32.mrb[8].mxu1 }
 0x118   :  { %v1054_v36 = vpop.f32.mrb[11].mxu0  ;;  %v1079_v39 = vpop.f32.mrb[9].mxu1 }
 0x119   :  { %v785_v37 = vadd.f32 %v1052_v33, %v736_v12  ;;  %v1055_v38 = vadd.f32 %v1054_v36, %v1053_v34  ;;  %v1080_v40 = vadd.f32 %v1079_v39, %v1078_v35  ;;  %v1081_v41 = vpop.f32.mrb[10].mxu1 }
 0x11a   :  { %v1082_v43 = vpop.f32.mrb[11].mxu1 }
 0x11b   :  { %v788_v42 = vadd.f32 %v1055_v38, %v739_v14  ;;  %v1083_v44 = vadd.f32 %v1082_v43, %v1081_v41  ;;  %v834_v45 = vadd.f32 %v1080_v40, %v785_v37 }
 0x11d   :  { %v1056_v46 = vpop.f32.mrb[12].mxu0  ;;  %v837_v48 = vadd.f32 %v1083_v44, %v788_v42 }
 0x11e   :  { %v1057_v47 = vpop.f32.mrb[13].mxu0 }
 0x11f   :  { %v1058_v49 = vadd.f32 %v1057_v47, %v1056_v46  ;;  %v1059_v50 = vpop.f32.mrb[14].mxu0  ;;  %v1084_v51 = vpop.f32.mrb[12].mxu1 }
 0x120   :  { %v1060_v52 = vpop.f32.mrb[15].mxu0  ;;  %v1085_v55 = vpop.f32.mrb[13].mxu1 }
 0x121   :  { %v793_v53 = vadd.f32 %v1058_v49, %v744_v28  ;;  %v1061_v54 = vadd.f32 %v1060_v52, %v1059_v50  ;;  %v1086_v56 = vadd.f32 %v1085_v55, %v1084_v51  ;;  %v1087_v57 = vpop.f32.mrb[14].mxu1 }
 0x122   :  { %v1088_v59 = vpop.f32.mrb[15].mxu1 }
 0x123   :  { %v796_v58 = vadd.f32 %v1061_v54, %v747_v30  ;;  %v1089_v60 = vadd.f32 %v1088_v59, %v1087_v57  ;;  %v842_v61 = vadd.f32 %v1086_v56, %v793_v53 }
 0x125   :  { %v845_v62 = vadd.f32 %v1089_v60, %v796_v58 }
 0x135   :  { %v1118_v63 = vpop.f32.mrb[16].mxu0 }
 0x136   :  { %v891_v0 = vadd.f32 %v1118_v63, %v842_v61  ;;  %v882_v1 = vpop.f32.mrb[17].mxu0 }
 0x137   :  { %v883_v2 = vadd.f32 %v882_v1, %v834_v45  ;;  %v1119_v3 = vpop.f32.mrb[18].mxu0 }
 0x138   :  { %899 = vst [vmem:[%s1554_s3 + $0x10] sm:$0xff] %v891_v0  ;;  %v894_v4 = vadd.f32 %v1119_v3, %v845_v62  ;;  %v885_v5 = vpop.f32.mrb[19].mxu0 }
 0x139   :  { %897 = vst [vmem:[%s1554_s3] sm:$0xff] %v883_v2  ;;  %v886_v6 = vadd.f32 %v885_v5, %v837_v48 }
 0x13a   :  { %900 = vst [vmem:[%s1554_s3 + $0x18] sm:$0xff] %v894_v4 }
 0x13b   :  { %898 = vst [vmem:[%s1554_s3 + $0x8] sm:$0xff] %v886_v6 }

// kernel: transformer_model_forward.7
= control target key start
LH: loop header
LB: loop body
LE: loop exit
PB: predicated region body
PF: predicated region fallthrough
CT: control target
= control target key end

     0   :  { %v394_v1 = vmov 0.0   ;;  %vm395_vm0 = vmmov 0   ;;  %s499_s0 = inlined_call_operand.vmem [shape: f32[2,24,128], index: 0, kind: input, shape index: {}]   ;;  %s500_s1 = inlined_call_operand.vmem [shape: bf16[128,128], index: 1, kind: input, shape index: {}]   ;;  %s501_s2 = inlined_call_operand.vmem [shape: f32[1,128], index: 2, kind: input, shape index: {}]   ;;  %s502_s3 = inlined_call_operand.vmem [shape: bf16[128,2], index: 3, kind: input, shape index: {}]   ;;  %s503_s4 = inlined_call_operand.vmem [shape: f32[1,2], index: 4, kind: input, shape index: {}]   ;;  %s504_s5 = inlined_call_operand.hbm [shape: f32[2,2], index: 5, kind: output, shape index: {}]  }
   0x1   :  { %v354_v0 = vld [vmem:[%s500_s1] sm:$0xff]   ;;  %311 = vmatprep.subr.bf16.mxu0 %v394_v1  ;;  %331 = vmatprep.subr.bf16.mxu1 %v394_v1  ;;  %v355_v2 = vld [vmem:[%s500_s1 + $0x8] sm:$0xff]   ;;  %v356_v3 = vld [vmem:[%s500_s1 + $0x10] sm:$0xff]  }
   0x2   :  { %312 = vmatpush3.bf16.msra.mxu0 %v354_v0  ;;  %327 = vmatprep.mubr.msk.bf16.mxu0 %vm395_vm0, %v394_v1  ;;  %v357_v4 = vld [vmem:[%s500_s1 + $0x18] sm:$0xff]   ;;  %v362_v5 = vld [vmem:[%s502_s3] sm:$0xff]   ;;  %v363_v7 = vld [vmem:[%s502_s3 + $0x8] sm:$0xff]  }
   0x3   :  { %313 = vmatprep.subr.bf16.mxu0 %v394_v1  ;;  %347 = vmatprep.mubr.msk.bf16.mxu1 %vm395_vm0, %v394_v1  ;;  %v23_v6 = vld [vmem:[%s499_s0 + $0x18] sm:$0x1]  ;;  %v358_v8 = vld [vmem:[%s500_s1 + $0x20] sm:$0xff]   ;;  %v364_v11 = vld [vmem:[%s502_s3 + $0x10] sm:$0xff]  }
   0x4   :  { %332 = vmatpush3.bf16.msra.mxu1 %v362_v5  ;;  %v22_v9 = vld [vmem:[%s499_s0] sm:$0x1]  ;;  %v25_v10 = vpack.c.bf16 %v23_v6, %v23_v6 }
   0x5   :  { %333 = vmatprep.subr.bf16.mxu1 %v394_v1 }
   0x6   :  { %314 = vmatpush3.bf16.msra.mxu0 %v355_v2 }
   0x7   :  { %315 = vmatprep.subr.bf16.mxu0 %v394_v1 }
   0x8   :  { %334 = vmatpush3.bf16.msra.mxu1 %v363_v7 }
   0x9   :  { %335 = vmatprep.subr.bf16.mxu1 %v394_v1 }
   0xa   :  { %316 = vmatpush3.bf16.msra.mxu0 %v356_v3 }
   0xb   :  { %317 = vmatprep.subr.bf16.mxu0 %v394_v1 }
   0xe   :  { %318 = vmatpush3.bf16.msra.mxu0 %v357_v4 }
   0xf   :  { %319 = vmatprep.subr.bf16.mxu0 %v394_v1 }
  0x10   :  { %10 = vsyncpa [#allocation3], 0  ;;  %v359_v12 = vld [vmem:[%s500_s1 + $0x28] sm:$0xff]   ;;  %v24_v13 = vpack.c.bf16 %v22_v9, %v22_v9  ;;  %v52_v14 = vunpack.c.l.b16 %v25_v10  ;;  %336 = vmatpush3.bf16.msra.mxu1 %v364_v11  ;;  %v365_v15 = vld [vmem:[%s502_s3 + $0x18] sm:$0xff]   ;;  %vm54_vm1 = vcmask 1041409   ;;  %s396_s6 = smov [#allocation2]  }
  0x11   :  { %337 = vmatprep.subr.bf16.mxu1 %v394_v1  ;;  %v360_v16 = vld [vmem:[%s500_s1 + $0x30] sm:$0xff]   ;;  %v366_v19 = vld [vmem:[%s502_s3 + $0x20] sm:$0xff]   ;;  %v361_v20 = vld [vmem:[%s500_s1 + $0x38] sm:$0xff]   ;;  %s267_s7 = sshll.u32 %s396_s6, 4  ;;  %vm259_vm2 = vcmask 9216   ;;  %s268_s7 = int_to_ptr.vmem [resolvable:$true] %s267_s7 }
  0x12   :  { %320 = vmatpush3.bf16.msra.mxu0 %v358_v8  ;;  %v51_v17 = vunpack.c.l.b16 %v24_v13  ;;  %v53_v18 = vrot.slane %v52_v14, 7  ;;  %v367_v22 = vld [vmem:[%s502_s3 + $0x28] sm:$0xff]   ;;  %v368_v24 = vld [vmem:[%s502_s3 + $0x30] sm:$0xff]   ;;  %v369_v25 = vld [vmem:[%s502_s3 + $0x38] sm:$0xff]   ;;  %p375_p1 = scmp.lt.s32.totalorder %s268_s7, %s268_s7 }
  0x13   :  { %321 = vmatprep.subr.bf16.mxu0 %v394_v1  ;;  %v275_v26 = vld [vmem:[%s501_s2] ss:$0 sm:$0xff]  ;;  %s370_s2 = scalar_lea.vmem %s268_s7, 32 }
  0x14   :  { %338 = vmatpush3.bf16.msra.mxu1 %v365_v15  ;;  %v55_v21 = vsel %vm54_vm1, %v53_v18, %v51_v17  ;;  %v284_v34 = vld [vmem:[%s503_s4] ss:$0 sm:$0xff]  ;;  %p371_p0 = scmp.ne.s32.totalorder %s268_s7, %s370_s2  ;;  %p376_p2 = scmp.lt.s32.totalorder %s370_s2, %s370_s2 }
  0x15   :  { %339 = vmatprep.subr.bf16.mxu1 %v394_v1  ;;  %v56_v23 = vpack.c.b16 %v55_v21, %v55_v21 }
  0x16   :  { %322 = vmatpush3.bf16.msra.mxu0 %v359_v12  ;;  %p377_p3 = por %p376_p2, %p375_p1 }
  0x17   :  { %323 = vmatprep.subr.bf16.mxu0 %v394_v1 }
  0x18   :  { %340 = vmatpush3.bf16.msra.mxu1 %v366_v19  ;;  %p378_p4 = pnand %p377_p3, %p371_p0 }
  0x19   :  { %341 = vmatprep.subr.bf16.mxu1 %v394_v1 }
  0x1a   :  { %324 = vmatpush3.bf16.msra.mxu0 %v360_v16 }
  0x1b   :  { %325 = vmatprep.subr.bf16.mxu0 %v394_v1 }
  0x1c   :  { %342 = vmatpush3.bf16.msra.mxu1 %v367_v22 }
  0x1d   :  { %343 = vmatprep.subr.bf16.mxu1 %v394_v1 }
  0x1e   :  { %326 = vmatpush3.bf16.msra.mxu0 %v361_v20 }
  0x20   :  { %344 = vmatpush3.bf16.msra.mxu1 %v368_v24 }
  0x21   :  { %328 = vmatmul.mubr.bf16.vlgmr.msra.gmra.mrb[0].mxu0 %v56_v23  ;;  %345 = vmatprep.subr.bf16.mxu1 %v394_v1 }
  0x24   :  { %346 = vmatpush3.bf16.msra.mxu1 %v369_v25 }
  0xf4   :  { %v140_v27 = vpop.f32.mrb[0].mxu0 }
  0xf5   :  { %v141_v28 = vadd.f32 %v275_v26, %v140_v27  ;;  %v329_v29 = vpop.f32.mrb[1].mxu0 }
  0xf6   :  { %v143_v30 = vpop.f32.mrb[2].mxu0 }
  0xf7   :  { %v146_v31 = vmax.f32 %v141_v28, 0.0  ;;  %v330_v32 = vpop.f32.mrb[3].mxu0 }
  0xf9   :  { %v147_v33 = vpack.c.bf16 %v146_v31, %v146_v31 }
  0xfb   :  { %348 = vmatmul.mubr.bf16.vlgmr.msra.gmra.mrb[0].mxu1 %v147_v33 }
 0x1ce   :  { %v253_v35 = vpop.f32.mrb[0].mxu1 }
 0x1cf   :  { %v254_v36 = vadd.f32 %v284_v34, %v253_v35  ;;  %v349_v37 = vpop.f32.mrb[1].mxu1 }
 0x1d0   :  { %v256_v38 = vpop.f32.mrb[2].mxu1 }
 0x1d1   :  { %v350_v39 = vpop.f32.mrb[3].mxu1  ;;  %260 = vst.msk [vmem:[#allocation2] sm:$0x3] %vm259_vm2, %v254_v36 }
 0x1d2   :  { %381 = shalt.err (!%p378_p4)
}
 0x1d3   :  { %s382_s4 = scalar_lea.hbm %s504_s5, 32 }
 0x1d4   :  { %p383_p5 = scmp.ne.s32.totalorder %s504_s5, %s382_s4  ;;  %p386_p6 = scmp.lt.u32.totalorder %s382_s4, %s504_s5 }
 0x1d6   :  { %p388_p7 = pnand %p386_p6, %p383_p5 }
 0x1d8   :  { %391 = shalt.err (!%p388_p7)
}
 0x1d9   :  { %270 = dma.vmem_to_hbm [thread:$0]  %s268_s7, 32, %s504_s5, [#allocation3]  }
 0x1da   :  { %392 = dma.done.wait [#allocation3], 32  }
 0x1db   :  { %393 = vsyncadd [#allocation3], 4294967264 }
 0x1dc   :  { %274 = vsyncpa [#allocation3], 1 }

// kernel: transformer_model_forward.6
= control target key start
LH: loop header
LB: loop body
LE: loop exit
PB: predicated region body
PF: predicated region fallthrough
CT: control target
= control target key end

     0   :  { %s3077_s25 = smov 0   ;;  %s3079_s26 = smov 0   ;;  %s3520_s0 = inlined_call_operand.vmem [shape: f32[2,24,128], index: 0, kind: input, shape index: {}]   ;;  %s3521_s1 = inlined_call_operand.vmem [shape: bf16[2,128,384], index: 1, kind: input, shape index: {}]   ;;  %s3522_s2 = inlined_call_operand.vmem [shape: f32[2,1,384], index: 2, kind: input, shape index: {}]   ;;  %s3523_s3 = inlined_call_operand.vmem [shape: bf16[2,128,128], index: 3, kind: input, shape index: {}]   ;;  %s3524_s4 = inlined_call_operand.vmem [shape: f32[2,1,128], index: 4, kind: input, shape index: {}]   ;;  %s3525_s5 = inlined_call_operand.vmem [shape: f32[2,1,128], index: 5, kind: input, shape index: {}]   ;;  %s3526_s6 = inlined_call_operand.vmem [shape: f32[2,1,128], index: 6, kind: input, shape index: {}]   ;;  %s3527_s7 = inlined_call_operand.vmem [shape: bf16[2,128,256], index: 7, kind: input, shape index: {}]   ;;  %s3528_s8 = inlined_call_operand.vmem [shape: f32[2,1,256], index: 8, kind: input, shape index: {}]   ;;  %s3529_s9 = inlined_call_operand.vmem [shape: bf16[2,256,128], index: 9, kind: input, shape index: {}]   ;;  %s3530_s10 = inlined_call_operand.vmem [shape: f32[2,1,128], index: 10, kind: input, shape index: {}]   ;;  %s3531_s11 = inlined_call_operand.vmem [shape: f32[2,1,128], index: 11, kind: input, shape index: {}]   ;;  %s3532_s12 = inlined_call_operand.vmem [shape: f32[2,1,128], index: 12, kind: input, shape index: {}]   ;;  %s3533_s13 = inlined_call_operand.vmem [shape: f32[2,24,128], index: 13, kind: output, shape index: {}]  }
   0x1   :  { %3538 = sst [smem:[#allocation9_spill]] %s3520_s0  ;;  %s3081_s27 = smov 0  }
   0x2   :  { %3539 = sst [smem:[#allocation10_spill]] %s3521_s1  ;;  %s3083_s28 = smov 0  }
   0x3   :  { %3540 = sst [smem:[#allocation11_spill]] %s3522_s2  ;;  %s3085_s29 = smov 0  }
   0x4   :  { %3541 = sst [smem:[#allocation12_spill]] %s3523_s3 }
   0x5   :  { %3542 = sst [smem:[#allocation13_spill]] %s3526_s6 }
   0x6   :  { %3543 = sst [smem:[#allocation14_spill]] %s3527_s7 }
   0x7   :  { %3544 = sst [smem:[#allocation15_spill]] %s3528_s8 }
   0x8   :  { %3545 = sst [smem:[#allocation16_spill]] %s3532_s12 }
   0x9   :  { %3546 = sst [smem:[#allocation17_spill]] %s3533_s13 }
   0xa LB: > { %3547 = sst [smem:[#allocation3_spill]] %s2985_s25  ;;  %s32_s30 = sadd.s32 1, %s2993_s27  ;;  %s3001_s29 = sphi %s3085_s29, %s23_s29   ;;  %s2997_s28 = sphi %s3083_s28, %s3572_s28   ;;  %s2993_s27 = sphi %s3081_s27, %s3571_s27   ;;  %s2989_s26 = sphi %s3079_s26, %s3570_s26   ;;  %s2985_s25 = sphi %s3077_s25, %s3569_s25  }
   0xb   : > { %3548 = sst [smem:[#allocation4_spill]] %s2993_s27  ;;  %s35_s14 = sadd.s32 1, %s2997_s28 }
   0xc   : > { %3549 = sst [smem:[#allocation5_spill]] %s2997_s28  ;;  %p33_p0 = scmp.ge.s32.totalorder %s32_s30, 2 }
   0xd   : > { %3550 = sst [smem:[#allocation6_spill]] %s3001_s29  ;;  %p2475_p1 = scmp.ge.s32.totalorder %s3001_s29, 1 }
   0xe   : > { %p505_p2 = scmp.lt.s32.totalorder %s3001_s29, 5  ;;  %s3574_s30 = smov (%p33_p0, %s32_s30), 0 }
   0xf   : > { %3551 = sst [smem:[#allocation7_spill]] %s3574_s30  ;;  %s3576_s14 = smov (!%p33_p0, %s35_s14), %s2997_s28 }
  0x10   : > { %p506_p3 = pnand %p2475_p1, %p505_p2  ;;  %p37_p4 = scmp.ge.s32.totalorder %s3576_s14, 2 }
  0x11   : > { %p595_p5 = scmp.lt.s32.totalorder (!%p506_p3), %s2989_s26, 1  ;;  %p600_p6 = scmp.lt.s32.totalorder (!%p506_p3), %s2985_s25, 1 }
  0x12   : > { %s3578_s14 = smov (%p37_p4, %s3576_s14), 0  ;;  %509 = sbr.rel (%p506_p3) target bundleno = 3617 (0xe21), region = 72 }
  0x13   : > { %3552 = sst [smem:[#allocation8_spill]] %s3578_s14  ;;  %s3553_s0 = sld [smem:[#allocation9_spill]] (!%p506_p3) }
  0x14   : > { %s3554_s1 = sld [smem:[#allocation10_spill]] (!%p506_p3)  ;;  %s3555_s3 = sld [smem:[#allocation12_spill]] (!%p506_p3) }
  0x15   : > { %s3556_s2 = sld [smem:[#allocation11_spill]] (!%p506_p3)  ;;  %s3558_s7 = sld [smem:[#allocation14_spill]] (!%p506_p3) }
  0x16   : > { %s3559_s8 = sld [smem:[#allocation15_spill]] (!%p506_p3)  ;;  %s3562_s20 = sld [smem:[#allocation3_spill]] (!%p506_p3) }
  0x19   : > { %s3580_s26 = smov (!%p595_p5, %s2989_s26), 1 }
  0x1a   : > { %s3111_s15 = scalar_select %p600_p6, %s2985_s25, 1 }
  0x1b   : > { %s2774_s16 = smul.u32 24, %s3580_s26  ;;  %s3561_s26 = sld [smem:[#allocation17_spill]] }
  0x1c   : > { %s2775_s17 = smul.u32 192, %s3111_s15  ;;  %s2575_s18 = sshll.u32 %s3111_s15, 6 }
  0x1d   : > { %s599_s21 = scalar_lea.vmem %s3553_s0, %s2774_s16  ;;  %s2776_s22 = smul.u32 3, %s3111_s15 }
  0x1e   : > { %s3122_s14 = scalar_lea.vmem %s3554_s1, %s2775_s17  ;;  %s3127_s27 = scalar_lea.vmem %s3555_s3, %s2575_s18 }
  0x1f   : > { %s3132_s25 = scalar_lea.vmem %s3556_s2, %s2776_s22  ;;  %s2576_s28 = sshll.u32 %s3111_s15, 7 }
  0x20   : > { %s2482_s30 = sshll.u32 %s3111_s15, 1  ;;  %s3151_s29 = scalar_lea.vmem %s3558_s7, %s2576_s28 }
  0x21   : > { %s3156_s13 = scalar_lea.vmem %s3559_s8, %s2482_s30  ;;  %s3161_s0 = scalar_lea.vmem %s3529_s9, %s2576_s28 }
  0x22   : > { %s639_s24 = scalar_lea.vmem %s3530_s10, %s3111_s15  ;;  %s642_s3 = scalar_lea.vmem %s3531_s11, %s3111_s15 }
  0x23   : > { %s3560_s7 = sld [smem:[#allocation16_spill]]  ;;  %s3178_s8 = scalar_lea.vmem %s3561_s26, %s2774_s16 }
  0x24   : > { %p2486_p7 = scmp.ne.s32.totalorder %s3562_s20, 0 }
  0x25   : > { %v656_v0 = vld [vmem:[%s599_s21] sm:$0xff] (!%p2486_p7)  ;;  %v657_v1 = vld [vmem:[%s599_s21 + $0x8] sm:$0xff] (!%p2486_p7)  ;;  %v658_v2 = vld [vmem:[%s599_s21 + $0x10] sm:$0xff] (!%p2486_p7) }
  0x26   : > { %655 = sbr.rel (%p2486_p7) target bundleno = 45 (0x2d), region = 76  ;;  %659 = vst [vmem:[%s3178_s8] sm:$0xff] (!%p2486_p7), %v656_v0  ;;  %660 = vst [vmem:[%s3178_s8 + $0x8] sm:$0xff] (!%p2486_p7), %v657_v1 }
  0x27   : > { %661 = vst [vmem:[%s3178_s8 + $0x10] sm:$0xff] (!%p2486_p7), %v658_v2 }
  0x29   : > { %s645_s6 = scalar_lea.vmem %s3560_s7, %s3111_s15 }
  0x2d PF: > { %v2821_v3 = vld [vmem:[%s3122_s14 + $0x4] ss:$12 sps:$4 sm:$0xff]   ;;  %v2823_v4 = vld [vmem:[%s3122_s14] ss:$12 sps:$4 sm:$0xff]   ;;  %v3003_v5 = vmov 0   ;;  %v701_v25 = vlaneseq  ;;  %vm952_vm0 = vcmask 261120   ;;  %s3564_s23 = scalar_lea.vmem %s3525_s5, %s3111_s15 }
  0x2e   : > { %876 = vmatprep.mubr.bf16.mxu0 %v3003_v5  ;;  %844 = vmatprep.subr.bf16.mxu0 %v2821_v3  ;;  %v2824_v6 = vld [vmem:[%s3122_s14 + $0x1c] ss:$12 sps:$4 sm:$0xff]   ;;  %v2826_v7 = vld [vmem:[%s3122_s14 + $0x18] ss:$12 sps:$4 sm:$0xff]   ;;  %v2827_v8 = vld [vmem:[%s3122_s14 + $0x34] ss:$12 sps:$4 sm:$0xff]  }
  0x2f   : > { %845 = vmatpush1.bf16.msra.mxu0 %v2823_v4  ;;  %v2829_v9 = vld [vmem:[%s3122_s14 + $0x30] ss:$12 sps:$4 sm:$0xff]   ;;  %v2830_v10 = vld [vmem:[%s3122_s14 + $0x4c] ss:$12 sps:$4 sm:$0xff]   ;;  %v662_v11 = vld [vmem:[%s3178_s8] sm:$0xff]  ;;  %v3209_v26 = vshrl.u32 %v701_v25, 7 }
  0x30   : > { %846 = vmatprep.subr.bf16.mxu0 %v2824_v6  ;;  %v2832_v12 = vld [vmem:[%s3122_s14 + $0x48] ss:$12 sps:$4 sm:$0xff]   ;;  %v2833_v13 = vld [vmem:[%s3122_s14 + $0x64] ss:$12 sps:$4 sm:$0xff]   ;;  %v2835_v16 = vld [vmem:[%s3122_s14 + $0x60] ss:$12 sps:$4 sm:$0xff]  }
  0x31   : > { %v663_v14 = vld [vmem:[%s3178_s8 + $0x8] sm:$0xff]  ;;  %v2838_v18 = vld [vmem:[%s3122_s14 + $0x78] ss:$12 sps:$4 sm:$0xff]   ;;  %v2839_v19 = vld [vmem:[%s3122_s14 + $0x94] ss:$12 sps:$4 sm:$0xff]   ;;  %v703_v27 = vsub.s32 0, %v3209_v26 }
  0x32   : > { %v665_v15 = vpack.c.bf16 %v663_v14, %v662_v11  ;;  %v2836_v17 = vld [vmem:[%s3122_s14 + $0x7c] ss:$12 sps:$4 sm:$0xff]   ;;  %v2842_v21 = vld [vmem:[%s3122_s14 + $0xac] ss:$12 sps:$4 sm:$0xff]   ;;  %v3204_v23 = vld [vmem:[%s3178_s8 + $0x10] sm:$0xff]  ;;  %v707_v29 = vsub.s32 1, %v3209_v26 }
  0x33   : > { %847 = vmatpush1.bf16.msra.mxu0 %v2826_v7  ;;  %v2841_v20 = vld [vmem:[%s3122_s14 + $0x90] ss:$12 sps:$4 sm:$0xff]   ;;  %v2844_v22 = vld [vmem:[%s3122_s14 + $0xa8] ss:$12 sps:$4 sm:$0xff]   ;;  %v666_v24 = vpack.c.bf16 %v3204_v23, %v3204_v23  ;;  %v3213_v28 = vld [vmem:[%s3132_s25] sm:$0x7] }
  0x34   : > { %848 = vmatprep.subr.bf16.mxu0 %v2827_v8  ;;  %2674 = vmatprep.mubr.bf16.mxu1 %v665_v15  ;;  %v704_v30 = vrot.slane %v3213_v28, %v703_v27  ;;  %v708_v32 = vrot.slane %v3213_v28, %v707_v29  ;;  %v2845_v52 = vld [vmem:[%s3122_s14 + $0x8] ss:$12 sps:$4 sm:$0xff]   ;;  %v2846_v53 = vld [vmem:[%s3122_s14 + $0x20] ss:$12 sps:$4 sm:$0xff]   ;;  %v2847_v54 = vld [vmem:[%s3122_s14 + $0x38] ss:$12 sps:$4 sm:$0xff]  }
  0x35   : > { %2658 = vmatprep.subr.bf16.mxu1 %v2845_v52  ;;  %v2848_v55 = vld [vmem:[%s3122_s14 + $0x50] ss:$12 sps:$4 sm:$0xff]   ;;  %v2849_v56 = vld [vmem:[%s3122_s14 + $0x68] ss:$12 sps:$4 sm:$0xff]   ;;  %v2850_v57 = vld [vmem:[%s3122_s14 + $0x80] ss:$12 sps:$4 sm:$0xff]  }
  0x36   : > { %2659 = vmatpush3.bf16.msra.mxu1 %v2845_v52  ;;  %v2851_v58 = vld [vmem:[%s3122_s14 + $0x98] ss:$12 sps:$4 sm:$0xff]   ;;  %v2852_v59 = vld [vmem:[%s3122_s14 + $0xb0] ss:$12 sps:$4 sm:$0xff]   ;;  %v3250_v60 = vand.u32 127, %v701_v25  ;;  %vm1021_vm2 = vcmask 195584   ;;  %s3563_s14 = scalar_lea.vmem %s3524_s4, %s3111_s15 }
  0x37   : > { %849 = vmatpush1.bf16.msra.mxu0 %v2829_v9  ;;  %2660 = vmatprep.subr.bf16.mxu1 %v2846_v53  ;;  %v711_v11 = vsub.s32 2, %v3209_v26  ;;  %vm1063_vm3 = vcmask 1043456   ;;  %s3004_s1 = smov 96   ;;  %s3005_s2 = smov 64   ;;  %vm1307_vm4 = vcmask 523520   ;;  %vm1494_vm5 = vcmask 785920  }
  0x38   : > { %850 = vmatprep.subr.bf16.mxu0 %v2830_v10  ;;  %vm945_vm1 = vcmp.lt.s32.totalorder %v3250_v60, 17  ;;  %s3006_s7 = smov 32   ;;  %vm1681_vm6 = vcmask 1048320   ;;  %s3565_s19 = sld [smem:[#allocation13_spill]] }
  0x3a   : > { %2661 = vmatpush3.bf16.msra.mxu1 %v2846_v53 }
  0x3b   : > { %851 = vmatpush1.bf16.msra.mxu0 %v2832_v12  ;;  %2662 = vmatprep.subr.bf16.mxu1 %v2847_v54  ;;  %v712_v12 = vrot.slane %v3213_v28, %v711_v11 }
  0x3c   : > { %852 = vmatprep.subr.bf16.mxu0 %v2833_v13 }
  0x3e   : > { %2663 = vmatpush3.bf16.msra.mxu1 %v2847_v54  ;;  %s3566_s12 = scalar_lea.vmem %s3565_s19, %s3111_s15 }
  0x3f   : > { %853 = vmatpush1.bf16.msra.mxu0 %v2835_v16  ;;  %2664 = vmatprep.subr.bf16.mxu1 %v2848_v55 }
  0x40   : > { %854 = vmatprep.subr.bf16.mxu0 %v2836_v17 }
  0x42   : > { %2665 = vmatpush3.bf16.msra.mxu1 %v2848_v55 }
  0x43   : > { %855 = vmatpush1.bf16.msra.mxu0 %v2838_v18  ;;  %2666 = vmatprep.subr.bf16.mxu1 %v2849_v56 }
  0x44   : > { %856 = vmatprep.subr.bf16.mxu0 %v2839_v19 }
  0x46   : > { %2667 = vmatpush3.bf16.msra.mxu1 %v2849_v56 }
  0x47   : > { %857 = vmatpush1.bf16.msra.mxu0 %v2841_v20  ;;  %2668 = vmatprep.subr.bf16.mxu1 %v2850_v57 }
  0x48   : > { %858 = vmatprep.subr.bf16.mxu0 %v2842_v21 }
  0x4a   : > { %2669 = vmatpush3.bf16.msra.mxu1 %v2850_v57 }
  0x4b   : > { %859 = vmatpush1.bf16.msra.mxu0 %v2844_v22  ;;  %2670 = vmatprep.subr.bf16.mxu1 %v2851_v58 }
  0x4e   : > { %877 = vmatmul.mubr.bf16.vlgmr.msra.gmra.mrb[0].mxu0 %v665_v15  ;;  %2671 = vmatpush3.bf16.msra.mxu1 %v2851_v58 }
  0x4f   : > { %886 = vmatprep.mubr.bf16.mxu0 %v3003_v5  ;;  %2672 = vmatprep.subr.bf16.mxu1 %v2852_v59 }
  0x52   : > { %2673 = vmatpush3.bf16.msra.mxu1 %v2852_v59 }
  0x55   : > { %2675 = vmatmul.mubr.bf16.vlgmr.msra.gmra.mrb[0].mxu1 %v666_v24 }
  0x56   : > { %887 = vmatmul.mubr.bf16.gmra.mrb[4].mxu0 %v666_v24 }
 0x121   : > { %v878_v31 = vpop.f32.mrb[0].mxu0 }
 0x122   : > { %v880_v33 = vpop.f32.mrb[1].mxu0  ;;  %v879_v35 = vadd.f32 %v878_v31, %v704_v30 }
 0x123   : > { %v882_v34 = vpop.f32.mrb[2].mxu0  ;;  %v881_v38 = vadd.f32 %v880_v33, %v708_v32 }
 0x124   : > { %v883_v36 = vadd.f32 %v882_v34, %v704_v30  ;;  %v884_v37 = vpop.f32.mrb[3].mxu0 }
 0x125   : > { %v885_v39 = vadd.f32 %v884_v37, %v708_v32 }
 0x126   : > { %v3222_v40 = vpack.c.bf16 %v883_v36, %v879_v35 }
 0x127   : > { %v3224_v41 = vpack.c.bf16 %v885_v39, %v881_v38 }
 0x128   : > { %2682 = vmatprep.mubr.msk.bf16.mxu0 %vm952_vm0, %v3222_v40  ;;  %v2676_v13 = vpop.f32.mrb[0].mxu1 }
 0x129   : > { %v888_v42 = vpop.f32.mrb[4].mxu0  ;;  %2762 = vmatprep.subr.msk.bf16.mxu0 %vm952_vm0, %v3224_v41  ;;  %v960_v43 = vsel %vm952_vm0, %v3224_v41, 0  ;;  %v929_v14 = vpop.f32.mrb[1].mxu1  ;;  %v938_v39 = vadd.f32 %v2676_v13, %v712_v12 }
 0x12a   : > { %v890_v44 = vpop.f32.mrb[5].mxu0  ;;  %2679 = vmatpush3.bf16.xpose.msra.mxu0 %v960_v43  ;;  %v889_v50 = vadd.f32 %v888_v42, %v704_v30  ;;  %v930_v15 = vadd.f32 %v929_v14, %v712_v12  ;;  %v2677_v16 = vpop.f32.mrb[2].mxu1 }
 0x12b   : > { %v891_v45 = vadd.f32 %v890_v44, %v708_v32  ;;  %v892_v46 = vpop.f32.mrb[6].mxu0  ;;  %v932_v17 = vpop.f32.mrb[3].mxu1  ;;  %v3271_v42 = vpack.c.bf16 %v938_v39, %v938_v39 }
 0x12c   : > { %v893_v47 = vpop.f32.mrb[7].mxu0  ;;  %v3238_v51 = vpack.c.bf16 %v889_v50, %v889_v50  ;;  %v933_v18 = vadd.f32 %v932_v17, %v712_v12 }
 0x12d   : > { %v3232_v48 = vpack.c.bf16 %v891_v45, %v891_v45  ;;  %v1065_v43 = vsel %vm1063_vm3, %v3271_v42, 0 }
 0x12e   : > { %v3264_v19 = vpack.c.bf16 %v933_v18, %v930_v15 }
 0x12f   : > { %2763 = vmatprep.subr.msk.bf16.mxu0 %vm952_vm0, %v3232_v48  ;;  %v963_v49 = vsel %vm952_vm0, %v3232_v48, 0 }
 0x130   : > { %2686 = vmatprep.subr.bf16.mxu1 %v3264_v19 }
 0x131   : > { %2687 = vmatpush3.bf16.msra.mxu1 %v3264_v19 }
 0x132   : > { %2681 = vmatpush3.bf16.xpose.msra.mxu0 %v963_v49  ;;  %2764 = vmatprep.subr.msk.bf16.mxu1 %vm1063_vm3, %v3271_v42 }
 0x135   : > { %2689 = vmatpush3.bf16.msra.mxu1 %v1065_v43 }
 0x139   : > { %2683 = vmatmul.mubr.msk.bf16.vlgmr.msra.gmra.mrb[8].mxu0 %vm952_vm0, %v3238_v51 }
 0x20c   : > { %v2684_v61 = vpop.f32.mrb[8].mxu0 }
 0x20d   : > { %v1015_v62 = vmul.f32 0.17677669, %v2684_v61  ;;  %v999_v63 = vpop.f32.mrb[9].mxu0 }
 0x20e   : > { %v1013_v0 = vmul.f32 0.17677669, %v999_v63  ;;  %v2685_v1 = vpop.f32.mrb[10].mxu0 }
 0x20f   : > { %v1002_v2 = vpop.f32.mrb[11].mxu0  ;;  %v1020_v3 = vsel %vm945_vm1, %v1015_v62, -1e+30 }
 0x210   : > { %v1014_v4 = vmul.f32 0.17677669, %v1002_v2  ;;  %v1028_v6 = vsel %vm1021_vm2, %v1020_v3, -inf  ;;  %v1018_v7 = vsel %vm945_vm1, %v1013_v0, -1e+30 }
 0x211   : > { %1029 = vmax.xlane.f32.xlu1 %v1028_v6  ;;  %v1022_v8 = vsel %vm1021_vm2, %v1018_v7, -inf }
 0x212   : > { %1023 = vmax.xlane.f32.xlu0 %v1022_v8  ;;  %v1019_v9 = vsel %vm945_vm1, %v1014_v4, -1e+30 }
 0x213   : > { %v1025_v10 = vsel %vm1021_vm2, %v1019_v9, -inf }
 0x216   : > { %1026 = vmax.xlane.f32.xlu0 %v1025_v10 }
 0x29e   : > { %v1030_v20 = vpop.xlane.xlu1 %1029 }
 0x29f   : > { %v1033_v21 = vsub.f32 %v1020_v3, %v1030_v20  ;;  %v1024_v22 = vpop.xlane.xlu0 %1023 }
 0x2a0   : > { %v1031_v24 = vsub.f32 %v1018_v7, %v1024_v22 }
 0x2a1   : > { %v1038_v25 = vmul.f32 1.442695, %v1033_v21 }
 0x2a2   : > { %v1034_v30 = vmul.f32 1.442695, %v1031_v24 }
 0x2a3   : > { %v1027_v31 = vpop.xlane.xlu0 %1026 }
 0x2a4   : > { %2901 = vpow2.f32 %v1034_v30  ;;  %v1032_v28 = vsub.f32 %v1019_v9, %v1027_v31 }
 0x2a5   : > { %2903 = vpow2.f32 %v1038_v25 }
 0x2a6   : > { %v1036_v32 = vmul.f32 1.442695, %v1032_v28 }
 0x2a8   : > { %2905 = vpow2.f32 %v1036_v32 }
 0x2ae   : > { %v2902_v33 = vpop.eup %2901 }
 0x2af   : > { %v1040_v34 = vsel %vm1021_vm2, %v2902_v33, 0.0  ;;  %v2904_v35 = vpop.eup %2903 }
 0x2b0   : > { %1041 = vadd.xlane.f32.xlu1 %v1040_v34  ;;  %v1046_v37 = vsel %vm1021_vm2, %v2904_v35, 0.0 }
 0x2b2   : > { %v2906_v36 = vpop.eup %2905 }
 0x2b3   : > { %v1043_v38 = vsel %vm1021_vm2, %v2906_v36, 0.0 }
 0x2b4   : > { %1047 = vadd.xlane.f32.xlu1 %v1046_v37  ;;  %1044 = vadd.xlane.f32.xlu0 %v1043_v38 }
 0x2c5   : > { %1128 = vrot.lane.b32.xlu1 %v3232_v48, %s3004_s1 }
 0x2c9   : > { %1120 = vrot.lane.b32.xlu1 %v3222_v40, %s3004_s1 }
 0x2ca   : > { %1126 = vrot.lane.b32.xlu0 %v3224_v41, %s3004_s1 }
 0x2cd   : > { %1315 = vrot.lane.b32.xlu1 %v3224_v41, %s3005_s2 }
 0x2ce   : > { %1122 = vrot.lane.b32.xlu0 %v3238_v51, %s3004_s1 }
 0x2d1   : > { %1317 = vrot.lane.b32.xlu1 %v3232_v48, %s3005_s2 }
 0x2d2   : > { %1311 = vrot.lane.b32.xlu0 %v3222_v40, %s3005_s2 }
 0x2d5   : > { %1313 = vrot.lane.b32.xlu1 %v3238_v51, %s3005_s2 }
 0x33d   : > { %v1042_v44 = vpop.xlane.xlu1 %1041 }
 0x33e   : > { %2907 = vrcp.f32 %v1042_v44 }
 0x341   : > { %v1048_v45 = vpop.xlane.xlu1 %1047  ;;  %v1045_v46 = vpop.xlane.xlu0 %1044 }
 0x342   : > { %2909 = vrcp.f32 %v1048_v45 }
 0x343   : > { %2911 = vrcp.f32 %v1045_v46 }
 0x345   : > { %v1127_v47 = vpop.permute.xlu0 %1126  ;;  %v1129_v54 = vpop.permute.xlu1 %1128 }
 0x346   : > { %2765 = vmatprep.subr.msk.bf16.mxu1 %vm952_vm0, %v1127_v47  ;;  %v1137_v59 = vsel %vm952_vm0, %v1127_v47, 0  ;;  %v1140_v62 = vsel %vm952_vm0, %v1129_v54, 0 }
 0x348   : > { %v2908_v49 = vpop.eup %2907 }
 0x349   : > { %v1052_v55 = vmul.f32 %v2908_v49, %v2902_v33  ;;  %v1121_v61 = vpop.permute.xlu1 %1120  ;;  %v1123_v0 = vpop.permute.xlu0 %1122 }
 0x34c   : > { %v2910_v50 = vpop.eup %2909 }
 0x34d   : > { %v2912_v52 = vpop.eup %2911  ;;  %v1054_v53 = vmul.f32 %v2910_v50, %v2904_v35  ;;  %v1316_v63 = vpop.permute.xlu1 %1315 }
 0x34e   : > { %v1053_v56 = vmul.f32 %v2912_v52, %v2906_v36  ;;  %v1326_v1 = vsel %vm952_vm0, %v1316_v63, 0  ;;  %v1312_v2 = vpop.permute.xlu0 %1311 }
 0x34f   : > { %v1056_v57 = vpack.c.bf16 %v1054_v53, %v1054_v53 }
 0x350   : > { %v1055_v58 = vpack.c.bf16 %v1053_v56, %v1052_v55 }
 0x351   : > { %v1318_v3 = vpop.permute.xlu1 %1317 }
 0x352   : > { %2690 = vmatprep.mubr.msk.bf16.mxu1 %vm1021_vm2, %v1055_v58  ;;  %v1329_v4 = vsel %vm952_vm0, %v1318_v3, 0 }
 0x353   : > { %2691 = vmatmul.mubr.msk.bf16.vlgmr.msra.gmra.mrb[4].mxu1 %vm1021_vm2, %v1056_v57 }
 0x354   : > { %2695 = vmatpush3.bf16.xpose.msra.mxu1 %v1137_v59  ;;  %2698 = vmatprep.mubr.msk.bf16.mxu1 %vm952_vm0, %v1121_v61 }
 0x355   : > { %2766 = vmatprep.subr.msk.bf16.mxu1 %vm952_vm0, %v1129_v54  ;;  %v1314_v6 = vpop.permute.xlu1 %1313 }
 0x35c   : > { %2697 = vmatpush3.bf16.xpose.msra.mxu1 %v1140_v62 }
 0x35d   : > { %2768 = vmatprep.subr.msk.bf16.mxu1 %vm952_vm0, %v1316_v63 }
 0x363   : > { %2699 = vmatmul.mubr.msk.bf16.vlgmr.msra.gmra.mrb[8].mxu1 %vm952_vm0, %v1123_v0 }
 0x364   : > { %2711 = vmatpush3.bf16.xpose.msra.mxu1 %v1326_v1  ;;  %2714 = vmatprep.mubr.msk.bf16.mxu1 %vm952_vm0, %v1312_v2 }
 0x365   : > { %2769 = vmatprep.subr.msk.bf16.mxu1 %vm952_vm0, %v1318_v3 }
 0x36c   : > { %2713 = vmatpush3.bf16.xpose.msra.mxu1 %v1329_v4 }
 0x373   : > { %2715 = vmatmul.mubr.msk.bf16.vlgmr.msra.gmra.mrb[12].mxu1 %vm952_vm0, %v1314_v6 }
 0x426   : > { %v2692_v7 = vpop.f32.mrb[4].mxu1 }
 0x427   : > { %1117 = vst.msk [vmem:[#allocation2 + $0x10] sm:$0xff] %vm952_vm0, %v2692_v7  ;;  %v1101_v8 = vpop.f32.mrb[5].mxu1 }
 0x428   : > { %1115 = vst.msk [vmem:[#allocation2] sm:$0xff] %vm952_vm0, %v1101_v8  ;;  %v2693_v9 = vpop.f32.mrb[6].mxu1 }
 0x429   : > { %v1104_v10 = vpop.f32.mrb[7].mxu1 }
 0x42a   : > { %1116 = vst.msk [vmem:[#allocation2 + $0x8] sm:$0xff] %vm952_vm0, %v1104_v10 }
 0x436   : > { %v2700_v11 = vpop.f32.mrb[8].mxu1 }
 0x437   : > { %v1176_v12 = vpop.f32.mrb[9].mxu1  ;;  %v1192_v54 = vmul.f32 0.17677669, %v2700_v11 }
 0x438   : > { %v2701_v13 = vpop.f32.mrb[10].mxu1  ;;  %v1190_v53 = vmul.f32 0.17677669, %v1176_v12 }
 0x439   : > { %v1179_v14 = vpop.f32.mrb[11].mxu1  ;;  %v1195_v57 = vsel %vm945_vm1, %v1192_v54, -1e+30 }
 0x43a   : > { %v1193_v55 = vsel %vm945_vm1, %v1190_v53, -1e+30 }
 0x43b   : > { %v1196_v56 = vsel %vm1021_vm2, %v1193_v55, -inf }
 0x446   : > { %v2716_v15 = vpop.f32.mrb[12].mxu1 }
 0x447   : > { %v1365_v16 = vpop.f32.mrb[13].mxu1  ;;  %v1381_v17 = vmul.f32 0.17677669, %v2716_v15 }
 0x448   : > { %v1379_v18 = vmul.f32 0.17677669, %v1365_v16  ;;  %v2717_v20 = vpop.f32.mrb[14].mxu1 }
 0x449   : > { %v1368_v21 = vpop.f32.mrb[15].mxu1  ;;  %v1384_v31 = vsel %vm945_vm1, %v1381_v17, -1e+30 }
 0x44a   : > { %v1380_v22 = vmul.f32 0.17677669, %v1368_v21  ;;  %v1382_v24 = vsel %vm945_vm1, %v1379_v18, -1e+30  ;;  %v1391_v32 = vsel %vm1021_vm2, %v1384_v31, -inf }
 0x44b   : > { %v1385_v25 = vsel %vm1021_vm2, %v1382_v24, -inf }
 0x44c   : > { %1386 = vmax.xlane.f32.xlu0 %v1385_v25  ;;  %v1383_v30 = vsel %vm945_vm1, %v1380_v22, -1e+30 }
 0x44d   : > { %v1388_v28 = vsel %vm1021_vm2, %v1383_v30, -inf }
 0x44e   : > { %1389 = vmax.xlane.f32.xlu1 %v1388_v28 }
 0x450   : > { %1392 = vmax.xlane.f32.xlu0 %v1391_v32 }
 0x4d9   : > { %v1387_v33 = vpop.xlane.xlu0 %1386 }
 0x4da   : > { %v1394_v34 = vsub.f32 %v1382_v24, %v1387_v33 }
 0x4db   : > { %v1390_v35 = vpop.xlane.xlu1 %1389 }
 0x4dc   : > { %v1397_v36 = vmul.f32 1.442695, %v1394_v34  ;;  %v1395_v37 = vsub.f32 %v1383_v30, %v1390_v35 }
 0x4dd   : > { %v1393_v38 = vpop.xlane.xlu0 %1392 }
 0x4de   : > { %2913 = vpow2.f32 %v1397_v36  ;;  %v1399_v39 = vmul.f32 1.442695, %v1395_v37  ;;  %v1396_v43 = vsub.f32 %v1384_v31, %v1393_v38 }
 0x4e0   : > { %2915 = vpow2.f32 %v1399_v39  ;;  %v1401_v44 = vmul.f32 1.442695, %v1396_v43 }
 0x4e2   : > { %2917 = vpow2.f32 %v1401_v44 }
 0x4e8   : > { %v2914_v45 = vpop.eup %2913 }
 0x4e9   : > { %v1403_v46 = vsel %vm1021_vm2, %v2914_v45, 0.0 }
 0x4ea   : > { %v2916_v47 = vpop.eup %2915  ;;  %1404 = vadd.xlane.f32.xlu0 %v1403_v46 }
 0x4eb   : > { %v1406_v52 = vsel %vm1021_vm2, %v2916_v47, 0.0 }
 0x4ec   : > { %v2918_v49 = vpop.eup %2917 }
 0x4ed   : > { %v1409_v50 = vsel %vm1021_vm2, %v2918_v49, 0.0 }
 0x4ee   : > { %1410 = vadd.xlane.f32.xlu1 %v1409_v50  ;;  %1407 = vadd.xlane.f32.xlu0 %v1406_v52 }
 0x4ff   : > { %1422 = vrot.lane.b32.xlu1 %v3271_v42, %s3005_s2 }
 0x503   : > { %1502 = vrot.lane.b32.xlu1 %v3224_v41, %s3006_s7  ;;  %v1191_v41 = vmul.f32 0.17677669, %v1179_v14 }
 0x504   : > { %1420 = vrot.lane.b32.xlu0 %v3264_v19, %s3005_s2 }
 0x507   : > { %1504 = vrot.lane.b32.xlu1 %v3232_v48, %s3006_s7  ;;  %v1202_v48 = vsel %vm1021_vm2, %v1195_v57, -inf }
 0x508   : > { %1498 = vrot.lane.b32.xlu0 %v3222_v40, %s3006_s7  ;;  %v1194_v40 = vsel %vm945_vm1, %v1191_v41, -1e+30 }
 0x50b   : > { %1500 = vrot.lane.b32.xlu1 %v3238_v51, %s3006_s7  ;;  %v1199_v51 = vsel %vm1021_vm2, %v1194_v40, -inf }
 0x527   : > { %1197 = vmax.xlane.f32.xlu0 %v1196_v56 }
 0x52b   : > { %1203 = vmax.xlane.f32.xlu0 %v1202_v48 }
 0x52f   : > { %1200 = vmax.xlane.f32.xlu1 %v1199_v51 }
 0x577   : > { %v1405_v58 = vpop.xlane.xlu0 %1404 }
 0x578   : > { %2919 = vrcp.f32 %v1405_v58 }
 0x57b   : > { %v1408_v59 = vpop.xlane.xlu0 %1407  ;;  %v1411_v61 = vpop.xlane.xlu1 %1410 }
 0x57c   : > { %2921 = vrcp.f32 %v1408_v59 }
 0x57d   : > { %2923 = vrcp.f32 %v1411_v61 }
 0x57f   : > { %v1421_v62 = vpop.permute.xlu0 %1420  ;;  %v1423_v63 = vpop.permute.xlu1 %1422 }
 0x580   : > { %2718 = vmatprep.subr.bf16.mxu1 %v1421_v62  ;;  %v1432_v1 = vsel %vm1063_vm3, %v1423_v63, 0 }
 0x581   : > { %2719 = vmatpush3.bf16.msra.mxu1 %v1421_v62 }
 0x582   : > { %2770 = vmatprep.subr.msk.bf16.mxu1 %vm1063_vm3, %v1423_v63  ;;  %v2920_v0 = vpop.eup %2919 }
 0x583   : > { %v1503_v2 = vpop.permute.xlu1 %1502  ;;  %v1415_v6 = vmul.f32 %v2920_v0, %v2914_v45  ;;  %v1499_v11 = vpop.permute.xlu0 %1498 }
 0x584   : > { %v1513_v12 = vsel %vm952_vm0, %v1503_v2, 0 }
 0x585   : > { %2721 = vmatpush3.bf16.msra.mxu1 %v1432_v1 }
 0x586   : > { %v2922_v3 = vpop.eup %2921  ;;  %2771 = vmatprep.subr.msk.bf16.mxu1 %vm952_vm0, %v1503_v2 }
 0x587   : > { %v2924_v4 = vpop.eup %2923  ;;  %v1416_v7 = vmul.f32 %v2922_v3, %v2916_v47  ;;  %v1505_v13 = vpop.permute.xlu1 %1504 }
 0x588   : > { %v1417_v8 = vmul.f32 %v2924_v4, %v2918_v49  ;;  %v1516_v14 = vsel %vm952_vm0, %v1505_v13, 0 }
 0x589   : > { %v1418_v9 = vpack.c.bf16 %v1416_v7, %v1415_v6 }
 0x58a   : > { %v1419_v10 = vpack.c.bf16 %v1417_v8, %v1417_v8 }
 0x58b   : > { %2722 = vmatprep.mubr.msk.bf16.mxu1 %vm1021_vm2, %v1418_v9  ;;  %v1501_v15 = vpop.permute.xlu1 %1500 }
 0x58c   : > { %2723 = vmatmul.mubr.msk.bf16.vlgmr.msra.gmra.mrb[16].mxu1 %vm1021_vm2, %v1419_v10 }
 0x58d   : > { %2730 = vmatprep.mubr.msk.bf16.mxu1 %vm952_vm0, %v1499_v11 }
 0x58e   : > { %2727 = vmatpush3.bf16.xpose.msra.mxu1 %v1513_v12 }
 0x58f   : > { %2772 = vmatprep.subr.msk.bf16.mxu1 %vm952_vm0, %v1505_v13 }
 0x596   : > { %2729 = vmatpush3.bf16.xpose.msra.mxu1 %v1516_v14 }
 0x59d   : > { %2731 = vmatmul.mubr.msk.bf16.vlgmr.msra.gmra.mrb[20].mxu1 %vm952_vm0, %v1501_v15 }
 0x59e   : > { %2008 = vmatprep.mubr.bf16.mxu1 %v3003_v5 }
 0x5b4   : > { %v1198_v22 = vpop.xlane.xlu0 %1197 }
 0x5b5   : > { %v1205_v30 = vsub.f32 %v1193_v55, %v1198_v22 }
 0x5b7   : > { %v1208_v28 = vmul.f32 1.442695, %v1205_v30 }
 0x5b8   : > { %v1204_v31 = vpop.xlane.xlu0 %1203 }
 0x5b9   : > { %v1207_v32 = vsub.f32 %v1195_v57, %v1204_v31 }
 0x5bb   : > { %v1212_v33 = vmul.f32 1.442695, %v1207_v32 }
 0x5bc   : > { %v1201_v17 = vpop.xlane.xlu1 %1200 }
 0x5bd   : > { %v1206_v24 = vsub.f32 %v1194_v40, %v1201_v17 }
 0x5bf   : > { %v1210_v25 = vmul.f32 1.442695, %v1206_v24 }
 0x5c1   : > { %2925 = vpow2.f32 %v1210_v25 }
 0x5c2   : > { %2927 = vpow2.f32 %v1208_v28 }
 0x5c3   : > { %2929 = vpow2.f32 %v1212_v33 }
 0x5cb   : > { %v2926_v47 = vpop.eup %2925 }
 0x5cc   : > { %v1217_v52 = vsel %vm1021_vm2, %v2926_v47, 0.0  ;;  %v2928_v54 = vpop.eup %2927 }
 0x5cd   : > { %v1214_v55 = vsel %vm1021_vm2, %v2928_v54, 0.0  ;;  %v2930_v56 = vpop.eup %2929 }
 0x5ce   : > { %v1220_v41 = vsel %vm1021_vm2, %v2930_v56, 0.0 }
 0x65f   : > { %v3354_v16 = vpop.f32.mrb[16].mxu1 }
 0x660   : > { %v3356_v18 = vpop.f32.mrb[17].mxu1 }
 0x661   : > { %v2725_v20 = vpop.f32.mrb[18].mxu1 }
 0x662   : > { %v3358_v21 = vpop.f32.mrb[19].mxu1 }
 0x670   : > { %v2732_v34 = vpop.f32.mrb[20].mxu1 }
 0x671   : > { %v1568_v35 = vmul.f32 0.17677669, %v2732_v34  ;;  %v1552_v36 = vpop.f32.mrb[21].mxu1 }
 0x672   : > { %v1566_v37 = vmul.f32 0.17677669, %v1552_v36  ;;  %v2733_v38 = vpop.f32.mrb[22].mxu1 }
 0x673   : > { %v1555_v39 = vpop.f32.mrb[23].mxu1  ;;  %v1571_v43 = vsel %vm945_vm1, %v1568_v35, -1e+30 }
 0x674   : > { %v1567_v44 = vmul.f32 0.17677669, %v1555_v39  ;;  %v1578_v45 = vsel %vm1021_vm2, %v1571_v43, -inf  ;;  %v1569_v46 = vsel %vm945_vm1, %v1566_v37, -1e+30 }
 0x675   : > { %1579 = vmax.xlane.f32.xlu1 %v1578_v45  ;;  %v1572_v49 = vsel %vm1021_vm2, %v1569_v46, -inf  ;;  %v2855_v45 = vld [vmem:[%s3127_s27 + $0x10] sm:$0xff]  }
 0x676   : > { %1573 = vmax.xlane.f32.xlu0 %v1572_v49  ;;  %v1570_v50 = vsel %vm945_vm1, %v1567_v44, -1e+30  ;;  %v2854_v44 = vld [vmem:[%s3127_s27 + $0x8] sm:$0xff]  }
 0x677   : > { %v1575_v53 = vsel %vm1021_vm2, %v1570_v50, -inf }
 0x679   : > { %1218 = vadd.xlane.f32.xlu1 %v1217_v52 }
 0x67a   : > { %1576 = vmax.xlane.f32.xlu0 %v1575_v53 }
 0x67e   : > { %1215 = vadd.xlane.f32.xlu0 %v1214_v55  ;;  %v2859_v55 = vld [vmem:[%s3127_s27 + $0x30] sm:$0xff]  }
 0x682   : > { %1221 = vadd.xlane.f32.xlu0 %v1220_v41 }
 0x702   : > { %v1580_v57 = vpop.xlane.xlu1 %1579 }
 0x703   : > { %v1583_v48 = vsub.f32 %v1571_v43, %v1580_v57  ;;  %v1574_v40 = vpop.xlane.xlu0 %1573  ;;  %v2853_v43 = vld [vmem:[%s3127_s27] sm:$0xff]  }
 0x704   : > { %v1581_v51 = vsub.f32 %v1569_v46, %v1574_v40  ;;  %v2856_v46 = vld [vmem:[%s3127_s27 + $0x18] sm:$0xff]  }
 0x705   : > { %v1588_v60 = vmul.f32 1.442695, %v1583_v48 }
 0x706   : > { %v1584_v58 = vmul.f32 1.442695, %v1581_v51  ;;  %v1219_v61 = vpop.xlane.xlu1 %1218 }
 0x707   : > { %2931 = vpow2.f32 %v1588_v60  ;;  %v1577_v59 = vpop.xlane.xlu0 %1576 }
 0x708   : > { %v1582_v62 = vsub.f32 %v1570_v50, %v1577_v59  ;;  %2933 = vpow2.f32 %v1584_v58 }
 0x709   : > { %2935 = vrcp.f32 %v1219_v61 }
 0x70a   : > { %v1586_v63 = vmul.f32 1.442695, %v1582_v62 }
 0x70b   : > { %v1216_v0 = vpop.xlane.xlu0 %1215 }
 0x70c   : > { %2937 = vpow2.f32 %v1586_v63 }
 0x70d   : > { %2939 = vrcp.f32 %v1216_v0 }
 0x70f   : > { %v1222_v13 = vpop.xlane.xlu0 %1221 }
 0x710   : > { %2941 = vrcp.f32 %v1222_v13 }
 0x711   : > { %v2932_v1 = vpop.eup %2931 }
 0x712   : > { %v1596_v2 = vsel %vm1021_vm2, %v2932_v1, 0.0  ;;  %v2934_v3 = vpop.eup %2933 }
 0x713   : > { %1597 = vadd.xlane.f32.xlu1 %v1596_v2  ;;  %v2936_v4 = vpop.eup %2935  ;;  %v1590_v7 = vsel %vm1021_vm2, %v2934_v3, 0.0 }
 0x714   : > { %v1227_v11 = vmul.f32 %v2936_v4, %v2926_v47  ;;  %v2857_v47 = vld [vmem:[%s3127_s27 + $0x20] sm:$0xff]  }
 0x715   : > { %v2527_v4 = vld [vmem:[%s3563_s14] ss:$0 sm:$0xff] }
 0x716   : > { %v2938_v6 = vpop.eup %2937 }
 0x717   : > { %v2940_v8 = vpop.eup %2939  ;;  %1591 = vadd.xlane.f32.xlu1 %v1590_v7  ;;  %v1593_v9 = vsel %vm1021_vm2, %v2938_v6, 0.0 }
 0x718   : > { %1594 = vadd.xlane.f32.xlu0 %v1593_v9  ;;  %v1226_v10 = vmul.f32 %v2940_v8, %v2928_v54  ;;  %v2858_v54 = vld [vmem:[%s3127_s27 + $0x28] sm:$0xff]  }
 0x71a   : > { %v1229_v12 = vpack.c.bf16 %v1227_v11, %v1226_v10  ;;  %v2942_v22 = vpop.eup %2941 }
 0x71b   : > { %v1228_v25 = vmul.f32 %v2942_v22, %v2930_v56  ;;  %v2860_v56 = vld [vmem:[%s3127_s27 + $0x38] sm:$0xff]   ;;  %v2861_v22 = vld [vmem:[%s3151_s29] ss:$8 sps:$4 sm:$0xff]  }
 0x71c   : > { %2706 = vmatprep.mubr.msk.bf16.mxu0 %vm1021_vm2, %v1229_v12  ;;  %v2961_v12 = vld [vmem:[%s3178_s8] sm:$0xff] }
 0x71d   : > { %v1230_v28 = vpack.c.bf16 %v1228_v25, %v1228_v25  ;;  %v2866_v25 = vld [vmem:[%s3151_s29 + $0x14] ss:$8 sps:$4 sm:$0xff]  }
 0x728   : > { %1235 = vrot.lane.b32.xlu1 %v3271_v42, %s3004_s1 }
 0x72c   : > { %1607 = vrot.lane.b32.xlu1 %v3264_v19, %s3006_s7 }
 0x72e   : > { %1233 = vrot.lane.b32.xlu0 %v3264_v19, %s3004_s1 }
 0x730   : > { %1609 = vrot.lane.b32.xlu1 %v3271_v42, %s3006_s7 }
 0x7a0   : > { %v1598_v14 = vpop.xlane.xlu1 %1597 }
 0x7a4   : > { %v1592_v15 = vpop.xlane.xlu1 %1591 }
 0x7a5   : > { %2943 = vrcp.f32 %v1592_v15  ;;  %v1595_v17 = vpop.xlane.xlu0 %1594  ;;  %v2962_v15 = vld [vmem:[%s3178_s8 + $0x8] sm:$0xff] }
 0x7a6   : > { %2945 = vrcp.f32 %v1595_v17 }
 0x7a7   : > { %2947 = vrcp.f32 %v1598_v14 }
 0x7a8   : > { %v1236_v20 = vpop.permute.xlu1 %1235 }
 0x7a9   : > { %v1234_v24 = vpop.permute.xlu0 %1233  ;;  %v1245_v30 = vsel %vm1063_vm3, %v1236_v20, 0 }
 0x7aa   : > { %2702 = vmatprep.subr.bf16.mxu0 %v1234_v24 }
 0x7ab   : > { %2703 = vmatpush3.bf16.msra.mxu0 %v1234_v24  ;;  %v2863_v24 = vld [vmem:[%s3151_s29 + $0x4] ss:$8 sps:$4 sm:$0xff]  }
 0x7ac   : > { %2767 = vmatprep.subr.msk.bf16.mxu0 %vm1063_vm3, %v1236_v20  ;;  %v1608_v19 = vpop.permute.xlu1 %1607  ;;  %1976 = vmatprep.subr.bf16.mxu1 %v2863_v24 }
 0x7ad   : > { %1977 = vmatpush1.bf16.msra.mxu1 %v2861_v22 }
 0x7ae   : > { %1978 = vmatprep.subr.bf16.mxu1 %v2866_v25 }
 0x7af   : > { %v2944_v42 = vpop.eup %2943  ;;  %2705 = vmatpush3.bf16.msra.mxu0 %v1245_v30 }
 0x7b0   : > { %v2946_v31 = vpop.eup %2945  ;;  %2734 = vmatprep.subr.bf16.mxu0 %v1608_v19  ;;  %v1602_v32 = vmul.f32 %v2944_v42, %v2934_v3  ;;  %v1610_v35 = vpop.permute.xlu1 %1609 }
 0x7b1   : > { %v2948_v33 = vpop.eup %2947  ;;  %v1603_v34 = vmul.f32 %v2946_v31, %v2938_v6  ;;  %v1619_v38 = vsel %vm1063_vm3, %v1610_v35, 0 }
 0x7b2   : > { %2707 = vmatmul.mubr.msk.bf16.vlgmr.msra.gmra.mrb[12].mxu0 %vm1021_vm2, %v1230_v28  ;;  %v1604_v37 = vmul.f32 %v2948_v33, %v2932_v1 }
 0x7b3   : > { %2735 = vmatpush3.bf16.msra.mxu0 %v1608_v19  ;;  %v1605_v36 = vpack.c.bf16 %v1603_v34, %v1602_v32  ;;  %v2864_v19 = vld [vmem:[%s3151_s29 + $0x10] ss:$8 sps:$4 sm:$0xff]  }
 0x7b4   : > { %2773 = vmatprep.subr.msk.bf16.mxu0 %vm1063_vm3, %v1610_v35  ;;  %v1606_v39 = vpack.c.bf16 %v1604_v37, %v1604_v37  ;;  %1979 = vmatpush1.bf16.msra.mxu1 %v2864_v19 }
 0x7b5   : > { %2738 = vmatprep.mubr.msk.bf16.mxu0 %vm1021_vm2, %v1605_v36 }
 0x7b7   : > { %2737 = vmatpush3.bf16.msra.mxu0 %v1619_v38 }
 0x7b8   : > { %2742 = vmatprep.subr.bf16.mxu0 %v2853_v43 }
 0x7ba   : > { %2739 = vmatmul.mubr.msk.bf16.vlgmr.msra.gmra.mrb[16].mxu0 %vm1021_vm2, %v1606_v39  ;;  %v2869_v39 = vld [vmem:[%s3151_s29 + $0x24] ss:$8 sps:$4 sm:$0xff]  }
 0x7bb   : > { %2743 = vmatpush3.bf16.msra.mxu0 %v2853_v43  ;;  %v2867_v43 = vld [vmem:[%s3151_s29 + $0x20] ss:$8 sps:$4 sm:$0xff]   ;;  %1980 = vmatprep.subr.bf16.mxu1 %v2869_v39 }
 0x7bc   : > { %2744 = vmatprep.subr.bf16.mxu0 %v2854_v44  ;;  %1981 = vmatpush1.bf16.msra.mxu1 %v2867_v43 }
 0x7bf   : > { %2745 = vmatpush3.bf16.msra.mxu0 %v2854_v44  ;;  %v2872_v44 = vld [vmem:[%s3151_s29 + $0x34] ss:$8 sps:$4 sm:$0xff]  }
 0x7c0   : > { %2746 = vmatprep.subr.bf16.mxu0 %v2855_v45  ;;  %1982 = vmatprep.subr.bf16.mxu1 %v2872_v44 }
 0x7c3   : > { %2747 = vmatpush3.bf16.msra.mxu0 %v2855_v45  ;;  %v2870_v45 = vld [vmem:[%s3151_s29 + $0x30] ss:$8 sps:$4 sm:$0xff]  }
 0x7c4   : > { %2748 = vmatprep.subr.bf16.mxu0 %v2856_v46  ;;  %1983 = vmatpush1.bf16.msra.mxu1 %v2870_v45 }
 0x7c7   : > { %2749 = vmatpush3.bf16.msra.mxu0 %v2856_v46  ;;  %v2875_v46 = vld [vmem:[%s3151_s29 + $0x44] ss:$8 sps:$4 sm:$0xff]  }
 0x7c8   : > { %2750 = vmatprep.subr.bf16.mxu0 %v2857_v47  ;;  %1984 = vmatprep.subr.bf16.mxu1 %v2875_v46 }
 0x7cb   : > { %2751 = vmatpush3.bf16.msra.mxu0 %v2857_v47  ;;  %v2873_v47 = vld [vmem:[%s3151_s29 + $0x40] ss:$8 sps:$4 sm:$0xff]  }
 0x7cc   : > { %2752 = vmatprep.subr.bf16.mxu0 %v2858_v54  ;;  %1985 = vmatpush1.bf16.msra.mxu1 %v2873_v47 }
 0x7cf   : > { %2753 = vmatpush3.bf16.msra.mxu0 %v2858_v54  ;;  %v2884_v54 = vld [vmem:[%s3151_s29 + $0x74] ss:$8 sps:$4 sm:$0xff]  }
 0x7d0   : > { %2754 = vmatprep.subr.bf16.mxu0 %v2859_v55 }
 0x7d3   : > { %2755 = vmatpush3.bf16.msra.mxu0 %v2859_v55  ;;  %v2882_v55 = vld [vmem:[%s3151_s29 + $0x70] ss:$8 sps:$4 sm:$0xff]  }
 0x7d4   : > { %2756 = vmatprep.subr.bf16.mxu0 %v2860_v56 }
 0x7d7   : > { %2757 = vmatpush3.bf16.msra.mxu0 %v2860_v56  ;;  %v2885_v56 = vld [vmem:[%s3161_s0 + $0x40] sm:$0xff]  }
 0x7d8   : > { %2630 = vmatprep.subr.bf16.mxu0 %v2885_v56 }
 0x885   : > { %v2708_v49 = vpop.f32.mrb[12].mxu0 }
 0x886   : > { %v1281_v50 = vpop.f32.mrb[13].mxu0 }
 0x887   : > { %1298 = vrot.lane.b32.xlu0 %v1281_v50, %s3006_s7  ;;  %v2709_v52 = vpop.f32.mrb[14].mxu0  ;;  %v2876_v50 = vld [vmem:[%s3151_s29 + $0x50] ss:$8 sps:$4 sm:$0xff]  }
 0x888   : > { %v1284_v53 = vpop.f32.mrb[15].mxu0  ;;  %v2879_v52 = vld [vmem:[%s3151_s29 + $0x60] ss:$8 sps:$4 sm:$0xff]  }
 0x889   : > { %1300 = vrot.lane.b32.xlu1 %v1284_v53, %s3006_s7  ;;  %v2881_v53 = vld [vmem:[%s3151_s29 + $0x64] ss:$8 sps:$4 sm:$0xff]  }
 0x88b   : > { %1302 = vrot.lane.b32.xlu0 %v2708_v49, %s3006_s7  ;;  %v2878_v49 = vld [vmem:[%s3151_s29 + $0x54] ss:$8 sps:$4 sm:$0xff]  }
 0x88c   : > { %1986 = vmatprep.subr.bf16.mxu1 %v2878_v49 }
 0x88d   : > { %1485 = vrot.lane.b32.xlu1 %v3356_v18, %s3005_s2  ;;  %v2740_v41 = vpop.f32.mrb[16].mxu0  ;;  %1987 = vmatpush1.bf16.msra.mxu1 %v2876_v50 }
 0x88e   : > { %v1655_v57 = vpop.f32.mrb[17].mxu0  ;;  %1988 = vmatprep.subr.bf16.mxu1 %v2881_v53 }
 0x88f   : > { %1487 = vrot.lane.b32.xlu0 %v3358_v21, %s3005_s2  ;;  %v2741_v48 = vpop.f32.mrb[18].mxu0 }
 0x890   : > { %v1658_v40 = vpop.f32.mrb[19].mxu0  ;;  %v2888_v48 = vld [vmem:[%s3161_s0 + $0x8] sm:$0xff]  }
 0x891   : > { %1489 = vrot.lane.b32.xlu1 %v3354_v16, %s3005_s2  ;;  %1989 = vmatpush1.bf16.msra.mxu1 %v2879_v52 }
 0x892   : > { %1990 = vmatprep.subr.bf16.mxu1 %v2884_v54 }
 0x893   : > { %1672 = vrot.lane.b32.xlu0 %v1655_v57, %s3004_s1  ;;  %v2887_v57 = vld [vmem:[%s3161_s0 + $0x48] sm:$0xff]  }
 0x895   : > { %1674 = vrot.lane.b32.xlu1 %v1658_v40, %s3004_s1  ;;  %1991 = vmatpush1.bf16.msra.mxu1 %v2882_v55  ;;  %v2889_v40 = vld [vmem:[%s3161_s0 + $0x50] sm:$0xff]  }
 0x897   : > { %1676 = vrot.lane.b32.xlu0 %v2740_v41, %s3004_s1  ;;  %v2886_v41 = vld [vmem:[%s3161_s0] sm:$0xff]  }
 0x8f9   : > { %v1299_v18 = vpop.permute.xlu0 %1298 }
 0x8fa   : > { %1308 = vst.msk [vmem:[#allocation2] sm:$0xff] %vm1307_vm4, %v1299_v18  ;;  %v2890_v18 = vld [vmem:[%s3161_s0 + $0x10] sm:$0xff]  }
 0x8fb   : > { %v1301_v51 = vpop.permute.xlu1 %1300 }
 0x8fc   : > { %1309 = vst.msk [vmem:[#allocation2 + $0x8] sm:$0xff] %vm1307_vm4, %v1301_v51  ;;  %v2891_v51 = vld [vmem:[%s3161_s0 + $0x58] sm:$0xff]  }
 0x8fd   : > { %v1303_v21 = vpop.permute.xlu0 %1302 }
 0x8fe   : > { %1310 = vst.msk [vmem:[#allocation2 + $0x10] sm:$0xff] %vm1307_vm4, %v1303_v21  ;;  %v2892_v21 = vld [vmem:[%s3161_s0 + $0x18] sm:$0xff]  }
 0x8ff   : > { %v1486_v60 = vpop.permute.xlu1 %1485 }
 0x900   : > { %1495 = vst.msk [vmem:[#allocation2] sm:$0xff] %vm1494_vm5, %v1486_v60  ;;  %v2893_v60 = vld [vmem:[%s3161_s0 + $0x60] sm:$0xff]  }
 0x901   : > { %v1488_v58 = vpop.permute.xlu0 %1487 }
 0x902   : > { %1496 = vst.msk [vmem:[#allocation2 + $0x8] sm:$0xff] %vm1494_vm5, %v1488_v58  ;;  %v2894_v58 = vld [vmem:[%s3161_s0 + $0x20] sm:$0xff]  }
 0x903   : > { %v1490_v16 = vpop.permute.xlu1 %1489 }
 0x904   : > { %1497 = vst.msk [vmem:[#allocation2 + $0x10] sm:$0xff] %vm1494_vm5, %v1490_v16  ;;  %v2895_v16 = vld [vmem:[%s3161_s0 + $0x68] sm:$0xff]  }
 0x905   : > { %v1673_v59 = vpop.permute.xlu0 %1672 }
 0x906   : > { %1682 = vst.msk [vmem:[#allocation2] sm:$0xff] %vm1681_vm6, %v1673_v59 }
 0x907   : > { %v1675_v61 = vpop.permute.xlu1 %1674 }
 0x908   : > { %1683 = vst.msk [vmem:[#allocation2 + $0x8] sm:$0xff] %vm1681_vm6, %v1675_v61 }
 0x909   : > { %v1677_v62 = vpop.permute.xlu0 %1676 }
 0x90a   : > { %1684 = vst.msk [vmem:[#allocation2 + $0x10] sm:$0xff] %vm1681_vm6, %v1677_v62 }
 0x90d   : > { %v1685_v63 = vld [vmem:[#allocation2] sm:$0xff] }
 0x90f   : > { %v1686_v0 = vld [vmem:[#allocation2 + $0x8] sm:$0xff] }
 0x910   : > { %v1688_v1 = vpack.c.bf16 %v1686_v0, %v1685_v63 }
 0x911   : > { %v1687_v2 = vld [vmem:[#allocation2 + $0x10] sm:$0xff] }
 0x912   : > { %2758 = vmatprep.mubr.bf16.mxu0 %v1688_v1  ;;  %v1689_v3 = vpack.c.bf16 %v1687_v2, %v1687_v2 }
 0x914   : > { %2759 = vmatmul.mubr.bf16.vlgmr.msra.gmra.mrb[20].mxu0 %v1689_v3 }
 0x915   : > { %2631 = vmatpush3.bf16.msra.mxu0 %v2886_v41 }
 0x916   : > { %2632 = vmatprep.subr.bf16.mxu0 %v2887_v57 }
 0x919   : > { %2633 = vmatpush3.bf16.msra.mxu0 %v2888_v48 }
 0x91a   : > { %2634 = vmatprep.subr.bf16.mxu0 %v2889_v40 }
 0x91d   : > { %2635 = vmatpush3.bf16.msra.mxu0 %v2890_v18  ;;  %v2554_v18 = vld [vmem:[%s639_s24] ss:$0 sm:$0xff] }
 0x91e   : > { %2636 = vmatprep.subr.bf16.mxu0 %v2891_v51 }
 0x921   : > { %2637 = vmatpush3.bf16.msra.mxu0 %v2892_v21 }
 0x922   : > { %2638 = vmatprep.subr.bf16.mxu0 %v2893_v60 }
 0x925   : > { %2639 = vmatpush3.bf16.msra.mxu0 %v2894_v58 }
 0x926   : > { %2640 = vmatprep.subr.bf16.mxu0 %v2895_v16 }
 0x9e7   : > { %v2760_v6 = vpop.f32.mrb[20].mxu0 }
 0x9e8   : > { %v1795_v7 = vpop.f32.mrb[21].mxu0  ;;  %v1804_v14 = vadd.f32 %v2760_v6, %v2527_v4 }
 0x9e9   : > { %v1796_v8 = vadd.f32 %v2527_v4, %v1795_v7  ;;  %v2761_v9 = vpop.f32.mrb[22].mxu0  ;;  %v2536_v7 = vld [vmem:[%s3564_s23] ss:$0 sm:$0xff] }
 0x9ea   : > { %v1798_v10 = vpop.f32.mrb[23].mxu0  ;;  %v1811_v20 = vadd.f32 %v1804_v14, %v3204_v23 }
 0x9eb   : > { %v1799_v11 = vadd.f32 %v2527_v4, %v1798_v10  ;;  %v1809_v13 = vadd.f32 %v2961_v12, %v1796_v8  ;;  %v2537_v12 = vld [vmem:[%s3566_s12] ss:$0 sm:$0xff] }
 0x9ed   : > { %1814 = vadd.xlane.f32.xlu1 %v1809_v13  ;;  %v1810_v17 = vadd.f32 %v2962_v15, %v1799_v11 }
 0x9ef   : > { %1816 = vadd.xlane.f32.xlu0 %v1810_v17 }
 0x9f3   : > { %1818 = vadd.xlane.f32.xlu0 %v1811_v20 }
 0xa7a   : > { %v1815_v30 = vpop.xlane.xlu1 %1814 }
 0xa7b   : > { %v1821_v42 = vmul.f32 0.0078125, %v1815_v30  ;;  %v2896_v30 = vld [vmem:[%s3161_s0 + $0x28] sm:$0xff]  }
 0xa7c   : > { %v1817_v31 = vpop.xlane.xlu0 %1816  ;;  %2641 = vmatpush3.bf16.msra.mxu0 %v2896_v30 }
 0xa7d   : > { %v3423_v28 = vsub.f32 %v1809_v13, %v1821_v42  ;;  %v1822_v32 = vmul.f32 0.0078125, %v1817_v31  ;;  %v2897_v42 = vld [vmem:[%s3161_s0 + $0x70] sm:$0xff]  }
 0xa7e   : > { %v2898_v31 = vld [vmem:[%s3161_s0 + $0x30] sm:$0xff]   ;;  %2642 = vmatprep.subr.bf16.mxu0 %v2897_v42 }
 0xa7f   : > { %v3425_v23 = vsub.f32 %v1810_v17, %v1822_v32  ;;  %v1827_v33 = vmul.f32 %v3423_v28, %v3423_v28  ;;  %v2900_v32 = vld [vmem:[%s3161_s0 + $0x38] sm:$0xff]  }
 0xa80   : > { %v1819_v34 = vpop.xlane.xlu0 %1818  ;;  %2643 = vmatpush3.bf16.msra.mxu0 %v2898_v31 }
 0xa81   : > { %v1823_v35 = vmul.f32 0.0078125, %v1819_v34  ;;  %1830 = vadd.xlane.f32.xlu0 %v1827_v33  ;;  %v1828_v36 = vmul.f32 %v3425_v23, %v3425_v23 }
 0xa83   : > { %v3431_v37 = vsub.f32 %v1811_v20, %v1823_v35  ;;  %1832 = vadd.xlane.f32.xlu1 %v1828_v36 }
 0xa85   : > { %v1829_v38 = vmul.f32 %v3431_v37, %v3431_v37 }
 0xa87   : > { %1834 = vadd.xlane.f32.xlu0 %v1829_v38 }
 0xb0e   : > { %v1831_v59 = vpop.xlane.xlu0 %1830 }
 0xb0f   : > { %v1836_v61 = vmul.f32 0.0078125, %v1831_v59 }
 0xb10   : > { %v1833_v62 = vpop.xlane.xlu1 %1832 }
 0xb11   : > { %v1839_v63 = vadd.f32 1e-05, %v1836_v61  ;;  %v1837_v0 = vmul.f32 0.0078125, %v1833_v62 }
 0xb13   : > { %2949 = vrsqrt.f32 %v1839_v63  ;;  %v1840_v1 = vadd.f32 1e-05, %v1837_v0 }
 0xb14   : > { %v1835_v2 = vpop.xlane.xlu0 %1834 }
 0xb15   : > { %2951 = vrsqrt.f32 %v1840_v1  ;;  %v1838_v3 = vmul.f32 0.0078125, %v1835_v2 }
 0xb17   : > { %v1841_v4 = vadd.f32 1e-05, %v1838_v3 }
 0xb19   : > { %2953 = vrsqrt.f32 %v1841_v4 }
 0xb1d   : > { %v2950_v6 = vpop.eup %2949 }
 0xb1e   : > { %v1845_v8 = vmul.f32 %v2950_v6, %v3423_v28  ;;  %v2899_v28 = vld [vmem:[%s3161_s0 + $0x78] sm:$0xff]  }
 0xb1f   : > { %v2952_v9 = vpop.eup %2951  ;;  %2644 = vmatprep.subr.bf16.mxu0 %v2899_v28 }
 0xb20   : > { %v1846_v10 = vmul.f32 %v2952_v9, %v3425_v23  ;;  %v1854_v11 = vmul.f32 %v2536_v7, %v1845_v8  ;;  %2645 = vmatpush3.bf16.msra.mxu0 %v2900_v32  ;;  %v1884_v23 = vld [vmem:[%s3156_s13] sm:$0x3] }
 0xb21   : > { %v1893_v33 = vrot.slane %v1884_v23, %v707_v29 }
 0xb22   : > { %v1855_v13 = vmul.f32 %v2536_v7, %v1846_v10  ;;  %v1863_v15 = vadd.f32 %v2537_v12, %v1854_v11 }
 0xb23   : > { %v2954_v14 = vpop.eup %2953 }
 0xb24   : > { %v1864_v17 = vadd.f32 %v2537_v12, %v1855_v13  ;;  %v1847_v20 = vmul.f32 %v2954_v14, %v3431_v37 }
 0xb26   : > { %v1866_v22 = vpack.c.bf16 %v1864_v17, %v1863_v15  ;;  %v1856_v24 = vmul.f32 %v2536_v7, %v1847_v20 }
 0xb28   : > { %2009 = vmatmul.mubr.bf16.vlgmr.msra.gmra.mrb[24].mxu1 %v1866_v22  ;;  %v3472_v25 = vadd.f32 %v2537_v12, %v1856_v24 }
 0xb29   : > { %2018 = vmatprep.mubr.bf16.mxu1 %v3003_v5  ;;  %v1889_v5 = vrot.slane %v1884_v23, %v703_v27 }
 0xb2a   : > { %v1867_v19 = vpack.c.bf16 %v3472_v25, %v3472_v25 }
 0xb30   : > { %2019 = vmatmul.mubr.bf16.gmra.mrb[28].mxu1 %v1867_v19 }
 0xbfb   : > { %v2010_v34 = vpop.f32.mrb[24].mxu1 }
 0xbfc   : > { %v2011_v35 = vadd.f32 %v2010_v34, %v1889_v5  ;;  %v2012_v36 = vpop.f32.mrb[25].mxu1  ;;  %v2571_v34 = vld [vmem:[%s642_s3] ss:$0 sm:$0xff] }
 0xbfd   : > { %v2013_v37 = vadd.f32 %v2012_v36, %v1893_v33  ;;  %v2014_v38 = vpop.f32.mrb[26].mxu1 }
 0xbfe   : > { %v2015_v39 = vadd.f32 %v2014_v38, %v1889_v5  ;;  %v2016_v43 = vpop.f32.mrb[27].mxu1  ;;  %v2027_v45 = vmax.f32 %v2011_v35, 0.0 }
 0xbff   : > { %v2017_v44 = vadd.f32 %v2016_v43, %v1893_v33  ;;  %v2028_v47 = vmax.f32 %v2013_v37, 0.0  ;;  %v2572_v37 = vld [vmem:[%s645_s6] ss:$0 sm:$0xff] }
 0xc00   : > { %v2029_v46 = vmax.f32 %v2015_v39, 0.0 }
 0xc01   : > { %v2030_v49 = vmax.f32 %v2017_v44, 0.0 }
 0xc02   : > { %v2033_v50 = vpack.c.bf16 %v2029_v46, %v2027_v45 }
 0xc03   : > { %v2034_v52 = vpack.c.bf16 %v2030_v49, %v2028_v47  ;;  %v2020_v53 = vpop.f32.mrb[28].mxu1 }
 0xc04   : > { %v2021_v27 = vadd.f32 %v2020_v53, %v1889_v5  ;;  %v2022_v54 = vpop.f32.mrb[29].mxu1 }
 0xc05   : > { %v2023_v26 = vadd.f32 %v2022_v54, %v1893_v33  ;;  %v2024_v29 = vpop.f32.mrb[30].mxu1  ;;  %2204 = vmatprep.mubr.bf16.mxu0 %v2034_v52 }
 0xc06   : > { %v2025_v55 = vpop.f32.mrb[31].mxu1  ;;  %2205 = vmatmul.mubr.bf16.vlgmr.msra.gmra.mrb[24].mxu0 %v2033_v50  ;;  %v2031_v41 = vmax.f32 %v2021_v27, 0.0 }
 0xc07   : > { %v2032_v56 = vmax.f32 %v2023_v26, 0.0 }
 0xc08   : > { %v2035_v48 = vpack.c.bf16 %v2031_v41, %v2031_v41 }
 0xc09   : > { %v2036_v57 = vpack.c.bf16 %v2032_v56, %v2032_v56 }
 0xc0b   : > { %2212 = vmatprep.mubr.bf16.mxu0 %v2036_v57 }
 0xc0e   : > { %2213 = vmatmul.mubr.bf16.gmra.mrb[28].mxu0 %v2035_v48 }
 0xcd9   : > { %v2646_v40 = vpop.f32.mrb[24].mxu0 }
 0xcda   : > { %v2647_v51 = vpop.f32.mrb[25].mxu0 }
 0xcdb   : > { %v2648_v21 = vadd.f32 %v2647_v51, %v2646_v40  ;;  %v2649_v60 = vpop.f32.mrb[26].mxu0 }
 0xcdc   : > { %v2650_v58 = vpop.f32.mrb[27].mxu0 }
 0xcdd   : > { %v2207_v16 = vadd.f32 %v2648_v21, %v2554_v18  ;;  %v2651_v59 = vadd.f32 %v2650_v58, %v2649_v60 }
 0xcdf   : > { %v2210_v61 = vadd.f32 %v2651_v59, %v2554_v18  ;;  %v2220_v62 = vadd.f32 %v2207_v16, %v1863_v15 }
 0xce1   : > { %v2652_v63 = vpop.f32.mrb[28].mxu0  ;;  %2225 = vadd.xlane.f32.xlu1 %v2220_v62  ;;  %v2221_v0 = vadd.f32 %v2210_v61, %v1864_v17 }
 0xce2   : > { %v2653_v1 = vpop.f32.mrb[29].mxu0 }
 0xce3   : > { %v2654_v2 = vadd.f32 %v2653_v1, %v2652_v63  ;;  %v2655_v3 = vpop.f32.mrb[30].mxu0  ;;  %2227 = vadd.xlane.f32.xlu0 %v2221_v0 }
 0xce4   : > { %v2656_v4 = vpop.f32.mrb[31].mxu0 }
 0xce5   : > { %v2215_v6 = vadd.f32 %v2654_v2, %v2554_v18 }
 0xce7   : > { %v2222_v7 = vadd.f32 %v2215_v6, %v3472_v25 }
 0xce9   : > { %2229 = vadd.xlane.f32.xlu1 %v2222_v7 }
 0xd6e   : > { %v2226_v8 = vpop.xlane.xlu1 %2225 }
 0xd6f   : > { %v2231_v9 = vmul.f32 0.0078125, %v2226_v8 }
 0xd70   : > { %v2228_v10 = vpop.xlane.xlu0 %2227 }
 0xd71   : > { %v2234_v11 = vsub.f32 %v2220_v62, %v2231_v9  ;;  %v2232_v12 = vmul.f32 0.0078125, %v2228_v10 }
 0xd73   : > { %v2235_v13 = vsub.f32 %v2221_v0, %v2232_v12  ;;  %v2237_v14 = vmul.f32 %v2234_v11, %v2234_v11 }
 0xd75   : > { %2240 = vadd.xlane.f32.xlu0 %v2237_v14  ;;  %v2238_v15 = vmul.f32 %v2235_v13, %v2235_v13 }
 0xd76   : > { %v2230_v20 = vpop.xlane.xlu1 %2229 }
 0xd77   : > { %v2233_v17 = vmul.f32 0.0078125, %v2230_v20  ;;  %2242 = vadd.xlane.f32.xlu1 %v2238_v15 }
 0xd79   : > { %v2236_v22 = vsub.f32 %v2222_v7, %v2233_v17 }
 0xd7b   : > { %v2239_v24 = vmul.f32 %v2236_v22, %v2236_v22 }
 0xd7d   : > { %2244 = vadd.xlane.f32.xlu0 %v2239_v24 }
 0xe02   : > { %v2241_v19 = vpop.xlane.xlu0 %2240 }
 0xe03   : > { %v2246_v25 = vmul.f32 0.0078125, %v2241_v19 }
 0xe04   : > { %v2243_v30 = vpop.xlane.xlu1 %2242 }
 0xe05   : > { %v2249_v42 = vadd.f32 1e-05, %v2246_v25  ;;  %v2247_v31 = vmul.f32 0.0078125, %v2243_v30 }
 0xe07   : > { %2955 = vrsqrt.f32 %v2249_v42  ;;  %v2250_v28 = vadd.f32 1e-05, %v2247_v31 }
 0xe09   : > { %2957 = vrsqrt.f32 %v2250_v28 }
 0xe0a   : > { %v2245_v32 = vpop.xlane.xlu0 %2244 }
 0xe0b   : > { %v2248_v23 = vmul.f32 0.0078125, %v2245_v32 }
 0xe0d   : > { %v2251_v5 = vadd.f32 1e-05, %v2248_v23 }
 0xe0f   : > { %2959 = vrsqrt.f32 %v2251_v5 }
 0xe11   : > { %v2956_v33 = vpop.eup %2955 }
 0xe12   : > { %v2255_v35 = vmul.f32 %v2956_v33, %v2234_v11 }
 0xe13   : > { %v2958_v36 = vpop.eup %2957 }
 0xe14   : > { %v2264_v38 = vmul.f32 %v2571_v34, %v2255_v35  ;;  %v2256_v39 = vmul.f32 %v2958_v36, %v2235_v13 }
 0xe16   : > { %v2273_v43 = vadd.f32 %v2572_v37, %v2264_v38  ;;  %v2265_v44 = vmul.f32 %v2571_v34, %v2256_v39 }
 0xe18   : > { %2276 = vst [vmem:[%s3178_s8] sm:$0xff] %v2273_v43  ;;  %v2274_v45 = vadd.f32 %v2572_v37, %v2265_v44 }
 0xe19   : > { %v2960_v46 = vpop.eup %2959 }
 0xe1a   : > { %2277 = vst [vmem:[%s3178_s8 + $0x8] sm:$0xff] %v2274_v45  ;;  %v2257_v47 = vmul.f32 %v2960_v46, %v2236_v22 }
 0xe1c   : > { %v2266_v49 = vmul.f32 %v2571_v34, %v2257_v47 }
 0xe1e   : > { %v2275_v50 = vadd.f32 %v2572_v37, %v2266_v49 }
 0xe20   : > { %2278 = vst [vmem:[%s3178_s8 + $0x10] sm:$0xff] %v2275_v50 }
 0xe21 PF: > { %s3568_s3 = sld [smem:[#allocation6_spill]]  ;;  %s3569_s25 = sld [smem:[#allocation4_spill]] }
 0xe22   : > { %s3570_s26 = sld [smem:[#allocation5_spill]]  ;;  %s3571_s27 = sld [smem:[#allocation7_spill]] }
 0xe23   : > { %s3572_s28 = sld [smem:[#allocation8_spill]] }
 0xe27   : > { %s23_s29 = sadd.s32 1, %s3568_s3  }
 0xe28   : > { %p20_p8 = scmp.ge.s32.totalorder %s23_s29, 6  }
 0xe2a   :  { %22 = sbr.rel (!%p20_p8) target bundleno = 10 (0xa), region = 142 }

</bundles_post_ra>
